<compile_context>
chip_gen: v5e
topology: v5e:2x2
jax: 0.10.0
libtpu: 0.0.40
codegen_flags: <defaults>
</compile_context>

<pallas_src>
import functools

import jax
import jax.numpy as jnp
from jax.experimental import pallas as pl
from jax.experimental.pallas import tpu as pltpu

HIDDEN = 2048
_LANE = 128
_SUBLANE = 8
_MIB = 1024 * 1024


def _round_up(x, m):
    return (x + m - 1) // m * m


@functools.lru_cache(maxsize=None)
def _vmem_capacity_bytes():
    """Physical VMEM per TensorCore; conservative default if the query fails."""
    try:
        return int(pltpu.get_tpu_info().vmem_capacity_bytes)
    except Exception:
        return 64 * _MIB  # v7x-style worst case


def _vmem_budgets():
    """Returns (vmem_limit_bytes for Mosaic, resident-path total-VMEM budget)."""
    phys = _vmem_capacity_bytes()
    if phys >= 96 * _MIB:        # v5e / v6e: 128 MiB physical VMEM
        return 96 * _MIB, 64 * _MIB
    else:                        # v7x: 64 MiB per TensorCore
        return 56 * _MIB, 40 * _MIB


# ---------------------------------------------------------------------------
# Primary kernel: weights resident in VMEM; grid over (M tiles, N tiles).
# ---------------------------------------------------------------------------
def _ffn_resident_kernel(x_ref, w1_ref, b1_ref, w2_ref, b2_ref, o_ref):
    x = x_ref[...].astype(jnp.bfloat16)
    h = jnp.dot(x, w1_ref[...], preferred_element_type=jnp.float32)
    h = jnp.maximum(h + b1_ref[...], 0.0)
    out = jnp.dot(h.astype(jnp.bfloat16), w2_ref[...],
                  preferred_element_type=jnp.float32)
    out = jnp.maximum(out + b2_ref[...], 0.0)
    o_ref[...] = out.astype(o_ref.dtype)


# ---------------------------------------------------------------------------
# Fallback kernel: hidden dim tiled (innermost, "arbitrary"), f32 accumulator.
# ---------------------------------------------------------------------------
def _ffn_hidden_tiled_kernel(x_ref, w1_ref, b1_ref, w2_ref, b2_ref, o_ref, acc_ref):
    k = pl.program_id(1)

    @pl.when(k == 0)
    def _():
        acc_ref[...] = jnp.zeros_like(acc_ref)

    x = x_ref[...].astype(jnp.bfloat16)
    h = jnp.dot(x, w1_ref[...], preferred_element_type=jnp.float32)
    h = jnp.maximum(h + b1_ref[...], 0.0)
    acc_ref[...] += jnp.dot(h.astype(jnp.bfloat16), w2_ref[...],
                            preferred_element_type=jnp.float32)

    @pl.when(k == pl.num_programs(1) - 1)
    def _():
        out = jnp.maximum(acc_ref[...] + b2_ref[...], 0.0)
        o_ref[...] = out.astype(o_ref.dtype)


# ---------------------------------------------------------------------------
# Parameter preparation (pad to lane-dense multiples of 128, cast once).
# ---------------------------------------------------------------------------
def prepare_params(w1, b1, w2, b2):
    d_in, hid = w1.shape
    d_out = w2.shape[1]
    d_in_p = _round_up(d_in, _LANE)
    hid_p = _round_up(hid, _LANE)
    d_out_p = _round_up(d_out, _LANE)
    w1_p = jnp.pad(w1.astype(jnp.bfloat16), ((0, d_in_p - d_in), (0, hid_p - hid)))
    b1_p = jnp.pad(b1.reshape(1, hid).astype(jnp.float32), ((0, 0), (0, hid_p - hid)))
    w2_p = jnp.pad(w2.astype(jnp.bfloat16), ((0, hid_p - hid), (0, d_out_p - d_out)))
    b2_p = jnp.pad(b2.reshape(1, d_out).astype(jnp.float32),
                   ((0, 0), (0, d_out_p - d_out)))
    return {"w1": w1_p, "b1": b1_p, "w2": w2_p, "b2": b2_p,
            "d_in": d_in, "d_out": d_out}


def ffn_forward(x, params, *, tile_m=512, tile_h=512):
    return _ffn_forward_impl(
        x, params["w1"], params["b1"], params["w2"], params["b2"],
        d_out=params["d_out"], tile_m=tile_m, tile_h=tile_h)


@functools.partial(jax.jit, static_argnames=("d_out", "tile_m", "tile_h"))
def _ffn_forward_impl(x, w1_p, b1_p, w2_p, b2_p, *, d_out, tile_m, tile_h):
    orig_shape = x.shape
    d_in = orig_shape[-1]
    d_in_p, hid_p = w1_p.shape
    d_out_p = w2_p.shape[1]
    out_dtype = x.dtype

    x2d = x.reshape(-1, d_in)
    m = x2d.shape[0]

    vmem_limit, resident_budget = _vmem_budgets()

    # --- decide resident vs hidden-tiled path (Buffered(1) weight accounting) ---
    tm_res = min(tile_m, max(_LANE, _round_up(m, _SUBLANE)))
    weight_bytes = (w1_p.size + w2_p.size) * 2            # bf16, single-buffered
    bias_bytes = (b1_p.size + b2_p.size) * 4
    x_elem = x2d.dtype.itemsize
    out_elem = jnp.dtype(out_dtype).itemsize
    act_bytes = (2 * tm_res * d_in_p * x_elem              # x tiles (double-buf)
                 + 2 * tm_res * d_out_p * out_elem         # out tiles (double-buf)
                 + tm_res * hid_p * 6                      # h f32 + h bf16
                 + tm_res * d_out_p * 4)                   # f32 out intermediate
    resident_fits = (weight_bytes + bias_bytes + act_bytes) <= resident_budget

    if resident_fits:
        tm = tm_res
    else:
        tm = 1024 if _vmem_capacity_bytes() >= 96 * _MIB else 512
        tm = min(tm, max(_LANE, _round_up(m, _SUBLANE)))
        while tm > _LANE and tm * d_out_p * 4 > 16 * _MIB:   # cap acc scratch
            tm = _round_up(max(_LANE, tm // 2), _SUBLANE)
        th = tile_h if (hid_p % tile_h == 0) else _LANE

    m_p = _round_up(m, tm)
    m_tiles = m_p // tm

    # x: pass through un-padded / un-cast when already aligned; else bf16-pad.
    if d_in_p == d_in and m_p == m:
        x_in = x2d
    else:
        x_in = jnp.pad(x2d.astype(jnp.bfloat16),
                       ((0, m_p - m), (0, d_in_p - d_in)))

    flops = 2 * m_p * hid_p * (d_in_p + d_out_p)
    bytes_accessed = (x_in.size * x_in.dtype.itemsize + weight_bytes + bias_bytes
                      + m_p * d_out_p * out_elem)
    cost = pl.CostEstimate(flops=flops, transcendentals=0,
                           bytes_accessed=bytes_accessed)

    if resident_fits:
        # ----------------- single-pass, weights-resident path ----------------
        # N-split for decode-like shapes so a second TensorCore gets work.
        n_tiles = 2 if (m_tiles == 1 and m <= 256 and d_out_p % (2 * _LANE) == 0) else 1
        tn = d_out_p // n_tiles

        w1_spec = pl.BlockSpec((d_in_p, hid_p), lambda i, j: (0, 0),
                               pipeline_mode=pl.Buffered(1))
        b1_spec = pl.BlockSpec((1, hid_p), lambda i, j: (0, 0),
                               pipeline_mode=pl.Buffered(1))
        if n_tiles == 1:
            w2_spec = pl.BlockSpec((hid_p, tn), lambda i, j: (0, 0),
                                   pipeline_mode=pl.Buffered(1))
            b2_spec = pl.BlockSpec((1, tn), lambda i, j: (0, 0),
                                   pipeline_mode=pl.Buffered(1))
        else:
            w2_spec = pl.BlockSpec((hid_p, tn), lambda i, j: (0, j))
            b2_spec = pl.BlockSpec((1, tn), lambda i, j: (0, j))

        out_p = pl.pallas_call(
            _ffn_resident_kernel,
            out_shape=jax.ShapeDtypeStruct((m_p, d_out_p), out_dtype),
            grid_spec=pltpu.PrefetchScalarGridSpec(
                num_scalar_prefetch=0,
                grid=(m_tiles, n_tiles),
                in_specs=[
                    pl.BlockSpec((tm, d_in_p), lambda i, j: (i, 0)),  # x tile
                    w1_spec, b1_spec, w2_spec, b2_spec,
                ],
                out_specs=pl.BlockSpec((tm, tn), lambda i, j: (i, j)),
            ),
            compiler_params=pltpu.CompilerParams(
                dimension_semantics=("parallel", "parallel"),
                vmem_limit_bytes=vmem_limit,
            ),
            cost_estimate=cost,
        )(x_in, w1_p, b1_p, w2_p, b2_p)
    else:
        # ------------- fallback: hidden-dim reduction grid (innermost) -------
        grid = (m_tiles, hid_p // th)
        out_p = pl.pallas_call(
            _ffn_hidden_tiled_kernel,
            out_shape=jax.ShapeDtypeStruct((m_p, d_out_p), out_dtype),
            grid_spec=pltpu.PrefetchScalarGridSpec(
                num_scalar_prefetch=0,
                grid=grid,
                in_specs=[
                    pl.BlockSpec((tm, d_in_p), lambda i, k: (i, 0)),     # x tile
                    pl.BlockSpec((d_in_p, th), lambda i, k: (0, k)),     # W1 slice
                    pl.BlockSpec((1, th), lambda i, k: (0, k)),          # b1 slice
                    pl.BlockSpec((th, d_out_p), lambda i, k: (k, 0)),    # W2 slice
                    pl.BlockSpec((1, d_out_p), lambda i, k: (0, 0),
                                 pipeline_mode=pl.Buffered(1)),          # b2
                ],
                out_specs=pl.BlockSpec((tm, d_out_p), lambda i, k: (i, 0)),
                scratch_shapes=[pltpu.VMEM((tm, d_out_p), jnp.float32)],
            ),
            compiler_params=pltpu.CompilerParams(
                dimension_semantics=("parallel", "arbitrary"),
                vmem_limit_bytes=vmem_limit,
            ),
            cost_estimate=cost,
        )(x_in, w1_p, b1_p, w2_p, b2_p)

    out2d = out_p[:m, :d_out]
    return out2d.reshape(*orig_shape[:-1], d_out)


def init_params(key, input_dim, output_dim):
    """Deterministic init mimicking nn.Linear default (U(-1/sqrt(fan_in), ...))."""
    k1, k2, k3, k4 = jax.random.split(key, 4)
    lim1 = 1.0 / (input_dim ** 0.5)
    lim2 = 1.0 / (HIDDEN ** 0.5)
    w1 = jax.random.uniform(k1, (input_dim, HIDDEN), jnp.float32, -lim1, lim1)
    b1 = jax.random.uniform(k2, (HIDDEN,), jnp.float32, -lim1, lim1)
    w2 = jax.random.uniform(k3, (HIDDEN, output_dim), jnp.float32, -lim2, lim2)
    b2 = jax.random.uniform(k4, (output_dim,), jnp.float32, -lim2, lim2)
    return w1, b1, w2, b2


def ffn_reference(x, w1, b1, w2, b2):
    """Pure-JAX reference with the same bf16-matmul / f32-accumulate recipe."""
    xb = x.astype(jnp.bfloat16)
    w1b = w1.astype(jnp.bfloat16)
    w2b = w2.astype(jnp.bfloat16)
    h = jnp.dot(xb, w1b, preferred_element_type=jnp.float32) + b1
    h = jnp.maximum(h, 0.0)
    out = jnp.dot(h.astype(jnp.bfloat16), w2b,
                  preferred_element_type=jnp.float32) + b2
    return jnp.maximum(out, 0.0)


if __name__ == "__main__":
    key = jax.random.PRNGKey(0)
    k_param, k_x = jax.random.split(key)

    batch, seq, input_dim, output_dim = 2, 8, 32, 32
    w1, b1, w2, b2 = init_params(k_param, input_dim, output_dim)
    params = prepare_params(w1, b1, w2, b2)     # pad + cast once, outside forward

    x = jax.random.normal(k_x, (batch, seq, input_dim), jnp.float32)

    out = ffn_forward(x, params)
    out = jax.block_until_ready(out)

    ref = ffn_reference(x.reshape(-1, input_dim), w1, b1, w2, b2).reshape(out.shape)
    assert out.shape == (batch, seq, output_dim), out.shape
    assert jnp.allclose(out, ref.astype(out.dtype), atol=1e-2, rtol=1e-2), \
        "mismatch vs reference"

    print("KERNEL_OK")
</pallas_src>

<mosaic_0001>
module attributes {stable_mosaic.version = 11 : i64} {
  func.func @_ffn_resident_kernel(%arg0: i32, %arg1: i32, %arg2: memref<128x128xbf16, #tpu.memory_space<vmem>>, %arg3: memref<128x2048xbf16, #tpu.memory_space<vmem>>, %arg4: memref<1x2048xf32, #tpu.memory_space<vmem>>, %arg5: memref<2048x128xbf16, #tpu.memory_space<vmem>>, %arg6: memref<1x128xf32, #tpu.memory_space<vmem>>, %arg7: memref<128x128xf32, #tpu.memory_space<vmem>>) attributes {dimension_semantics = [#tpu.dimension_semantics<parallel>, #tpu.dimension_semantics<parallel>], iteration_bounds = array<i64: 1, 1>, scalar_prefetch = 0 : i64, scratch_operands = 0 : i64, tpu.core_type = #tpu.core_type<tc>, window_params = [{transform_indices = @transform_0, window_bounds = array<i64: 128, 128>}, {pipeline_mode = #tpu.pipeline_mode<synchronous>, transform_indices = @transform_1, window_bounds = array<i64: 128, 2048>}, {pipeline_mode = #tpu.pipeline_mode<synchronous>, transform_indices = @transform_2, window_bounds = array<i64: 1, 2048>}, {pipeline_mode = #tpu.pipeline_mode<synchronous>, transform_indices = @transform_3, window_bounds = array<i64: 2048, 128>}, {pipeline_mode = #tpu.pipeline_mode<synchronous>, transform_indices = @transform_4, window_bounds = array<i64: 1, 128>}, {transform_indices = @transform_5, window_bounds = array<i64: 128, 128>}]} {
    %c0 = arith.constant 0 : index
    %c0_0 = arith.constant 0 : index
    %0 = vector.load %arg2[%c0, %c0_0] : memref<128x128xbf16, #tpu.memory_space<vmem>>, vector<128x128xbf16>
    %c0_1 = arith.constant 0 : index
    %c0_2 = arith.constant 0 : index
    %1 = vector.load %arg3[%c0_1, %c0_2] : memref<128x2048xbf16, #tpu.memory_space<vmem>>, vector<128x2048xbf16>
    %cst = arith.constant dense<0.000000e+00> : vector<128x2048xf32>
    %2 = tpu.matmul %0, %1, %cst {dimension_numbers = #tpu.dot_dimension_numbers<[1], [0], [0], [1], [0, 0, 1, 1], [], []>} : vector<128x128xbf16>, vector<128x2048xbf16>, vector<128x2048xf32> -> vector<128x2048xf32>
    %c0_3 = arith.constant 0 : index
    %c0_4 = arith.constant 0 : index
    %3 = vector.load %arg4[%c0_3, %c0_4] : memref<1x2048xf32, #tpu.memory_space<vmem>>, vector<1x2048xf32>
    %4 = vector.broadcast %3 : vector<1x2048xf32> to vector<128x2048xf32>
    %5 = arith.addf %2, %4 : vector<128x2048xf32>
    %cst_5 = arith.constant 0.000000e+00 : f32
    %6 = vector.broadcast %cst_5 : f32 to vector<128x2048xf32>
    %7 = arith.maximumf %5, %6 : vector<128x2048xf32>
    %8 = arith.truncf %7 : vector<128x2048xf32> to vector<128x2048xbf16>
    %c0_6 = arith.constant 0 : index
    %c0_7 = arith.constant 0 : index
    %9 = vector.load %arg5[%c0_6, %c0_7] : memref<2048x128xbf16, #tpu.memory_space<vmem>>, vector<2048x128xbf16>
    %cst_8 = arith.constant dense<0.000000e+00> : vector<128x128xf32>
    %10 = tpu.matmul %8, %9, %cst_8 {dimension_numbers = #tpu.dot_dimension_numbers<[1], [0], [0], [1], [0, 0, 1, 1], [], []>} : vector<128x2048xbf16>, vector<2048x128xbf16>, vector<128x128xf32> -> vector<128x128xf32>
    %c0_9 = arith.constant 0 : index
    %c0_10 = arith.constant 0 : index
    %11 = vector.load %arg6[%c0_9, %c0_10] : memref<1x128xf32, #tpu.memory_space<vmem>>, vector<1x128xf32>
    %12 = vector.broadcast %11 : vector<1x128xf32> to vector<128x128xf32>
    %13 = arith.addf %10, %12 : vector<128x128xf32>
    %cst_11 = arith.constant 0.000000e+00 : f32
    %14 = vector.broadcast %cst_11 : f32 to vector<128x128xf32>
    %15 = arith.maximumf %13, %14 : vector<128x128xf32>
    %c0_12 = arith.constant 0 : index
    %c0_13 = arith.constant 0 : index
    %16 = vector.load %arg7[%c0_12, %c0_13] : memref<128x128xf32, #tpu.memory_space<vmem>>, vector<128x128xf32>
    tpu.vector_store %arg7[%c0_12, %c0_13], %15 {strides = array<i32>} : memref<128x128xf32, #tpu.memory_space<vmem>>, vector<128x128xf32>,
    return
  }
  func.func @transform_0(%arg0: i32, %arg1: i32) -> (i32, i32) {
    %c0_i32 = arith.constant 0 : i32
    %c0_i32_0 = arith.constant 0 : i32
    return %arg0, %c0_i32 : i32, i32
  }
  func.func @transform_1(%arg0: i32, %arg1: i32) -> (i32, i32) {
    %c0_i32 = arith.constant 0 : i32
    %c0_i32_0 = arith.constant 0 : i32
    %c0_i32_1 = arith.constant 0 : i32
    return %c0_i32, %c0_i32_0 : i32, i32
  }
  func.func @transform_2(%arg0: i32, %arg1: i32) -> (i32, i32) {
    %c0_i32 = arith.constant 0 : i32
    %c0_i32_0 = arith.constant 0 : i32
    %c0_i32_1 = arith.constant 0 : i32
    return %c0_i32, %c0_i32_0 : i32, i32
  }
  func.func @transform_3(%arg0: i32, %arg1: i32) -> (i32, i32) {
    %c0_i32 = arith.constant 0 : i32
    %c0_i32_0 = arith.constant 0 : i32
    %c0_i32_1 = arith.constant 0 : i32
    return %c0_i32, %c0_i32_0 : i32, i32
  }
  func.func @transform_4(%arg0: i32, %arg1: i32) -> (i32, i32) {
    %c0_i32 = arith.constant 0 : i32
    %c0_i32_0 = arith.constant 0 : i32
    %c0_i32_1 = arith.constant 0 : i32
    return %c0_i32, %c0_i32_0 : i32, i32
  }
  func.func @transform_5(%arg0: i32, %arg1: i32) -> (i32, i32) {
    %c0_i32 = arith.constant 0 : i32
    return %arg0, %arg1 : i32, i32
  }
}

</mosaic_0001>

<bundles_post_ra>
// kernel: _ffn_forward_impl.1
= control target key start
LH: loop header
LB: loop body
LE: loop exit
PB: predicated region body
PF: predicated region fallthrough
CT: control target
= control target key end

     0   :  { %10 = vsyncpa [#allocation3], 0  ;;  %s6484_s0 = inlined_call_operand.vmem [shape: bf16[128,128], index: 0, kind: input, shape index: {}]   ;;  %s6485_s1 = inlined_call_operand.hbm [shape: bf16[128,2048], index: 1, kind: input, shape index: {}]   ;;  %s6486_s2 = inlined_call_operand.vmem [shape: f32[1,2048], index: 2, kind: input, shape index: {}]   ;;  %s6487_s3 = inlined_call_operand.hbm [shape: bf16[2048,128], index: 3, kind: input, shape index: {}]   ;;  %s6488_s4 = inlined_call_operand.vmem [shape: f32[1,128], index: 4, kind: input, shape index: {}]   ;;  %s6489_s5 = inlined_call_operand.vmem [shape: f32[128,128], index: 5, kind: output, shape index: {}]  }
   0x1   :  { %s18_s20 = sshll.u32 %s6485_s1, 4  ;;  %s19_s20 = int_to_ptr.hbm [resolvable:$true] %s18_s20 }
   0x2   :  { %11 = vsyncpa [#allocation5], 0  ;;  %s5324_s21 = smov [#allocation2]   ;;  %s33_s25 = sshll.u32 %s6487_s3, 4  ;;  %s34_s25 = int_to_ptr.hbm [resolvable:$true] %s33_s25 }
   0x3   :  { %s20_s22 = sshll.u32 %s5324_s21, 4  ;;  %s5325_s26 = smov 1024   ;;  %s21_s22 = int_to_ptr.vmem [resolvable:$true] %s20_s22 }
   0x4   :  { %s5326_s27 = smov 64   ;;  %s5327_s28 = smov [#allocation4]  }
   0x5   :  { %26 = dma.hbm_to_vmem [thread:$0]  %s19_s20, 16384, %s21_s22, [#allocation3], %s5325_s26, %s5325_s26, %s5326_s27  }
   0x6   :  { %s35_s29 = sshll.u32 %s5327_s28, 4  ;;  %s5328_s30 = smov 4   ;;  %s36_s29 = int_to_ptr.vmem [resolvable:$true] %s35_s29 }
   0x7   :  { %41 = dma.hbm_to_vmem [thread:$0]  %s34_s25, 16384, %s36_s29, [#allocation5], %s5326_s27, %s5326_s27, %s5328_s30  }
   0x8   :  { %5320 = dma.done.wait [#allocation3], 16384  }
   0x9   :  { %5321 = vsyncadd [#allocation3], 4294950912 }
   0xa   :  { %5322 = dma.done.wait [#allocation5], 16384  }
   0xb   :  { %5323 = vsyncadd [#allocation5], 4294950912  ;;  %v4420_v0 = vld [vmem:[#allocation2 + $0x380] sm:$0xf]  ;;  %v5114_v2 = vld [vmem:[#allocation2 + $0x384] sm:$0xf] }
   0xc   :  { %v5122_v1 = vld [vmem:[#allocation2 + $0x3bc] sm:$0xf0]  ;;  %v4422_v4 = vld [vmem:[#allocation2 + $0x3c0] sm:$0xf0]  ;;  %v4428_v5 = vld [vmem:[#allocation2 + $0x388] sm:$0xf] }
   0xd   :  { %v4421_v3 = vor.u32 %v5122_v1, %v4420_v0  ;;  %v5123_v6 = vld [vmem:[#allocation2 + $0x3c4] sm:$0xf0]  ;;  %v4425_v7 = vor.u32 %v5114_v2, %v4422_v4  ;;  %v5115_v9 = vld [vmem:[#allocation2 + $0x38c] sm:$0xf]  ;;  %v4356_v11 = vld [vmem:[#allocation2 + $0x300] sm:$0xf] }
   0xe   :  { %v4429_v8 = vor.u32 %v5123_v6, %v4428_v5  ;;  %v4430_v10 = vld [vmem:[#allocation2 + $0x3c8] sm:$0xf0]  ;;  %v5106_v13 = vld [vmem:[#allocation2 + $0x33c] sm:$0xf0]  ;;  %v5098_v14 = vld [vmem:[#allocation2 + $0x304] sm:$0xf] }
   0xf   :  { %920 = vmatpush.bf16.msra.mxu0 %v4421_v3  ;;  %v4433_v12 = vor.u32 %v5115_v9, %v4430_v10  ;;  %v4358_v15 = vld [vmem:[#allocation2 + $0x340] sm:$0xf0]  ;;  %969 = vmatpush.bf16.msra.mxu1 %v4425_v7  ;;  %v4357_v16 = vor.u32 %v5106_v13, %v4356_v11  ;;  %v4364_v18 = vld [vmem:[#allocation2 + $0x308] sm:$0xf]  ;;  %v5099_v20 = vld [vmem:[#allocation2 + $0x30c] sm:$0xf] }
  0x10   :  { %1018 = vmatpush.bf16.msra.mxu2 %v4429_v8  ;;  %v4361_v17 = vor.u32 %v5098_v14, %v4358_v15  ;;  %v5107_v19 = vld [vmem:[#allocation2 + $0x344] sm:$0xf0]  ;;  %v4366_v22 = vld [vmem:[#allocation2 + $0x348] sm:$0xf0]  ;;  %v4292_v23 = vld [vmem:[#allocation2 + $0x280] sm:$0xf] }
  0x11   :  { %1067 = vmatpush.bf16.msra.mxu3 %v4433_v12  ;;  %v4365_v21 = vor.u32 %v5107_v19, %v4364_v18  ;;  %v5090_v24 = vld [vmem:[#allocation2 + $0x2bc] sm:$0xf0]  ;;  %v4369_v25 = vor.u32 %v5099_v20, %v4366_v22  ;;  %v5082_v26 = vld [vmem:[#allocation2 + $0x284] sm:$0xf]  ;;  %v4300_v28 = vld [vmem:[#allocation2 + $0x288] sm:$0xf] }
  0x12   :  { %v4294_v27 = vld [vmem:[#allocation2 + $0x2c0] sm:$0xf0]  ;;  %v4293_v29 = vor.u32 %v5090_v24, %v4292_v23  ;;  %v5091_v30 = vld [vmem:[#allocation2 + $0x2c4] sm:$0xf0]  ;;  %v5083_v31 = vld [vmem:[#allocation2 + $0x28c] sm:$0xf] }
  0x13   :  { %921 = vmatpush.bf16.msra.mxu0 %v4357_v16  ;;  %v4302_v32 = vld [vmem:[#allocation2 + $0x2c8] sm:$0xf0]  ;;  %970 = vmatpush.bf16.msra.mxu1 %v4361_v17  ;;  %v4297_v33 = vor.u32 %v5082_v26, %v4294_v27  ;;  %v4301_v34 = vor.u32 %v5091_v30, %v4300_v28  ;;  %v4228_v35 = vld [vmem:[#allocation2 + $0x200] sm:$0xf]  ;;  %v5066_v37 = vld [vmem:[#allocation2 + $0x204] sm:$0xf] }
  0x14   :  { %1019 = vmatpush.bf16.msra.mxu2 %v4365_v21  ;;  %v5074_v36 = vld [vmem:[#allocation2 + $0x23c] sm:$0xf0]  ;;  %v4305_v38 = vor.u32 %v5083_v31, %v4302_v32  ;;  %v4230_v39 = vld [vmem:[#allocation2 + $0x240] sm:$0xf0]  ;;  %v4236_v40 = vld [vmem:[#allocation2 + $0x208] sm:$0xf] }
  0x15   :  { %1068 = vmatpush.bf16.msra.mxu3 %v4369_v25  ;;  %v5075_v41 = vld [vmem:[#allocation2 + $0x244] sm:$0xf0]  ;;  %v5067_v42 = vld [vmem:[#allocation2 + $0x20c] sm:$0xf]  ;;  %v4229_v44 = vor.u32 %v5074_v36, %v4228_v35  ;;  %v4233_v45 = vor.u32 %v5066_v37, %v4230_v39  ;;  %v4164_v47 = vld [vmem:[#allocation2 + $0x180] sm:$0xf] }
  0x16   :  { %v4238_v43 = vld [vmem:[#allocation2 + $0x248] sm:$0xf0]  ;;  %v4237_v46 = vor.u32 %v5075_v41, %v4236_v40  ;;  %v5058_v48 = vld [vmem:[#allocation2 + $0x1bc] sm:$0xf0]  ;;  %v5050_v49 = vld [vmem:[#allocation2 + $0x184] sm:$0xf] }
  0x17   :  { %922 = vmatpush.bf16.msra.mxu0 %v4293_v29  ;;  %971 = vmatpush.bf16.msra.mxu1 %v4297_v33  ;;  %v4241_v50 = vor.u32 %v5067_v42, %v4238_v43  ;;  %v4166_v51 = vld [vmem:[#allocation2 + $0x1c0] sm:$0xf0]  ;;  %v4172_v52 = vld [vmem:[#allocation2 + $0x188] sm:$0xf]  ;;  %v5051_v54 = vld [vmem:[#allocation2 + $0x18c] sm:$0xf]  ;;  %v4165_v56 = vor.u32 %v5058_v48, %v4164_v47 }
  0x18   :  { %1020 = vmatpush.bf16.msra.mxu2 %v4301_v34  ;;  %v5059_v53 = vld [vmem:[#allocation2 + $0x1c4] sm:$0xf0]  ;;  %v4174_v55 = vld [vmem:[#allocation2 + $0x1c8] sm:$0xf0]  ;;  %v4169_v57 = vor.u32 %v5050_v49, %v4166_v51  ;;  %v4100_v59 = vld [vmem:[#allocation2 + $0x100] sm:$0xf] }
  0x19   :  { %1069 = vmatpush.bf16.msra.mxu3 %v4305_v38  ;;  %v4173_v58 = vor.u32 %v5059_v53, %v4172_v52  ;;  %v5042_v60 = vld [vmem:[#allocation2 + $0x13c] sm:$0xf0]  ;;  %v5034_v61 = vld [vmem:[#allocation2 + $0x104] sm:$0xf]  ;;  %v4177_v62 = vor.u32 %v5051_v54, %v4174_v55  ;;  %v4108_v0 = vld [vmem:[#allocation2 + $0x108] sm:$0xf] }
  0x1a   :  { %v4102_v63 = vld [vmem:[#allocation2 + $0x140] sm:$0xf0]  ;;  %v5043_v1 = vld [vmem:[#allocation2 + $0x144] sm:$0xf0]  ;;  %v5035_v2 = vld [vmem:[#allocation2 + $0x10c] sm:$0xf]  ;;  %v4101_v4 = vor.u32 %v5042_v60, %v4100_v59 }
  0x1b   :  { %923 = vmatpush.bf16.msra.mxu0 %v4229_v44  ;;  %972 = vmatpush.bf16.msra.mxu1 %v4233_v45  ;;  %v4110_v3 = vld [vmem:[#allocation2 + $0x148] sm:$0xf0]  ;;  %v4105_v5 = vor.u32 %v5034_v61, %v4102_v63  ;;  %v4109_v6 = vor.u32 %v5043_v1, %v4108_v0  ;;  %v4036_v7 = vld [vmem:[#allocation2 + $0x80] sm:$0xf]  ;;  %v5018_v9 = vld [vmem:[#allocation2 + $0x84] sm:$0xf] }
  0x1c   :  { %1021 = vmatpush.bf16.msra.mxu2 %v4237_v46  ;;  %v5026_v8 = vld [vmem:[#allocation2 + $0xbc] sm:$0xf0]  ;;  %v4113_v10 = vor.u32 %v5035_v2, %v4110_v3  ;;  %v4038_v11 = vld [vmem:[#allocation2 + $0xc0] sm:$0xf0]  ;;  %v4044_v12 = vld [vmem:[#allocation2 + $0x88] sm:$0xf] }
  0x1d   :  { %1070 = vmatpush.bf16.msra.mxu3 %v4241_v50  ;;  %v5027_v13 = vld [vmem:[#allocation2 + $0xc4] sm:$0xf0]  ;;  %v5019_v14 = vld [vmem:[#allocation2 + $0x8c] sm:$0xf]  ;;  %v4037_v16 = vor.u32 %v5026_v8, %v4036_v7  ;;  %v3972_v17 = vld [vmem:[#allocation2] sm:$0xf]  ;;  %v4041_v18 = vor.u32 %v5018_v9, %v4038_v11 }
  0x1e   :  { %v4046_v15 = vld [vmem:[#allocation2 + $0xc8] sm:$0xf0]  ;;  %v4045_v19 = vor.u32 %v5027_v13, %v4044_v12  ;;  %v5010_v20 = vld [vmem:[#allocation2 + $0x3c] sm:$0xf0]  ;;  %v5002_v21 = vld [vmem:[#allocation2 + $0x4] sm:$0xf] }
  0x1f   :  { %924 = vmatpush.bf16.msra.mxu0 %v4165_v56  ;;  %973 = vmatpush.bf16.msra.mxu1 %v4169_v57  ;;  %v3974_v22 = vld [vmem:[#allocation2 + $0x40] sm:$0xf0]  ;;  %v4049_v23 = vor.u32 %v5019_v14, %v4046_v15  ;;  %v3980_v24 = vld [vmem:[#allocation2 + $0x8] sm:$0xf]  ;;  %v5003_v26 = vld [vmem:[#allocation2 + $0xc] sm:$0xf]  ;;  %v3973_v30 = vor.u32 %v5010_v20, %v3972_v17 }
  0x20   :  { %1022 = vmatpush.bf16.msra.mxu2 %v4173_v58  ;;  %v5011_v25 = vld [vmem:[#allocation2 + $0x44] sm:$0xf0]  ;;  %v3982_v27 = vld [vmem:[#allocation2 + $0x48] sm:$0xf0]  ;;  %v4444_v28 = vld [vmem:[#allocation2 + $0x398] sm:$0xf]  ;;  %v3977_v33 = vor.u32 %v5002_v21, %v3974_v22 }
  0x21   :  { %1071 = vmatpush.bf16.msra.mxu3 %v4177_v62  ;;  %v5125_v29 = vld [vmem:[#allocation2 + $0x3d4] sm:$0xf0]  ;;  %v5117_v31 = vld [vmem:[#allocation2 + $0x39c] sm:$0xf]  ;;  %v3981_v34 = vor.u32 %v5011_v25, %v3980_v24  ;;  %v5368_v35 = vld [vmem:[%s6484_s0] sm:$0xff]  ;;  %v3985_v36 = vor.u32 %v5003_v26, %v3982_v27 }
  0x22   :  { %v4446_v32 = vld [vmem:[#allocation2 + $0x3d8] sm:$0xf0]  ;;  %v4445_v37 = vor.u32 %v5125_v29, %v4444_v28  ;;  %v4436_v38 = vld [vmem:[#allocation2 + $0x390] sm:$0xf]  ;;  %v5116_v40 = vld [vmem:[#allocation2 + $0x394] sm:$0xf] }
  0x23   :  { %925 = vmatpush.bf16.msra.mxu0 %v4101_v4  ;;  %974 = vmatpush.bf16.msra.mxu1 %v4105_v5  ;;  %v5124_v39 = vld [vmem:[#allocation2 + $0x3cc] sm:$0xf0]  ;;  %v4449_v41 = vor.u32 %v5117_v31, %v4446_v32  ;;  %v4438_v42 = vld [vmem:[#allocation2 + $0x3d0] sm:$0xf0]  ;;  %v4380_v43 = vld [vmem:[#allocation2 + $0x318] sm:$0xf] }
  0x24   :  { %1023 = vmatpush.bf16.msra.mxu2 %v4109_v6  ;;  %v5109_v44 = vld [vmem:[#allocation2 + $0x354] sm:$0xf0]  ;;  %v5101_v45 = vld [vmem:[#allocation2 + $0x31c] sm:$0xf]  ;;  %v4437_v47 = vor.u32 %v5124_v39, %v4436_v38  ;;  %v4441_v48 = vor.u32 %v5116_v40, %v4438_v42  ;;  %v4372_v50 = vld [vmem:[#allocation2 + $0x310] sm:$0xf] }
  0x25   :  { %1072 = vmatpush.bf16.msra.mxu3 %v4113_v10  ;;  %v4382_v46 = vld [vmem:[#allocation2 + $0x358] sm:$0xf0]  ;;  %v4381_v49 = vor.u32 %v5109_v44, %v4380_v43  ;;  %v5108_v51 = vld [vmem:[#allocation2 + $0x34c] sm:$0xf0]  ;;  %v5100_v53 = vld [vmem:[#allocation2 + $0x314] sm:$0xf] }
  0x26   :  { %v4385_v52 = vor.u32 %v5101_v45, %v4382_v46  ;;  %v4374_v54 = vld [vmem:[#allocation2 + $0x350] sm:$0xf0]  ;;  %v4373_v55 = vor.u32 %v5108_v51, %v4372_v50  ;;  %v4316_v56 = vld [vmem:[#allocation2 + $0x298] sm:$0xf]  ;;  %v4308_v58 = vld [vmem:[#allocation2 + $0x290] sm:$0xf] }
  0x27   :  { %926 = vmatpush.bf16.msra.mxu0 %v4037_v16  ;;  %975 = vmatpush.bf16.msra.mxu1 %v4041_v18  ;;  %v5093_v57 = vld [vmem:[#allocation2 + $0x2d4] sm:$0xf0]  ;;  %v4377_v59 = vor.u32 %v5100_v53, %v4374_v54  ;;  %v5092_v61 = vld [vmem:[#allocation2 + $0x2cc] sm:$0xf0]  ;;  %v5085_v62 = vld [vmem:[#allocation2 + $0x29c] sm:$0xf] }
  0x28   :  { %1024 = vmatpush.bf16.msra.mxu2 %v4045_v19  ;;  %v4317_v60 = vor.u32 %v5093_v57, %v4316_v56  ;;  %v4318_v63 = vld [vmem:[#allocation2 + $0x2d8] sm:$0xf0]  ;;  %v5084_v1 = vld [vmem:[#allocation2 + $0x294] sm:$0xf]  ;;  %v4309_v3 = vor.u32 %v5092_v61, %v4308_v58  ;;  %v5377_v5 = vld [vmem:[%s6484_s0 + $0x8] sm:$0xff] }
  0x29   :  { %1073 = vmatpush.bf16.msra.mxu3 %v4049_v23  ;;  %v4321_v0 = vor.u32 %v5085_v62, %v4318_v63  ;;  %v4310_v2 = vld [vmem:[#allocation2 + $0x2d0] sm:$0xf0]  ;;  %v4252_v6 = vld [vmem:[#allocation2 + $0x218] sm:$0xf]  ;;  %v4244_v8 = vld [vmem:[#allocation2 + $0x210] sm:$0xf] }
  0x2a   :  { %v4313_v4 = vor.u32 %v5084_v1, %v4310_v2  ;;  %v5077_v7 = vld [vmem:[#allocation2 + $0x254] sm:$0xf0]  ;;  %v5076_v10 = vld [vmem:[#allocation2 + $0x24c] sm:$0xf0]  ;;  %v5069_v11 = vld [vmem:[#allocation2 + $0x21c] sm:$0xf] }
  0x2b   :  { %927 = vmatpush.bf16.msra.mxu0 %v3973_v30  ;;  %976 = vmatpush.bf16.msra.mxu1 %v3977_v33  ;;  %v4253_v9 = vor.u32 %v5077_v7, %v4252_v6  ;;  %v4254_v12 = vld [vmem:[#allocation2 + $0x258] sm:$0xf0]  ;;  %v4245_v13 = vor.u32 %v5076_v10, %v4244_v8  ;;  %v5068_v15 = vld [vmem:[#allocation2 + $0x214] sm:$0xf]  ;;  %v4188_v19 = vld [vmem:[#allocation2 + $0x198] sm:$0xf] }
  0x2c   :  { %1025 = vmatpush.bf16.msra.mxu2 %v3981_v34  ;;  %v4257_v14 = vor.u32 %v5069_v11, %v4254_v12  ;;  %v4246_v16 = vld [vmem:[#allocation2 + $0x250] sm:$0xf0]  ;;  %v5061_v20 = vld [vmem:[#allocation2 + $0x1d4] sm:$0xf0]  ;;  %v4180_v21 = vld [vmem:[#allocation2 + $0x190] sm:$0xf] }
  0x2d   :  { %1074 = vmatpush.bf16.msra.mxu3 %v3985_v36  ;;  %v4249_v17 = vor.u32 %v5068_v15, %v4246_v16  ;;  %v5386_v18 = vld [vmem:[%s6484_s0 + $0x10] sm:$0xff]  ;;  %v4189_v22 = vor.u32 %v5061_v20, %v4188_v19  ;;  %v5053_v24 = vld [vmem:[#allocation2 + $0x19c] sm:$0xf]  ;;  %v4124_v32 = vld [vmem:[#allocation2 + $0x118] sm:$0xf] }
  0x2e   :  { %928 = vmatmul.bf16.vlgmr.msra.gmra.mxu0 %v5368_v35  ;;  %977 = vmatmul.bf16.vlgmr.msra.gmra.mxu1 %v5368_v35  ;;  %v5060_v23 = vld [vmem:[#allocation2 + $0x1cc] sm:$0xf0]  ;;  %v4190_v25 = vld [vmem:[#allocation2 + $0x1d8] sm:$0xf0]  ;;  %v5052_v28 = vld [vmem:[#allocation2 + $0x194] sm:$0xf] }
  0x2f   :  { %1026 = vmatmul.bf16.vlgmr.msra.gmra.mxu2 %v5368_v35  ;;  %1116 = vmatpush.bf16.msrb.mxu0 %v4437_v47  ;;  %v4181_v26 = vor.u32 %v5060_v23, %v4180_v21  ;;  %v4193_v27 = vor.u32 %v5053_v24, %v4190_v25  ;;  %v4182_v29 = vld [vmem:[#allocation2 + $0x1d0] sm:$0xf0]  ;;  %v5395_v31 = vld [vmem:[%s6484_s0 + $0x18] sm:$0xff]  ;;  %v4116_v34 = vld [vmem:[#allocation2 + $0x110] sm:$0xf] }
  0x30   :  { %1214 = vmatpush.bf16.msrb.mxu2 %v4445_v37  ;;  %1075 = vmatmul.bf16.vlgmr.msra.gmra.mxu3 %v5368_v35  ;;  %v4185_v30 = vor.u32 %v5052_v28, %v4182_v29  ;;  %v5045_v33 = vld [vmem:[#allocation2 + $0x154] sm:$0xf0]  ;;  %v5044_v37 = vld [vmem:[#allocation2 + $0x14c] sm:$0xf0]  ;;  %v5037_v38 = vld [vmem:[#allocation2 + $0x11c] sm:$0xf] }
  0x31   :  { %1263 = vmatpush.bf16.msrb.mxu3 %v4449_v41  ;;  %1165 = vmatpush.bf16.msrb.mxu1 %v4441_v48  ;;  %v4125_v36 = vor.u32 %v5045_v33, %v4124_v32  ;;  %v4126_v39 = vld [vmem:[#allocation2 + $0x158] sm:$0xf0]  ;;  %v4117_v40 = vor.u32 %v5044_v37, %v4116_v34  ;;  %v5036_v42 = vld [vmem:[#allocation2 + $0x114] sm:$0xf]  ;;  %v5404_v45 = vld [vmem:[%s6484_s0 + $0x20] sm:$0xff] }
  0x32   :  { %v4129_v41 = vor.u32 %v5037_v38, %v4126_v39  ;;  %v4118_v43 = vld [vmem:[#allocation2 + $0x150] sm:$0xf0]  ;;  %v4060_v46 = vld [vmem:[#allocation2 + $0x98] sm:$0xf]  ;;  %v4052_v48 = vld [vmem:[#allocation2 + $0x90] sm:$0xf] }
  0x33   :  { %1117 = vmatpush.bf16.msrb.mxu0 %v4373_v55  ;;  %v4121_v44 = vor.u32 %v5036_v42, %v4118_v43  ;;  %v5029_v47 = vld [vmem:[#allocation2 + $0xd4] sm:$0xf0]  ;;  %v5028_v50 = vld [vmem:[#allocation2 + $0xcc] sm:$0xf0]  ;;  %v5021_v51 = vld [vmem:[#allocation2 + $0x9c] sm:$0xf] }
  0x34   :  { %1215 = vmatpush.bf16.msrb.mxu2 %v4381_v49  ;;  %v4061_v49 = vor.u32 %v5029_v47, %v4060_v46  ;;  %v4053_v53 = vor.u32 %v5028_v50, %v4052_v48  ;;  %v5020_v55 = vld [vmem:[#allocation2 + $0x94] sm:$0xf]  ;;  %v5413_v58 = vld [vmem:[%s6484_s0 + $0x28] sm:$0xff]  ;;  %v3988_v61 = vld [vmem:[#allocation2 + $0x10] sm:$0xf] }
  0x35   :  { %1264 = vmatpush.bf16.msrb.mxu3 %v4385_v52  ;;  %1166 = vmatpush.bf16.msrb.mxu1 %v4377_v59  ;;  %v4062_v52 = vld [vmem:[#allocation2 + $0xd8] sm:$0xf0]  ;;  %v4054_v56 = vld [vmem:[#allocation2 + $0xd0] sm:$0xf0]  ;;  %v3996_v59 = vld [vmem:[#allocation2 + $0x18] sm:$0xf] }
  0x36   :  { %v4065_v54 = vor.u32 %v5021_v51, %v4062_v52  ;;  %v4057_v57 = vor.u32 %v5020_v55, %v4054_v56  ;;  %v5012_v63 = vld [vmem:[#allocation2 + $0x4c] sm:$0xf0]  ;;  %v3998_v1 = vld [vmem:[#allocation2 + $0x58] sm:$0xf0]  ;;  %v3990_v6 = vld [vmem:[#allocation2 + $0x50] sm:$0xf0] }
  0x37   :  { %1118 = vmatpush.bf16.msrb.mxu0 %v4309_v3  ;;  %v3989_v2 = vor.u32 %v5012_v63, %v3988_v61  ;;  %v5422_v8 = vld [vmem:[%s6484_s0 + $0x30] sm:$0xff]  ;;  %v5127_v10 = vld [vmem:[#allocation2 + $0x3e4] sm:$0xf0]  ;;  %v4452_v11 = vld [vmem:[#allocation2 + $0x3a0] sm:$0xf] }
  0x38   :  { %1216 = vmatpush.bf16.msrb.mxu2 %v4317_v60  ;;  %v5013_v60 = vld [vmem:[#allocation2 + $0x54] sm:$0xf0]  ;;  %v4462_v15 = vld [vmem:[#allocation2 + $0x3e8] sm:$0xf0]  ;;  %v5118_v19 = vld [vmem:[#allocation2 + $0x3a4] sm:$0xf] }
  0x39   :  { %1265 = vmatpush.bf16.msrb.mxu3 %v4321_v0  ;;  %1167 = vmatpush.bf16.msrb.mxu1 %v4313_v4  ;;  %v3997_v62 = vor.u32 %v5013_v60, %v3996_v59  ;;  %v5005_v0 = vld [vmem:[#allocation2 + $0x1c] sm:$0xf]  ;;  %v5004_v4 = vld [vmem:[#allocation2 + $0x14] sm:$0xf]  ;;  %v4454_v20 = vld [vmem:[#allocation2 + $0x3e0] sm:$0xf0] }
  0x3a   :  { %v4001_v3 = vor.u32 %v5005_v0, %v3998_v1  ;;  %v3993_v7 = vor.u32 %v5004_v4, %v3990_v6  ;;  %v4457_v21 = vor.u32 %v5118_v19, %v4454_v20  ;;  %v4396_v23 = vld [vmem:[#allocation2 + $0x328] sm:$0xf]  ;;  %v4388_v25 = vld [vmem:[#allocation2 + $0x320] sm:$0xf]  ;;  %v5103_v28 = vld [vmem:[#allocation2 + $0x32c] sm:$0xf] }
  0x3b   :  { %1119 = vmatpush.bf16.msrb.mxu0 %v4245_v13  ;;  %v5126_v13 = vld [vmem:[#allocation2 + $0x3dc] sm:$0xf0]  ;;  %v5111_v24 = vld [vmem:[#allocation2 + $0x364] sm:$0xf0]  ;;  %v4398_v29 = vld [vmem:[#allocation2 + $0x368] sm:$0xf0] }
  0x3c   :  { %1217 = vmatpush.bf16.msrb.mxu2 %v4253_v9  ;;  %v4460_v9 = vld [vmem:[#allocation2 + $0x3a8] sm:$0xf]  ;;  %v4453_v16 = vor.u32 %v5126_v13, %v4452_v11  ;;  %v4401_v32 = vor.u32 %v5103_v28, %v4398_v29  ;;  %v5102_v33 = vld [vmem:[#allocation2 + $0x324] sm:$0xf]  ;;  %v5094_v47 = vld [vmem:[#allocation2 + $0x2dc] sm:$0xf0] }
  0x3d   :  { %1266 = vmatpush.bf16.msrb.mxu3 %v4257_v14  ;;  %1168 = vmatpush.bf16.msrb.mxu1 %v4249_v17  ;;  %v4461_v12 = vor.u32 %v5127_v10, %v4460_v9  ;;  %v5119_v14 = vld [vmem:[#allocation2 + $0x3ac] sm:$0xf]  ;;  %v4390_v34 = vld [vmem:[#allocation2 + $0x360] sm:$0xf0]  ;;  %v4332_v42 = vld [vmem:[#allocation2 + $0x2a8] sm:$0xf] }
  0x3e   :  { %933 = vmatmul.bf16.gmra.mxu0 %v5377_v5  ;;  %982 = vmatmul.bf16.gmra.mxu1 %v5377_v5  ;;  %v4465_v17 = vor.u32 %v5119_v14, %v4462_v15  ;;  %v5440_v37 = vld [vmem:[%s6486_s2] sm:$0xff]  ;;  %v5095_v43 = vld [vmem:[#allocation2 + $0x2e4] sm:$0xf0]  ;;  %v5087_v48 = vld [vmem:[#allocation2 + $0x2ac] sm:$0xf] }
  0x3f   :  { %1031 = vmatmul.bf16.gmra.mxu2 %v5377_v5  ;;  %1120 = vmatpush.bf16.msrb.mxu0 %v4181_v26  ;;  %v4397_v26 = vor.u32 %v5111_v24, %v4396_v23  ;;  %v4333_v46 = vor.u32 %v5095_v43, %v4332_v42  ;;  %v5456_v59 = vperm.slane %v5440_v37, 2  ;;  %v5459_v60 = vperm.slane %v5440_v37, 3  ;;  %v5086_v0 = vld [vmem:[#allocation2 + $0x2a4] sm:$0xf]  ;;  %v5078_v29 = vld [vmem:[#allocation2 + $0x25c] sm:$0xf0] }
  0x40   :  { %1080 = vmatmul.bf16.gmra.mxu3 %v5377_v5  ;;  %1218 = vmatpush.bf16.msrb.mxu2 %v4189_v22  ;;  %v5431_v22 = vld [vmem:[%s6484_s0 + $0x38] sm:$0xff]  ;;  %v4326_v1 = vld [vmem:[#allocation2 + $0x2e0] sm:$0xf0] }
  0x41   :  { %1267 = vmatpush.bf16.msrb.mxu3 %v4193_v27  ;;  %1169 = vmatpush.bf16.msrb.mxu1 %v4185_v30  ;;  %v5110_v27 = vld [vmem:[#allocation2 + $0x35c] sm:$0xf0]  ;;  %v4329_v4 = vor.u32 %v5086_v0, %v4326_v1 }
  0x42   :  { %v4389_v30 = vor.u32 %v5110_v27, %v4388_v25  ;;  %v4268_v25 = vld [vmem:[#allocation2 + $0x228] sm:$0xf]  ;;  %v4260_v27 = vld [vmem:[#allocation2 + $0x220] sm:$0xf] }
  0x43   :  { %1121 = vmatpush.bf16.msrb.mxu0 %v4117_v40  ;;  %v5443_v40 = vperm.slane %v5440_v37, 0 }
  0x44   :  { %1219 = vmatpush.bf16.msrb.mxu2 %v4125_v36  ;;  %v4393_v36 = vor.u32 %v5102_v33, %v4390_v34 }
  0x45   :  { %1268 = vmatpush.bf16.msrb.mxu3 %v4129_v41  ;;  %1170 = vmatpush.bf16.msrb.mxu1 %v4121_v44  ;;  %v5447_v41 = vperm.slane %v5440_v37, 1  ;;  %v4324_v44 = vld [vmem:[#allocation2 + $0x2a0] sm:$0xf] }
  0x46   :  { %v4325_v52 = vor.u32 %v5094_v47, %v4324_v44 }
  0x47   :  { %1122 = vmatpush.bf16.msrb.mxu0 %v4053_v53 }
  0x48   :  { %1220 = vmatpush.bf16.msrb.mxu2 %v4061_v49  ;;  %v4334_v49 = vld [vmem:[#allocation2 + $0x2e8] sm:$0xf0] }
  0x49   :  { %1269 = vmatpush.bf16.msrb.mxu3 %v4065_v54  ;;  %1171 = vmatpush.bf16.msrb.mxu1 %v4057_v57  ;;  %v4337_v53 = vor.u32 %v5087_v48, %v4334_v49  ;;  %v5070_v49 = vld [vmem:[#allocation2 + $0x224] sm:$0xf] }
  0x4b   :  { %1123 = vmatpush.bf16.msrb.mxu0 %v3989_v2 }
  0x4c   :  { %1221 = vmatpush.bf16.msrb.mxu2 %v3997_v62 }
  0x4d   :  { %1270 = vmatpush.bf16.msrb.mxu3 %v4001_v3  ;;  %1172 = vmatpush.bf16.msrb.mxu1 %v3993_v7 }
  0x4e   :  { %938 = vmatmul.bf16.gmra.mxu0 %v5386_v18  ;;  %987 = vmatmul.bf16.gmra.mxu1 %v5386_v18 }
  0x4f   :  { %1036 = vmatmul.bf16.gmra.mxu2 %v5386_v18  ;;  %1312 = vmatpush.bf16.msra.mxu0 %v4453_v16 }
  0x50   :  { %1085 = vmatmul.bf16.gmra.mxu3 %v5386_v18  ;;  %1410 = vmatpush.bf16.msra.mxu2 %v4461_v12 }
  0x51   :  { %1459 = vmatpush.bf16.msra.mxu3 %v4465_v17  ;;  %1361 = vmatpush.bf16.msra.mxu1 %v4457_v21 }
  0x53   :  { %1313 = vmatpush.bf16.msra.mxu0 %v4389_v30  ;;  %v5071_v30 = vld [vmem:[#allocation2 + $0x22c] sm:$0xf] }
  0x54   :  { %1411 = vmatpush.bf16.msra.mxu2 %v4397_v26  ;;  %v5079_v26 = vld [vmem:[#allocation2 + $0x264] sm:$0xf0] }
  0x55   :  { %1460 = vmatpush.bf16.msra.mxu3 %v4401_v32  ;;  %1362 = vmatpush.bf16.msra.mxu1 %v4393_v36  ;;  %v4269_v28 = vor.u32 %v5079_v26, %v4268_v25  ;;  %v4270_v32 = vld [vmem:[#allocation2 + $0x268] sm:$0xf0]  ;;  %v4261_v36 = vor.u32 %v5078_v29, %v4260_v27 }
  0x57   :  { %1314 = vmatpush.bf16.msra.mxu0 %v4325_v52 }
  0x58   :  { %1412 = vmatpush.bf16.msra.mxu2 %v4333_v46 }
  0x59   :  { %1461 = vmatpush.bf16.msra.mxu3 %v4337_v53  ;;  %1363 = vmatpush.bf16.msra.mxu1 %v4329_v4 }
  0x5b   :  { %1315 = vmatpush.bf16.msra.mxu0 %v4261_v36  ;;  %v5054_v36 = vld [vmem:[#allocation2 + $0x1a4] sm:$0xf] }
  0x5c   :  { %1413 = vmatpush.bf16.msra.mxu2 %v4269_v28 }
  0x5e   :  { %943 = vmatmul.bf16.gmra.mxu0 %v5395_v31  ;;  %992 = vmatmul.bf16.gmra.mxu1 %v5395_v31 }
  0x5f   :  { %1041 = vmatmul.bf16.gmra.mxu2 %v5395_v31 }
  0x60   :  { %1090 = vmatmul.bf16.gmra.mxu3 %v5395_v31 }
  0x6e   :  { %948 = vmatmul.bf16.gmra.mxu0 %v5404_v45  ;;  %997 = vmatmul.bf16.gmra.mxu1 %v5404_v45 }
  0x6f   :  { %1046 = vmatmul.bf16.gmra.mxu2 %v5404_v45 }
  0x70   :  { %1095 = vmatmul.bf16.gmra.mxu3 %v5404_v45 }
  0x7e   :  { %953 = vmatmul.bf16.gmra.mxu0 %v5413_v58  ;;  %1002 = vmatmul.bf16.gmra.mxu1 %v5413_v58 }
  0x7f   :  { %1051 = vmatmul.bf16.gmra.mxu2 %v5413_v58 }
  0x80   :  { %1100 = vmatmul.bf16.gmra.mxu3 %v5413_v58 }
  0x8e   :  { %958 = vmatmul.bf16.gmra.mxu0 %v5422_v8  ;;  %1007 = vmatmul.bf16.gmra.mxu1 %v5422_v8 }
  0x8f   :  { %1056 = vmatmul.bf16.gmra.mxu2 %v5422_v8 }
  0x90   :  { %1105 = vmatmul.bf16.gmra.mxu3 %v5422_v8 }
  0x9e   :  { %963 = vmatmul.bf16.gmra.mxu0 %v5431_v22  ;;  %1012 = vmatmul.bf16.gmra.mxu1 %v5431_v22 }
  0x9f   :  { %1061 = vmatmul.bf16.gmra.mxu2 %v5431_v22 }
  0xa0   :  { %1110 = vmatmul.bf16.gmra.mxu3 %v5431_v22 }
  0xab   :  { %v929_v38 = vpop.f32.mrf.mxu0  ;;  %v978_v39 = vpop.f32.mrf.mxu1 }
  0xac   :  { %v930_v50 = vadd.f32 %v929_v38, %v5443_v40  ;;  %v979_v54 = vadd.f32 %v978_v39, %v5447_v41  ;;  %v4273_v38 = vor.u32 %v5071_v30, %v4270_v32 }
  0xae   :  { %1124 = vmatmul.bf16.vlgmr.msrb.gmra.mxu0 %v5368_v35  ;;  %1173 = vmatmul.bf16.vlgmr.msrb.gmra.mxu1 %v5368_v35  ;;  %v1704_v62 = vmax.f32 %v930_v50, 0.0  ;;  %v1705_v2 = vmax.f32 %v979_v54, 0.0  ;;  %v4262_v50 = vld [vmem:[#allocation2 + $0x260] sm:$0xf0] }
  0xaf   :  { %1222 = vmatmul.bf16.vlgmr.msrb.gmra.mxu2 %v5368_v35  ;;  %1462 = vmatpush.bf16.msra.mxu3 %v4273_v38  ;;  %v4265_v53 = vor.u32 %v5070_v49, %v4262_v50  ;;  %v4198_v38 = vld [vmem:[#allocation2 + $0x1e0] sm:$0xf0] }
  0xb0   :  { %1271 = vmatmul.bf16.vlgmr.msrb.gmra.mxu3 %v5368_v35 }
  0xb1   :  { %1364 = vmatpush.bf16.msra.mxu1 %v4265_v53 }
  0xb2   :  { %v1027_v51 = vpop.f32.mrf.mxu2 }
  0xb3   :  { %v1076_v55 = vpop.f32.mrf.mxu3  ;;  %v931_v56 = vpop.f32.mrf.mxu0  ;;  %v1028_v7 = vadd.f32 %v1027_v51, %v5456_v59 }
  0xb4   :  { %v932_v57 = vadd.f32 %v931_v56, %v5443_v40  ;;  %v980_v35 = vpop.f32.mrf.mxu1  ;;  %v1077_v10 = vadd.f32 %v1076_v55, %v5459_v60 }
  0xb5   :  { %v981_v61 = vadd.f32 %v980_v35, %v5447_v41  ;;  %v1706_v17 = vmax.f32 %v1028_v7, 0.0 }
  0xb6   :  { %v1720_v63 = vmax.f32 %v932_v57, 0.0  ;;  %v1707_v20 = vmax.f32 %v1077_v10, 0.0 }
  0xb7   :  { %v1721_v3 = vmax.f32 %v981_v61, 0.0 }
  0xb8   :  { %v5462_v6 = vpack.c.bf16 %v1720_v63, %v1704_v62 }
  0xb9   :  { %v5465_v9 = vpack.c.bf16 %v1721_v3, %v1705_v2 }
  0xba   :  { %v1029_v11 = vpop.f32.mrf.mxu2 }
  0xbb   :  { %v1030_v12 = vadd.f32 %v1029_v11, %v5456_v59  ;;  %v1078_v13 = vpop.f32.mrf.mxu3  ;;  %v934_v14 = vpop.f32.mrf.mxu0  ;;  %v4204_v11 = vld [vmem:[#allocation2 + $0x1a8] sm:$0xf] }
  0xbc   :  { %v1079_v15 = vadd.f32 %v1078_v13, %v5459_v60  ;;  %v983_v16 = vpop.f32.mrf.mxu1  ;;  %v935_v33 = vadd.f32 %v934_v14, %v5443_v40  ;;  %v4196_v13 = vld [vmem:[#allocation2 + $0x1a0] sm:$0xf] }
  0xbd   :  { %v1722_v19 = vmax.f32 %v1030_v12, 0.0  ;;  %v984_v39 = vadd.f32 %v983_v16, %v5447_v41  ;;  %v5063_v12 = vld [vmem:[#allocation2 + $0x1e4] sm:$0xf0]  ;;  %v5062_v16 = vld [vmem:[#allocation2 + $0x1dc] sm:$0xf0] }
  0xbe   :  { %v1723_v21 = vmax.f32 %v1079_v15, 0.0  ;;  %1129 = vmatmul.bf16.gmra.mxu0 %v5377_v5  ;;  %1178 = vmatmul.bf16.gmra.mxu1 %v5377_v5  ;;  %v1736_v47 = vmax.f32 %v935_v33, 0.0  ;;  %v4205_v15 = vor.u32 %v5063_v12, %v4204_v11  ;;  %v4197_v25 = vor.u32 %v5062_v16, %v4196_v13  ;;  %v4142_v11 = vld [vmem:[#allocation2 + $0x168] sm:$0xf0] }
  0xbf   :  { %v5471_v23 = vpack.c.bf16 %v1722_v19, %v1706_v17  ;;  %1227 = vmatmul.bf16.gmra.mxu2 %v5377_v5  ;;  %v1737_v51 = vmax.f32 %v984_v39, 0.0  ;;  %v5055_v17 = vld [vmem:[#allocation2 + $0x1ac] sm:$0xf] }
  0xc0   :  { %v5475_v24 = vpack.c.bf16 %v1723_v21, %v1707_v20  ;;  %1276 = vmatmul.bf16.gmra.mxu3 %v5377_v5  ;;  %v4206_v19 = vld [vmem:[#allocation2 + $0x1e8] sm:$0xf0]  ;;  %1414 = vmatpush.bf16.msra.mxu2 %v4205_v15 }
  0xc1   :  { %v4209_v26 = vor.u32 %v5055_v17, %v4206_v19  ;;  %1316 = vmatpush.bf16.msra.mxu0 %v4197_v25 }
  0xc2   :  { %v1032_v34 = vpop.f32.mrf.mxu2 }
  0xc3   :  { %v1081_v42 = vpop.f32.mrf.mxu3  ;;  %v936_v43 = vpop.f32.mrf.mxu0  ;;  %v1033_v55 = vadd.f32 %v1032_v34, %v5456_v59  ;;  %1463 = vmatpush.bf16.msra.mxu3 %v4209_v26 }
  0xc4   :  { %v937_v44 = vadd.f32 %v936_v43, %v5443_v40  ;;  %v985_v5 = vpop.f32.mrf.mxu1  ;;  %v1082_v57 = vadd.f32 %v1081_v42, %v5459_v60  ;;  %v4201_v43 = vor.u32 %v5054_v36, %v4198_v38 }
  0xc5   :  { %v986_v46 = vadd.f32 %v985_v5, %v5447_v41  ;;  %v1738_v2 = vmax.f32 %v1033_v55, 0.0 }
  0xc6   :  { %v1752_v48 = vmax.f32 %v937_v44, 0.0  ;;  %v1739_v4 = vmax.f32 %v1082_v57, 0.0  ;;  %1365 = vmatpush.bf16.msra.mxu1 %v4201_v43 }
  0xc7   :  { %v1753_v52 = vmax.f32 %v986_v46, 0.0 }
  0xc8   :  { %v5482_v54 = vpack.c.bf16 %v1752_v48, %v1736_v47 }
  0xc9   :  { %v5485_v56 = vpack.c.bf16 %v1753_v52, %v1737_v51 }
  0xca   :  { %v1034_v35 = vpop.f32.mrf.mxu2 }
  0xcb   :  { %v1035_v61 = vadd.f32 %v1034_v35, %v5456_v59  ;;  %v1083_v62 = vpop.f32.mrf.mxu3  ;;  %v939_v63 = vpop.f32.mrf.mxu0 }
  0xcc   :  { %v1084_v0 = vadd.f32 %v1083_v62, %v5459_v60  ;;  %v988_v1 = vpop.f32.mrf.mxu1  ;;  %v940_v20 = vadd.f32 %v939_v63, %v5443_v40  ;;  %v4140_v63 = vld [vmem:[#allocation2 + $0x128] sm:$0xf] }
  0xcd   :  { %v1754_v3 = vmax.f32 %v1035_v61, 0.0  ;;  %v989_v27 = vadd.f32 %v988_v1, %v5447_v41  ;;  %v4132_v1 = vld [vmem:[#allocation2 + $0x120] sm:$0xf] }
  0xce   :  { %v1755_v7 = vmax.f32 %v1084_v0, 0.0  ;;  %1134 = vmatmul.bf16.gmra.mxu0 %v5386_v18  ;;  %1183 = vmatmul.bf16.gmra.mxu1 %v5386_v18  ;;  %v1768_v33 = vmax.f32 %v940_v20, 0.0  ;;  %v5047_v0 = vld [vmem:[#allocation2 + $0x164] sm:$0xf0] }
  0xcf   :  { %1232 = vmatmul.bf16.gmra.mxu2 %v5386_v18  ;;  %v5493_v10 = vpack.c.bf16 %v1754_v3, %v1738_v2  ;;  %v1769_v39 = vmax.f32 %v989_v27, 0.0  ;;  %v4141_v3 = vor.u32 %v5047_v0, %v4140_v63  ;;  %v5030_v0 = vld [vmem:[#allocation2 + $0xdc] sm:$0xf0] }
  0xd0   :  { %1281 = vmatmul.bf16.gmra.mxu3 %v5386_v18  ;;  %v5496_v14 = vpack.c.bf16 %v1755_v7, %v1739_v4  ;;  %v5046_v4 = vld [vmem:[#allocation2 + $0x15c] sm:$0xf0]  ;;  %v5039_v7 = vld [vmem:[#allocation2 + $0x12c] sm:$0xf] }
  0xd1   :  { %v4133_v15 = vor.u32 %v5046_v4, %v4132_v1  ;;  %v4145_v16 = vor.u32 %v5039_v7, %v4142_v11  ;;  %1415 = vmatpush.bf16.msra.mxu2 %v4141_v3  ;;  %v5023_v1 = vld [vmem:[#allocation2 + $0xac] sm:$0xf] }
  0xd2   :  { %v1037_v21 = vpop.f32.mrf.mxu2  ;;  %v4078_v3 = vld [vmem:[#allocation2 + $0xe8] sm:$0xf0] }
  0xd3   :  { %v1086_v28 = vpop.f32.mrf.mxu3  ;;  %v941_v29 = vpop.f32.mrf.mxu0  ;;  %v1038_v5 = vadd.f32 %v1037_v21, %v5456_v59  ;;  %1317 = vmatpush.bf16.msra.mxu0 %v4133_v15  ;;  %1464 = vmatpush.bf16.msra.mxu3 %v4145_v16 }
  0xd4   :  { %v942_v18 = vadd.f32 %v941_v29, %v5443_v40  ;;  %v990_v30 = vpop.f32.mrf.mxu1  ;;  %v1087_v47 = vadd.f32 %v1086_v28, %v5459_v60  ;;  %v5038_v28 = vld [vmem:[#allocation2 + $0x124] sm:$0xf] }
  0xd5   :  { %v991_v32 = vadd.f32 %v990_v30, %v5447_v41  ;;  %v1770_v55 = vmax.f32 %v1038_v5, 0.0  ;;  %v4134_v29 = vld [vmem:[#allocation2 + $0x160] sm:$0xf0] }
  0xd6   :  { %v1784_v34 = vmax.f32 %v942_v18, 0.0  ;;  %v1771_v35 = vmax.f32 %v1087_v47, 0.0 }
  0xd7   :  { %v1785_v42 = vmax.f32 %v991_v32, 0.0  ;;  %v4137_v32 = vor.u32 %v5038_v28, %v4134_v29 }
  0xd8   :  { %v5502_v44 = vpack.c.bf16 %v1784_v34, %v1768_v33 }
  0xd9   :  { %v5505_v46 = vpack.c.bf16 %v1785_v42, %v1769_v39  ;;  %1366 = vmatpush.bf16.msra.mxu1 %v4137_v32 }
  0xda   :  { %v1039_v48 = vpop.f32.mrf.mxu2 }
  0xdb   :  { %v1040_v49 = vadd.f32 %v1039_v48, %v5456_v59  ;;  %v1088_v50 = vpop.f32.mrf.mxu3  ;;  %v944_v51 = vpop.f32.mrf.mxu0 }
  0xdc   :  { %v1089_v52 = vadd.f32 %v1088_v50, %v5459_v60  ;;  %v993_v53 = vpop.f32.mrf.mxu1  ;;  %v945_v12 = vadd.f32 %v944_v51, %v5443_v40 }
  0xdd   :  { %v1786_v57 = vmax.f32 %v1040_v49, 0.0  ;;  %v994_v17 = vadd.f32 %v993_v53, %v5447_v41 }
  0xde   :  { %v1787_v61 = vmax.f32 %v1089_v52, 0.0  ;;  %1139 = vmatmul.bf16.gmra.mxu0 %v5395_v31  ;;  %1188 = vmatmul.bf16.gmra.mxu1 %v5395_v31  ;;  %v1800_v26 = vmax.f32 %v945_v12, 0.0  ;;  %v4081_v12 = vor.u32 %v5023_v1, %v4078_v3  ;;  %v5007_v1 = vld [vmem:[#allocation2 + $0x2c] sm:$0xf] }
  0xdf   :  { %1237 = vmatmul.bf16.gmra.mxu2 %v5395_v31  ;;  %v5513_v62 = vpack.c.bf16 %v1786_v57, %v1770_v55  ;;  %v1801_v18 = vmax.f32 %v994_v17, 0.0  ;;  %v4076_v55 = vld [vmem:[#allocation2 + $0xa8] sm:$0xf]  ;;  %v4014_v3 = vld [vmem:[#allocation2 + $0x68] sm:$0xf0] }
  0xe0   :  { %1286 = vmatmul.bf16.gmra.mxu3 %v5395_v31  ;;  %v5516_v2 = vpack.c.bf16 %v1787_v61, %v1771_v35  ;;  %v5031_v57 = vld [vmem:[#allocation2 + $0xe4] sm:$0xf0]  ;;  %v4068_v35 = vld [vmem:[#allocation2 + $0xa0] sm:$0xf] }
  0xe1   :  { %v4077_v63 = vor.u32 %v5031_v57, %v4076_v55  ;;  %v4069_v11 = vor.u32 %v5030_v0, %v4068_v35  ;;  %1465 = vmatpush.bf16.msra.mxu3 %v4081_v12  ;;  %v5015_v55 = vld [vmem:[#allocation2 + $0x64] sm:$0xf0]  ;;  %v4004_v57 = vld [vmem:[#allocation2 + $0x20] sm:$0xf]  ;;  %v4017_v12 = vor.u32 %v5007_v1, %v4014_v3 }
  0xe2   :  { %v1042_v13 = vpop.f32.mrf.mxu2  ;;  %v5014_v0 = vld [vmem:[#allocation2 + $0x5c] sm:$0xf0] }
  0xe3   :  { %v1091_v19 = vpop.f32.mrf.mxu3  ;;  %v946_v20 = vpop.f32.mrf.mxu0  ;;  %v1043_v34 = vadd.f32 %v1042_v13, %v5456_v59  ;;  %1416 = vmatpush.bf16.msra.mxu2 %v4077_v63  ;;  %1318 = vmatpush.bf16.msra.mxu0 %v4069_v11  ;;  %v4005_v11 = vor.u32 %v5014_v0, %v4004_v57  ;;  %v4476_v57 = vld [vmem:[#allocation2 + $0x3b8] sm:$0xf]  ;;  %v4468_v0 = vld [vmem:[#allocation2 + $0x3b0] sm:$0xf] }
  0xe4   :  { %v947_v31 = vadd.f32 %v946_v20, %v5443_v40  ;;  %v995_v21 = vpop.f32.mrf.mxu1  ;;  %v1092_v38 = vadd.f32 %v1091_v19, %v5459_v60 }
  0xe5   :  { %v996_v25 = vadd.f32 %v995_v21, %v5447_v41  ;;  %v1802_v49 = vmax.f32 %v1043_v34, 0.0  ;;  %v5022_v21 = vld [vmem:[#allocation2 + $0xa4] sm:$0xf]  ;;  %1466 = vmatpush.bf16.msra.mxu3 %v4017_v12 }
  0xe6   :  { %v1816_v27 = vmax.f32 %v947_v31, 0.0  ;;  %v1803_v51 = vmax.f32 %v1092_v38, 0.0 }
  0xe7   :  { %v1817_v30 = vmax.f32 %v996_v25, 0.0  ;;  %v4070_v25 = vld [vmem:[#allocation2 + $0xe0] sm:$0xf0]  ;;  %1319 = vmatpush.bf16.msra.mxu0 %v4005_v11  ;;  %v4478_v11 = vld [vmem:[#allocation2 + $0x3f8] sm:$0xf0] }
  0xe8   :  { %v5522_v33 = vpack.c.bf16 %v1816_v27, %v1800_v26  ;;  %v4073_v28 = vor.u32 %v5022_v21, %v4070_v25  ;;  %v4006_v21 = vld [vmem:[#allocation2 + $0x60] sm:$0xf0] }
  0xe9   :  { %v5525_v36 = vpack.c.bf16 %v1817_v30, %v1801_v18 }
  0xea   :  { %v1044_v39 = vpop.f32.mrf.mxu2  ;;  %1367 = vmatpush.bf16.msra.mxu1 %v4073_v28 }
  0xeb   :  { %v1045_v42 = vadd.f32 %v1044_v39, %v5456_v59  ;;  %v1093_v43 = vpop.f32.mrf.mxu3  ;;  %v949_v5 = vpop.f32.mrf.mxu0 }
  0xec   :  { %v1094_v47 = vadd.f32 %v1093_v43, %v5459_v60  ;;  %v998_v48 = vpop.f32.mrf.mxu1  ;;  %v950_v4 = vadd.f32 %v949_v5, %v5443_v40 }
  0xed   :  { %v1818_v50 = vmax.f32 %v1045_v42, 0.0  ;;  %v999_v13 = vadd.f32 %v998_v48, %v5447_v41 }
  0xee   :  { %v1819_v52 = vmax.f32 %v1094_v47, 0.0  ;;  %1144 = vmatmul.bf16.gmra.mxu0 %v5404_v45  ;;  %1193 = vmatmul.bf16.gmra.mxu1 %v5404_v45  ;;  %v1832_v20 = vmax.f32 %v950_v4, 0.0 }
  0xef   :  { %1242 = vmatmul.bf16.gmra.mxu2 %v5404_v45  ;;  %v5533_v53 = vpack.c.bf16 %v1818_v50, %v1802_v49  ;;  %v1833_v26 = vmax.f32 %v999_v13, 0.0 }
  0xf0   :  { %1291 = vmatmul.bf16.gmra.mxu3 %v5404_v45  ;;  %v5536_v61 = vpack.c.bf16 %v1819_v52, %v1803_v51  ;;  %v4012_v52 = vld [vmem:[#allocation2 + $0x28] sm:$0xf] }
  0xf1   :  { %v4013_v63 = vor.u32 %v5015_v55, %v4012_v52 }
  0xf2   :  { %v1047_v7 = vpop.f32.mrf.mxu2 }
  0xf3   :  { %v1096_v15 = vpop.f32.mrf.mxu3  ;;  %v951_v16 = vpop.f32.mrf.mxu0  ;;  %v1048_v18 = vadd.f32 %v1047_v7, %v5456_v59  ;;  %1417 = vmatpush.bf16.msra.mxu2 %v4013_v63  ;;  %v5129_v63 = vld [vmem:[#allocation2 + $0x3f4] sm:$0xf0] }
  0xf4   :  { %v952_v45 = vadd.f32 %v951_v16, %v5443_v40  ;;  %v1000_v17 = vpop.f32.mrf.mxu1  ;;  %v1097_v32 = vadd.f32 %v1096_v15, %v5459_v60  ;;  %v4477_v3 = vor.u32 %v5129_v63, %v4476_v57 }
  0xf5   :  { %v1001_v19 = vadd.f32 %v1000_v17, %v5447_v41  ;;  %v1834_v47 = vmax.f32 %v1048_v18, 0.0 }
  0xf6   :  { %v1848_v31 = vmax.f32 %v952_v45, 0.0  ;;  %v1835_v49 = vmax.f32 %v1097_v32, 0.0 }
  0xf7   :  { %v1849_v27 = vmax.f32 %v1001_v19, 0.0  ;;  %1606 = vmatpush.bf16.msrb.mxu2 %v4477_v3 }
  0xf8   :  { %v5542_v29 = vpack.c.bf16 %v1848_v31, %v1832_v20  ;;  %v5006_v31 = vld [vmem:[#allocation2 + $0x24] sm:$0xf] }
  0xf9   :  { %v5545_v30 = vpack.c.bf16 %v1849_v27, %v1833_v26  ;;  %v4009_v27 = vor.u32 %v5006_v31, %v4006_v21 }
  0xfa   :  { %v1049_v34 = vpop.f32.mrf.mxu2 }
  0xfb   :  { %v1050_v38 = vadd.f32 %v1049_v34, %v5456_v59  ;;  %v1098_v39 = vpop.f32.mrf.mxu3  ;;  %v954_v42 = vpop.f32.mrf.mxu0  ;;  %1368 = vmatpush.bf16.msra.mxu1 %v4009_v27 }
  0xfc   :  { %v1099_v43 = vadd.f32 %v1098_v39, %v5459_v60  ;;  %v1003_v5 = vpop.f32.mrf.mxu1  ;;  %v955_v4 = vadd.f32 %v954_v42, %v5443_v40 }
  0xfd   :  { %v1850_v48 = vmax.f32 %v1050_v38, 0.0  ;;  %v1004_v13 = vadd.f32 %v1003_v5, %v5447_v41 }
  0xfe   :  { %v1851_v50 = vmax.f32 %v1099_v43, 0.0  ;;  %1149 = vmatmul.bf16.gmra.mxu0 %v5413_v58  ;;  %1198 = vmatmul.bf16.gmra.mxu1 %v5413_v58  ;;  %v1864_v19 = vmax.f32 %v955_v4, 0.0  ;;  %v5128_v4 = vld [vmem:[#allocation2 + $0x3ec] sm:$0xf0] }
  0xff   :  { %1247 = vmatmul.bf16.gmra.mxu2 %v5413_v58  ;;  %v5553_v51 = vpack.c.bf16 %v1850_v48, %v1834_v47  ;;  %v1865_v25 = vmax.f32 %v1004_v13, 0.0 }
 0x100   :  { %1296 = vmatmul.bf16.gmra.mxu3 %v5413_v58  ;;  %v5556_v35 = vpack.c.bf16 %v1851_v50, %v1835_v49 }
 0x102   :  { %v1052_v7 = vpop.f32.mrf.mxu2 }
 0x103   :  { %v1101_v15 = vpop.f32.mrf.mxu3  ;;  %v956_v16 = vpop.f32.mrf.mxu0  ;;  %v1053_v18 = vadd.f32 %v1052_v7, %v5456_v59  ;;  %v5121_v7 = vld [vmem:[#allocation2 + $0x3bc] sm:$0xf] }
 0x104   :  { %v957_v58 = vadd.f32 %v956_v16, %v5443_v40  ;;  %v1005_v45 = vpop.f32.mrf.mxu1  ;;  %v1102_v34 = vadd.f32 %v1101_v15, %v5459_v60  ;;  %v4469_v15 = vor.u32 %v5128_v4, %v4468_v0  ;;  %v4481_v16 = vor.u32 %v5121_v7, %v4478_v11  ;;  %v4412_v7 = vld [vmem:[#allocation2 + $0x338] sm:$0xf] }
 0x105   :  { %v1006_v17 = vadd.f32 %v1005_v45, %v5447_v41  ;;  %v1866_v48 = vmax.f32 %v1053_v18, 0.0  ;;  %v5113_v11 = vld [vmem:[#allocation2 + $0x374] sm:$0xf0] }
 0x106   :  { %v1880_v20 = vmax.f32 %v957_v58, 0.0  ;;  %v1867_v50 = vmax.f32 %v1102_v34, 0.0  ;;  %1508 = vmatpush.bf16.msrb.mxu0 %v4469_v15  ;;  %1655 = vmatpush.bf16.msrb.mxu3 %v4481_v16  ;;  %v4413_v15 = vor.u32 %v5113_v11, %v4412_v7  ;;  %v5112_v16 = vld [vmem:[#allocation2 + $0x36c] sm:$0xf0] }
 0x107   :  { %v1881_v26 = vmax.f32 %v1006_v17, 0.0 }
 0x108   :  { %v5562_v28 = vpack.c.bf16 %v1880_v20, %v1864_v19  ;;  %1607 = vmatpush.bf16.msrb.mxu2 %v4413_v15 }
 0x109   :  { %v5565_v32 = vpack.c.bf16 %v1881_v26, %v1865_v25  ;;  %v5120_v25 = vld [vmem:[#allocation2 + $0x3b4] sm:$0xf] }
 0x10a   :  { %v1054_v38 = vpop.f32.mrf.mxu2  ;;  %v4470_v26 = vld [vmem:[#allocation2 + $0x3f0] sm:$0xf0] }
 0x10b   :  { %v1055_v39 = vadd.f32 %v1054_v38, %v5456_v59  ;;  %v1103_v42 = vpop.f32.mrf.mxu3  ;;  %v959_v43 = vpop.f32.mrf.mxu0  ;;  %v4473_v34 = vor.u32 %v5120_v25, %v4470_v26 }
 0x10c   :  { %v1104_v5 = vadd.f32 %v1103_v42, %v5459_v60  ;;  %v1008_v47 = vpop.f32.mrf.mxu1  ;;  %v960_v12 = vadd.f32 %v959_v43, %v5443_v40 }
 0x10d   :  { %v1882_v49 = vmax.f32 %v1055_v39, 0.0  ;;  %v1009_v58 = vadd.f32 %v1008_v47, %v5447_v41  ;;  %1557 = vmatpush.bf16.msrb.mxu1 %v4473_v34 }
 0x10e   :  { %v1883_v52 = vmax.f32 %v1104_v5, 0.0  ;;  %1154 = vmatmul.bf16.gmra.mxu0 %v5422_v8  ;;  %1203 = vmatmul.bf16.gmra.mxu1 %v5422_v8  ;;  %v1896_v31 = vmax.f32 %v960_v12, 0.0  ;;  %v4404_v12 = vld [vmem:[#allocation2 + $0x330] sm:$0xf] }
 0x10f   :  { %1252 = vmatmul.bf16.gmra.mxu2 %v5422_v8  ;;  %v5573_v55 = vpack.c.bf16 %v1882_v49, %v1866_v48  ;;  %v1897_v27 = vmax.f32 %v1009_v58, 0.0  ;;  %v5105_v58 = vld [vmem:[#allocation2 + $0x33c] sm:$0xf] }
 0x110   :  { %1301 = vmatmul.bf16.gmra.mxu3 %v5422_v8  ;;  %v5576_v1 = vpack.c.bf16 %v1883_v52, %v1867_v50 }
 0x112   :  { %v1057_v13 = vpop.f32.mrf.mxu2 }
 0x113   :  { %v1106_v45 = vpop.f32.mrf.mxu3  ;;  %v961_v17 = vpop.f32.mrf.mxu0  ;;  %v1058_v39 = vadd.f32 %v1057_v13, %v5456_v59 }
 0x114   :  { %v962_v8 = vadd.f32 %v961_v17, %v5443_v40  ;;  %v1010_v19 = vpop.f32.mrf.mxu1  ;;  %v1107_v43 = vadd.f32 %v1106_v45, %v5459_v60  ;;  %v4414_v45 = vld [vmem:[#allocation2 + $0x378] sm:$0xf0] }
 0x115   :  { %v1011_v20 = vadd.f32 %v1010_v19, %v5447_v41  ;;  %v1898_v57 = vmax.f32 %v1058_v39, 0.0  ;;  %v4405_v19 = vor.u32 %v5112_v16, %v4404_v12  ;;  %v5104_v39 = vld [vmem:[#allocation2 + $0x334] sm:$0xf] }
 0x116   :  { %v1912_v21 = vmax.f32 %v962_v8, 0.0  ;;  %v1899_v0 = vmax.f32 %v1107_v43, 0.0  ;;  %v4406_v43 = vld [vmem:[#allocation2 + $0x370] sm:$0xf0] }
 0x117   :  { %v1913_v18 = vmax.f32 %v1011_v20, 0.0  ;;  %v4417_v20 = vor.u32 %v5105_v58, %v4414_v45  ;;  %1509 = vmatpush.bf16.msrb.mxu0 %v4405_v19  ;;  %v5611_v58 = vperm.slane %v5440_v37, 4  ;;  %v5616_v45 = vld [vmem:[%s6484_s0] sm:$0xff]  ;;  %v4340_v19 = vld [vmem:[#allocation2 + $0x2b0] sm:$0xf] }
 0x118   :  { %v5582_v38 = vpack.c.bf16 %v1912_v21, %v1896_v31 }
 0x119   :  { %v5585_v42 = vpack.c.bf16 %v1913_v18, %v1897_v27  ;;  %1656 = vmatpush.bf16.msrb.mxu3 %v4417_v20 }
 0x11a   :  { %v1059_v5 = vpop.f32.mrf.mxu2 }
 0x11b   :  { %v1060_v47 = vadd.f32 %v1059_v5, %v5456_v59  ;;  %v1108_v48 = vpop.f32.mrf.mxu3  ;;  %v964_v49 = vpop.f32.mrf.mxu0 }
 0x11c   :  { %v1109_v50 = vadd.f32 %v1108_v48, %v5459_v60  ;;  %v1013_v52 = vpop.f32.mrf.mxu1  ;;  %v965_v17 = vadd.f32 %v964_v49, %v5443_v40  ;;  %v4409_v48 = vor.u32 %v5104_v39, %v4406_v43 }
 0x11d   :  { %v1914_v63 = vmax.f32 %v1060_v47, 0.0  ;;  %v1014_v31 = vadd.f32 %v1013_v52, %v5447_v41 }
 0x11e   :  { %v1915_v3 = vmax.f32 %v1109_v50, 0.0  ;;  %1159 = vmatmul.bf16.gmra.mxu0 %v5431_v22  ;;  %1208 = vmatmul.bf16.gmra.mxu1 %v5431_v22  ;;  %v1928_v18 = vmax.f32 %v965_v17, 0.0  ;;  %v4348_v17 = vld [vmem:[#allocation2 + $0x2b8] sm:$0xf] }
 0x11f   :  { %1257 = vmatmul.bf16.gmra.mxu2 %v5431_v22  ;;  %v5593_v4 = vpack.c.bf16 %v1914_v63, %v1898_v57  ;;  %v1929_v5 = vmax.f32 %v1014_v31, 0.0  ;;  %1558 = vmatpush.bf16.msrb.mxu1 %v4409_v48 }
 0x120   :  { %1306 = vmatmul.bf16.gmra.mxu3 %v5431_v22  ;;  %v5596_v13 = vpack.c.bf16 %v1915_v3, %v1899_v0 }
 0x122   :  { %v1062_v8 = vpop.f32.mrf.mxu2 }
 0x123   :  { %v1111_v21 = vpop.f32.mrf.mxu3  ;;  %v966_v25 = vpop.f32.mrf.mxu0  ;;  %v1063_v50 = vadd.f32 %v1062_v8, %v5456_v59  ;;  %v5097_v8 = vld [vmem:[#allocation2 + $0x2f4] sm:$0xf0] }
 0x124   :  { %v967_v22 = vadd.f32 %v966_v25, %v5443_v40  ;;  %v1015_v26 = vpop.f32.mrf.mxu1  ;;  %v1112_v40 = vadd.f32 %v1111_v21, %v5459_v60  ;;  %v4349_v31 = vor.u32 %v5097_v8, %v4348_v17  ;;  %v5096_v21 = vld [vmem:[#allocation2 + $0x2ec] sm:$0xf0]  ;;  %v5089_v25 = vld [vmem:[#allocation2 + $0x2bc] sm:$0xf] }
 0x125   :  { %v1016_v27 = vadd.f32 %v1015_v26, %v5447_v41  ;;  %v1930_v11 = vmax.f32 %v1063_v50, 0.0  ;;  %v5633_v50 = vperm.slane %v5440_v37, 6 }
 0x126   :  { %v1944_v34 = vmax.f32 %v967_v22, 0.0  ;;  %v1931_v15 = vmax.f32 %v1112_v40, 0.0  ;;  %v4350_v22 = vld [vmem:[#allocation2 + $0x2f8] sm:$0xf0]  ;;  %1608 = vmatpush.bf16.msrb.mxu2 %v4349_v31  ;;  %v5636_v40 = vperm.slane %v5440_v37, 7 }
 0x127   :  { %v1945_v47 = vmax.f32 %v1016_v27, 0.0 }
 0x128   :  { %v5602_v49 = vpack.c.bf16 %v1944_v34, %v1928_v18  ;;  %v4341_v18 = vor.u32 %v5096_v21, %v4340_v19  ;;  %v4353_v34 = vor.u32 %v5089_v25, %v4350_v22 }
 0x129   :  { %v5605_v52 = vpack.c.bf16 %v1945_v47, %v1929_v5 }
 0x12a   :  { %v1064_v57 = vpop.f32.mrf.mxu2  ;;  %1510 = vmatpush.bf16.msrb.mxu0 %v4341_v18  ;;  %1657 = vmatpush.bf16.msrb.mxu3 %v4353_v34 }
 0x12b   :  { %v1065_v63 = vadd.f32 %v1064_v57, %v5456_v59  ;;  %v1113_v41 = vpop.f32.mrf.mxu3  ;;  %v1125_v0 = vpop.f32.mrf.mxu0  ;;  %v5620_v59 = vperm.slane %v5440_v37, 5 }
 0x12c   :  { %v1114_v3 = vadd.f32 %v1113_v41, %v5459_v60  ;;  %v1174_v7 = vpop.f32.mrf.mxu1  ;;  %v1126_v26 = vadd.f32 %v1125_v0, %v5611_v58  ;;  %v5088_v0 = vld [vmem:[#allocation2 + $0x2b4] sm:$0xf] }
 0x12d   :  { %v1946_v12 = vmax.f32 %v1065_v63, 0.0  ;;  %v1175_v39 = vadd.f32 %v1174_v7, %v5620_v59 }
 0x12e   :  { %v1947_v16 = vmax.f32 %v1114_v3, 0.0  ;;  %1320 = vmatmul.bf16.vlgmr.msra.gmra.mxu0 %v5616_v45  ;;  %1369 = vmatmul.bf16.vlgmr.msra.gmra.mxu1 %v5616_v45  ;;  %v1708_v63 = vmax.f32 %v1126_v26, 0.0  ;;  %v4342_v3 = vld [vmem:[#allocation2 + $0x2f0] sm:$0xf0] }
 0x12f   :  { %1418 = vmatmul.bf16.vlgmr.msra.gmra.mxu2 %v5616_v45  ;;  %v5624_v60 = vpack.c.bf16 %v1946_v12, %v1930_v11  ;;  %v1709_v7 = vmax.f32 %v1175_v39, 0.0  ;;  %v4345_v12 = vor.u32 %v5088_v0, %v4342_v3  ;;  %v5073_v0 = vld [vmem:[#allocation2 + $0x23c] sm:$0xf] }
 0x130   :  { %1467 = vmatmul.bf16.vlgmr.msra.gmra.mxu3 %v5616_v45  ;;  %v5627_v20 = vpack.c.bf16 %v1947_v16, %v1931_v15  ;;  %v4286_v3 = vld [vmem:[#allocation2 + $0x278] sm:$0xf0] }
 0x131   :  { %1559 = vmatpush.bf16.msrb.mxu1 %v4345_v12 }
 0x132   :  { %v1223_v27 = vpop.f32.mrf.mxu2 }
 0x133   :  { %v1272_v43 = vpop.f32.mrf.mxu3  ;;  %v1127_v5 = vpop.f32.mrf.mxu0  ;;  %v1224_v16 = vadd.f32 %v1223_v27, %v5633_v50  ;;  %v5650_v27 = vld [vmem:[%s6484_s0 + $0x8] sm:$0xff] }
 0x134   :  { %v1128_v47 = vadd.f32 %v1127_v5, %v5611_v58  ;;  %v1176_v48 = vpop.f32.mrf.mxu1  ;;  %v1273_v8 = vadd.f32 %v1272_v43, %v5636_v40 }
 0x135   :  { %v1177_v57 = vadd.f32 %v1176_v48, %v5620_v59  ;;  %v1710_v26 = vmax.f32 %v1224_v16, 0.0  ;;  %v5081_v48 = vld [vmem:[#allocation2 + $0x274] sm:$0xf0]  ;;  %v4289_v16 = vor.u32 %v5073_v0, %v4286_v3 }
 0x136   :  { %v1724_v41 = vmax.f32 %v1128_v47, 0.0  ;;  %v1711_v34 = vmax.f32 %v1273_v8, 0.0  ;;  %v4284_v47 = vld [vmem:[#allocation2 + $0x238] sm:$0xf] }
 0x137   :  { %v1725_v11 = vmax.f32 %v1177_v57, 0.0  ;;  %v4276_v57 = vld [vmem:[#allocation2 + $0x230] sm:$0xf]  ;;  %1658 = vmatpush.bf16.msrb.mxu3 %v4289_v16 }
 0x138   :  { %v5639_v15 = vpack.c.bf16 %v1724_v41, %v1708_v63  ;;  %v4285_v63 = vor.u32 %v5081_v48, %v4284_v47  ;;  %v5080_v41 = vld [vmem:[#allocation2 + $0x26c] sm:$0xf0]  ;;  %v4278_v47 = vld [vmem:[#allocation2 + $0x270] sm:$0xf0] }
 0x139   :  { %v5642_v17 = vpack.c.bf16 %v1725_v11, %v1709_v7  ;;  %v4277_v12 = vor.u32 %v5080_v41, %v4276_v57 }
 0x13a   :  { %6490 = vst [vmem:[#allocation8_spill] sm:$0xff] %v5639_v15  ;;  %v1225_v37 = vpop.f32.mrf.mxu2  ;;  %1609 = vmatpush.bf16.msrb.mxu2 %v4285_v63 }
 0x13b   :  { %6491 = vst [vmem:[#allocation9_spill] sm:$0xff] %v5642_v17  ;;  %v1226_v19 = vadd.f32 %v1225_v37, %v5633_v50  ;;  %v1274_v31 = vpop.f32.mrf.mxu3  ;;  %v1130_v21 = vpop.f32.mrf.mxu0  ;;  %1511 = vmatpush.bf16.msrb.mxu0 %v4277_v12 }
 0x13c   :  { %v1275_v25 = vadd.f32 %v1274_v31, %v5636_v40  ;;  %v1179_v22 = vpop.f32.mrf.mxu1  ;;  %v1131_v7 = vadd.f32 %v1130_v21, %v5611_v58 }
 0x13d   :  { %v1726_v18 = vmax.f32 %v1226_v19, 0.0  ;;  %v1180_v8 = vadd.f32 %v1179_v22, %v5620_v59 }
 0x13e   :  { %v1727_v39 = vmax.f32 %v1275_v25, 0.0  ;;  %1325 = vmatmul.bf16.gmra.mxu0 %v5650_v27  ;;  %1374 = vmatmul.bf16.gmra.mxu1 %v5650_v27 }
 0x13f   :  { %v5653_v43 = vpack.c.bf16 %v1726_v18, %v1710_v26  ;;  %1423 = vmatmul.bf16.gmra.mxu2 %v5650_v27  ;;  %v1740_v18 = vmax.f32 %v1131_v7, 0.0  ;;  %v1741_v21 = vmax.f32 %v1180_v8, 0.0 }
 0x140   :  { %v5657_v5 = vpack.c.bf16 %v1727_v39, %v1711_v34  ;;  %1472 = vmatmul.bf16.gmra.mxu3 %v5650_v27  ;;  %v5072_v39 = vld [vmem:[#allocation2 + $0x234] sm:$0xf] }
 0x141   :  { %6492 = vst [vmem:[#allocation10_spill] sm:$0xff] %v5653_v43  ;;  %v4281_v57 = vor.u32 %v5072_v39, %v4278_v47  ;;  %v5065_v39 = vld [vmem:[#allocation2 + $0x1f4] sm:$0xf0]  ;;  %v4212_v47 = vld [vmem:[#allocation2 + $0x1b0] sm:$0xf] }
 0x142   :  { %6493 = vst [vmem:[#allocation11_spill] sm:$0xff] %v5657_v5  ;;  %v1228_v11 = vpop.f32.mrf.mxu2 }
 0x143   :  { %v1277_v37 = vpop.f32.mrf.mxu3  ;;  %v1132_v19 = vpop.f32.mrf.mxu0  ;;  %v1229_v22 = vadd.f32 %v1228_v11, %v5633_v50  ;;  %1560 = vmatpush.bf16.msrb.mxu1 %v4281_v57  ;;  %v5675_v11 = vld [vmem:[%s6484_s0 + $0x10] sm:$0xff] }
 0x144   :  { %v1133_v31 = vadd.f32 %v1132_v19, %v5611_v58  ;;  %v1181_v25 = vpop.f32.mrf.mxu1  ;;  %v1278_v0 = vadd.f32 %v1277_v37, %v5636_v40  ;;  %v5064_v57 = vld [vmem:[#allocation2 + $0x1ec] sm:$0xf0] }
 0x145   :  { %v1182_v26 = vadd.f32 %v1181_v25, %v5620_v59  ;;  %v1742_v8 = vmax.f32 %v1229_v22, 0.0  ;;  %v5057_v22 = vld [vmem:[#allocation2 + $0x1bc] sm:$0xf] }
 0x146   :  { %v1756_v34 = vmax.f32 %v1133_v31, 0.0 }
 0x147   :  { %v1757_v48 = vmax.f32 %v1182_v26, 0.0  ;;  %v1743_v26 = vmax.f32 %v1278_v0, 0.0  ;;  %v4222_v0 = vld [vmem:[#allocation2 + $0x1f8] sm:$0xf0] }
 0x148   :  { %v5664_v41 = vpack.c.bf16 %v1756_v34, %v1740_v18  ;;  %v4220_v34 = vld [vmem:[#allocation2 + $0x1b8] sm:$0xf] }
 0x149   :  { %v5667_v63 = vpack.c.bf16 %v1757_v48, %v1741_v21  ;;  %v4221_v48 = vor.u32 %v5065_v39, %v4220_v34  ;;  %v5056_v39 = vld [vmem:[#allocation2 + $0x1b4] sm:$0xf] }
 0x14a   :  { %6494 = vst [vmem:[#allocation12_spill] sm:$0xff] %v5664_v41  ;;  %v1230_v3 = vpop.f32.mrf.mxu2 }
 0x14b   :  { %6495 = vst [vmem:[#allocation13_spill] sm:$0xff] %v5667_v63  ;;  %v1231_v12 = vadd.f32 %v1230_v3, %v5633_v50  ;;  %v1279_v16 = vpop.f32.mrf.mxu3  ;;  %v1135_v7 = vpop.f32.mrf.mxu0  ;;  %1610 = vmatpush.bf16.msrb.mxu2 %v4221_v48 }
 0x14c   :  { %v1280_v19 = vadd.f32 %v1279_v16, %v5636_v40  ;;  %v1184_v31 = vpop.f32.mrf.mxu1  ;;  %v1136_v3 = vadd.f32 %v1135_v7, %v5611_v58  ;;  %v4213_v16 = vor.u32 %v5064_v57, %v4212_v47 }
 0x14d   :  { %v1758_v25 = vmax.f32 %v1231_v12, 0.0  ;;  %v1185_v63 = vadd.f32 %v1184_v31, %v5620_v59 }
 0x14e   :  { %v1759_v18 = vmax.f32 %v1280_v19, 0.0  ;;  %1330 = vmatmul.bf16.gmra.mxu0 %v5675_v11  ;;  %1379 = vmatmul.bf16.gmra.mxu1 %v5675_v11  ;;  %v4225_v19 = vor.u32 %v5057_v22, %v4222_v0 }
 0x14f   :  { %1428 = vmatmul.bf16.gmra.mxu2 %v5675_v11  ;;  %v5680_v37 = vpack.c.bf16 %v1758_v25, %v1742_v8  ;;  %1512 = vmatpush.bf16.msrb.mxu0 %v4213_v16  ;;  %v1773_v7 = vmax.f32 %v1185_v63, 0.0 }
 0x150   :  { %1477 = vmatmul.bf16.gmra.mxu3 %v5675_v11  ;;  %v5683_v21 = vpack.c.bf16 %v1759_v18, %v1743_v26  ;;  %v1772_v18 = vmax.f32 %v1136_v3, 0.0 }
 0x151   :  { %6496 = vst [vmem:[#allocation14_spill] sm:$0xff] %v5680_v37  ;;  %1659 = vmatpush.bf16.msrb.mxu3 %v4225_v19 }
 0x152   :  { %6497 = vst [vmem:[#allocation15_spill] sm:$0xff] %v5683_v21  ;;  %v1233_v12 = vpop.f32.mrf.mxu2  ;;  %v4214_v21 = vld [vmem:[#allocation2 + $0x1f0] sm:$0xf0] }
 0x153   :  { %v1282_v8 = vpop.f32.mrf.mxu3  ;;  %v1137_v25 = vpop.f32.mrf.mxu0  ;;  %v4217_v47 = vor.u32 %v5056_v39, %v4214_v21  ;;  %v1234_v31 = vadd.f32 %v1233_v12, %v5633_v50  ;;  %v5700_v12 = vld [vmem:[%s6484_s0 + $0x18] sm:$0xff] }
 0x154   :  { %v1138_v37 = vadd.f32 %v1137_v25, %v5611_v58  ;;  %v1186_v41 = vpop.f32.mrf.mxu1  ;;  %v1283_v22 = vadd.f32 %v1282_v8, %v5636_v40  ;;  %v4156_v8 = vld [vmem:[#allocation2 + $0x138] sm:$0xf] }
 0x155   :  { %v1187_v26 = vadd.f32 %v1186_v41, %v5620_v59  ;;  %1561 = vmatpush.bf16.msrb.mxu1 %v4217_v47  ;;  %v1774_v63 = vmax.f32 %v1234_v31, 0.0  ;;  %v5048_v47 = vld [vmem:[#allocation2 + $0x16c] sm:$0xf0]  ;;  %v5041_v31 = vld [vmem:[#allocation2 + $0x13c] sm:$0xf] }
 0x156   :  { %v1788_v34 = vmax.f32 %v1138_v37, 0.0  ;;  %v1775_v21 = vmax.f32 %v1283_v22, 0.0  ;;  %v4158_v22 = vld [vmem:[#allocation2 + $0x178] sm:$0xf0] }
 0x157   :  { %v1789_v5 = vmax.f32 %v1187_v26, 0.0 }
 0x158   :  { %v5689_v57 = vpack.c.bf16 %v1788_v34, %v1772_v18  ;;  %v5049_v18 = vld [vmem:[#allocation2 + $0x174] sm:$0xf0]  ;;  %v4148_v34 = vld [vmem:[#allocation2 + $0x130] sm:$0xf] }
 0x159   :  { %v5692_v48 = vpack.c.bf16 %v1789_v5, %v1773_v7  ;;  %v4157_v7 = vor.u32 %v5049_v18, %v4156_v8  ;;  %v5040_v18 = vld [vmem:[#allocation2 + $0x134] sm:$0xf] }
 0x15a   :  { %6498 = vst [vmem:[#allocation16_spill] sm:$0xff] %v5689_v57  ;;  %v1235_v0 = vpop.f32.mrf.mxu2 }
 0x15b   :  { %6499 = vst [vmem:[#allocation17_spill] sm:$0xff] %v5692_v48  ;;  %v1236_v16 = vadd.f32 %v1235_v0, %v5633_v50  ;;  %v1284_v41 = vpop.f32.mrf.mxu3  ;;  %v1140_v3 = vpop.f32.mrf.mxu0  ;;  %1611 = vmatpush.bf16.msrb.mxu2 %v4157_v7 }
 0x15c   :  { %v1285_v37 = vadd.f32 %v1284_v41, %v5636_v40  ;;  %v1189_v19 = vpop.f32.mrf.mxu1  ;;  %v1141_v0 = vadd.f32 %v1140_v3, %v5611_v58  ;;  %v4149_v41 = vor.u32 %v5048_v47, %v4148_v34 }
 0x15d   :  { %v1790_v25 = vmax.f32 %v1236_v16, 0.0  ;;  %v1190_v48 = vadd.f32 %v1189_v19, %v5620_v59 }
 0x15e   :  { %v1791_v26 = vmax.f32 %v1285_v37, 0.0  ;;  %1335 = vmatmul.bf16.gmra.mxu0 %v5700_v12  ;;  %1384 = vmatmul.bf16.gmra.mxu1 %v5700_v12  ;;  %v4161_v37 = vor.u32 %v5041_v31, %v4158_v22 }
 0x15f   :  { %1433 = vmatmul.bf16.gmra.mxu2 %v5700_v12  ;;  %v5705_v5 = vpack.c.bf16 %v1790_v25, %v1774_v63  ;;  %1513 = vmatpush.bf16.msrb.mxu0 %v4149_v41  ;;  %v1805_v3 = vmax.f32 %v1190_v48, 0.0 }
 0x160   :  { %1482 = vmatmul.bf16.gmra.mxu3 %v5700_v12  ;;  %v5708_v39 = vpack.c.bf16 %v1791_v26, %v1775_v21  ;;  %v1804_v26 = vmax.f32 %v1141_v0, 0.0 }
 0x161   :  { %6500 = vst [vmem:[#allocation18_spill] sm:$0xff] %v5705_v5  ;;  %1660 = vmatpush.bf16.msrb.mxu3 %v4161_v37 }
 0x162   :  { %6501 = vst [vmem:[#allocation19_spill] sm:$0xff] %v5708_v39  ;;  %v1238_v16 = vpop.f32.mrf.mxu2  ;;  %v4150_v39 = vld [vmem:[#allocation2 + $0x170] sm:$0xf0] }
 0x163   :  { %v1287_v63 = vpop.f32.mrf.mxu3  ;;  %v1142_v25 = vpop.f32.mrf.mxu0  ;;  %v4153_v34 = vor.u32 %v5040_v18, %v4150_v39  ;;  %v1239_v19 = vadd.f32 %v1238_v16, %v5633_v50  ;;  %v5725_v16 = vld [vmem:[%s6484_s0 + $0x20] sm:$0xff] }
 0x164   :  { %v1143_v5 = vadd.f32 %v1142_v25, %v5611_v58  ;;  %v1191_v57 = vpop.f32.mrf.mxu1  ;;  %v1288_v31 = vadd.f32 %v1287_v63, %v5636_v40  ;;  %v4092_v63 = vld [vmem:[#allocation2 + $0xb8] sm:$0xf] }
 0x165   :  { %v1192_v21 = vadd.f32 %v1191_v57, %v5620_v59  ;;  %1562 = vmatpush.bf16.msrb.mxu1 %v4153_v34  ;;  %v1806_v48 = vmax.f32 %v1239_v19, 0.0  ;;  %v5032_v34 = vld [vmem:[#allocation2 + $0xec] sm:$0xf0]  ;;  %v5025_v19 = vld [vmem:[#allocation2 + $0xbc] sm:$0xf] }
 0x166   :  { %v1820_v8 = vmax.f32 %v1143_v5, 0.0  ;;  %v1807_v39 = vmax.f32 %v1288_v31, 0.0  ;;  %v4094_v31 = vld [vmem:[#allocation2 + $0xf8] sm:$0xf0] }
 0x167   :  { %v1821_v43 = vmax.f32 %v1192_v21, 0.0 }
 0x168   :  { %v5714_v47 = vpack.c.bf16 %v1820_v8, %v1804_v26  ;;  %v5033_v26 = vld [vmem:[#allocation2 + $0xf4] sm:$0xf0]  ;;  %v4084_v8 = vld [vmem:[#allocation2 + $0xb0] sm:$0xf] }
 0x169   :  { %v5717_v7 = vpack.c.bf16 %v1821_v43, %v1805_v3  ;;  %v4093_v3 = vor.u32 %v5033_v26, %v4092_v63  ;;  %v5024_v26 = vld [vmem:[#allocation2 + $0xb4] sm:$0xf] }
 0x16a   :  { %6502 = vst [vmem:[#allocation20_spill] sm:$0xff] %v5714_v47  ;;  %v1240_v22 = vpop.f32.mrf.mxu2 }
 0x16b   :  { %6503 = vst [vmem:[#allocation21_spill] sm:$0xff] %v5717_v7  ;;  %v1241_v41 = vadd.f32 %v1240_v22, %v5633_v50  ;;  %v1289_v57 = vpop.f32.mrf.mxu3  ;;  %v1145_v0 = vpop.f32.mrf.mxu0  ;;  %1612 = vmatpush.bf16.msrb.mxu2 %v4093_v3 }
 0x16c   :  { %v1290_v5 = vadd.f32 %v1289_v57, %v5636_v40  ;;  %v1194_v37 = vpop.f32.mrf.mxu1  ;;  %v1146_v22 = vadd.f32 %v1145_v0, %v5611_v58  ;;  %v4085_v57 = vor.u32 %v5032_v34, %v4084_v8 }
 0x16d   :  { %v1822_v25 = vmax.f32 %v1241_v41, 0.0  ;;  %v1195_v7 = vadd.f32 %v1194_v37, %v5620_v59 }
 0x16e   :  { %v1823_v21 = vmax.f32 %v1290_v5, 0.0  ;;  %1340 = vmatmul.bf16.gmra.mxu0 %v5725_v16  ;;  %1389 = vmatmul.bf16.gmra.mxu1 %v5725_v16  ;;  %v4097_v5 = vor.u32 %v5025_v19, %v4094_v31 }
 0x16f   :  { %1438 = vmatmul.bf16.gmra.mxu2 %v5725_v16  ;;  %v5730_v43 = vpack.c.bf16 %v1822_v25, %v1806_v48  ;;  %1514 = vmatpush.bf16.msrb.mxu0 %v4085_v57  ;;  %v1837_v0 = vmax.f32 %v1195_v7, 0.0 }
 0x170   :  { %1487 = vmatmul.bf16.gmra.mxu3 %v5725_v16  ;;  %v5733_v18 = vpack.c.bf16 %v1823_v21, %v1807_v39  ;;  %v1836_v21 = vmax.f32 %v1146_v22, 0.0 }
 0x171   :  { %6504 = vst [vmem:[#allocation22_spill] sm:$0xff] %v5730_v43  ;;  %1661 = vmatpush.bf16.msrb.mxu3 %v4097_v5 }
 0x172   :  { %6505 = vst [vmem:[#allocation23_spill] sm:$0xff] %v5733_v18  ;;  %v1243_v41 = vpop.f32.mrf.mxu2  ;;  %v4086_v18 = vld [vmem:[#allocation2 + $0xf0] sm:$0xf0] }
 0x173   :  { %v1292_v48 = vpop.f32.mrf.mxu3  ;;  %v1147_v25 = vpop.f32.mrf.mxu0  ;;  %v4089_v8 = vor.u32 %v5024_v26, %v4086_v18  ;;  %v1244_v37 = vadd.f32 %v1243_v41, %v5633_v50  ;;  %v5750_v41 = vld [vmem:[%s6484_s0 + $0x28] sm:$0xff] }
 0x174   :  { %v1148_v43 = vadd.f32 %v1147_v25, %v5611_v58  ;;  %v1196_v47 = vpop.f32.mrf.mxu1  ;;  %v1293_v19 = vadd.f32 %v1292_v48, %v5636_v40  ;;  %v4028_v48 = vld [vmem:[#allocation2 + $0x38] sm:$0xf] }
 0x175   :  { %v1197_v39 = vadd.f32 %v1196_v47, %v5620_v59  ;;  %1563 = vmatpush.bf16.msrb.mxu1 %v4089_v8  ;;  %v1838_v7 = vmax.f32 %v1244_v37, 0.0  ;;  %v5016_v8 = vld [vmem:[#allocation2 + $0x6c] sm:$0xf0]  ;;  %v5009_v37 = vld [vmem:[#allocation2 + $0x3c] sm:$0xf] }
 0x176   :  { %v1852_v63 = vmax.f32 %v1148_v43, 0.0  ;;  %v1839_v18 = vmax.f32 %v1293_v19, 0.0  ;;  %v4030_v19 = vld [vmem:[#allocation2 + $0x78] sm:$0xf0] }
 0x177   :  { %v1853_v17 = vmax.f32 %v1197_v39, 0.0 }
 0x178   :  { %v5739_v34 = vpack.c.bf16 %v1852_v63, %v1836_v21  ;;  %v5017_v21 = vld [vmem:[#allocation2 + $0x74] sm:$0xf0]  ;;  %v4020_v63 = vld [vmem:[#allocation2 + $0x30] sm:$0xf] }
 0x179   :  { %v5742_v3 = vpack.c.bf16 %v1853_v17, %v1837_v0  ;;  %v4029_v0 = vor.u32 %v5017_v21, %v4028_v48  ;;  %v5008_v21 = vld [vmem:[#allocation2 + $0x34] sm:$0xf] }
 0x17a   :  { %6506 = vst [vmem:[#allocation24_spill] sm:$0xff] %v5739_v34  ;;  %v1245_v31 = vpop.f32.mrf.mxu2 }
 0x17b   :  { %6507 = vst [vmem:[#allocation25_spill] sm:$0xff] %v5742_v3  ;;  %v1246_v57 = vadd.f32 %v1245_v31, %v5633_v50  ;;  %v1294_v47 = vpop.f32.mrf.mxu3  ;;  %v1150_v22 = vpop.f32.mrf.mxu0  ;;  %1613 = vmatpush.bf16.msrb.mxu2 %v4029_v0 }
 0x17c   :  { %v1295_v43 = vadd.f32 %v1294_v47, %v5636_v40  ;;  %v1199_v5 = vpop.f32.mrf.mxu1  ;;  %v1151_v31 = vadd.f32 %v1150_v22, %v5611_v58  ;;  %v4021_v47 = vor.u32 %v5016_v8, %v4020_v63 }
 0x17d   :  { %v1854_v25 = vmax.f32 %v1246_v57, 0.0  ;;  %v1200_v3 = vadd.f32 %v1199_v5, %v5620_v59 }
 0x17e   :  { %v1855_v39 = vmax.f32 %v1295_v43, 0.0  ;;  %1345 = vmatmul.bf16.gmra.mxu0 %v5750_v41  ;;  %1394 = vmatmul.bf16.gmra.mxu1 %v5750_v41  ;;  %v4033_v43 = vor.u32 %v5009_v37, %v4030_v19 }
 0x17f   :  { %1443 = vmatmul.bf16.gmra.mxu2 %v5750_v41  ;;  %v5755_v17 = vpack.c.bf16 %v1854_v25, %v1838_v7  ;;  %1515 = vmatpush.bf16.msrb.mxu0 %v4021_v47  ;;  %v1869_v22 = vmax.f32 %v1200_v3, 0.0 }
 0x180   :  { %1492 = vmatmul.bf16.gmra.mxu3 %v5750_v41  ;;  %v5758_v26 = vpack.c.bf16 %v1855_v39, %v1839_v18  ;;  %v1868_v39 = vmax.f32 %v1151_v31, 0.0 }
 0x181   :  { %6508 = vst [vmem:[#allocation26_spill] sm:$0xff] %v5755_v17  ;;  %1662 = vmatpush.bf16.msrb.mxu3 %v4033_v43 }
 0x182   :  { %6509 = vst [vmem:[#allocation27_spill] sm:$0xff] %v5758_v26  ;;  %v1248_v57 = vpop.f32.mrf.mxu2  ;;  %v4022_v26 = vld [vmem:[#allocation2 + $0x70] sm:$0xf0] }
 0x183   :  { %v1297_v7 = vpop.f32.mrf.mxu3  ;;  %v1152_v25 = vpop.f32.mrf.mxu0  ;;  %v4025_v63 = vor.u32 %v5008_v21, %v4022_v26  ;;  %v1249_v5 = vadd.f32 %v1248_v57, %v5633_v50  ;;  %v5775_v57 = vld [vmem:[%s6484_s0 + $0x30] sm:$0xff] }
 0x184   :  { %v1153_v17 = vadd.f32 %v1152_v25, %v5611_v58  ;;  %v1201_v34 = vpop.f32.mrf.mxu1  ;;  %v1298_v37 = vadd.f32 %v1297_v7, %v5636_v40  ;;  %v5153_v7 = vld [vmem:[#allocation4 + $0xb8] sm:$0xff] }
 0x185   :  { %v1202_v18 = vadd.f32 %v1201_v34, %v5620_v59  ;;  %1564 = vmatpush.bf16.msrb.mxu1 %v4025_v63  ;;  %v1870_v3 = vmax.f32 %v1249_v5, 0.0  ;;  %3214 = vmatpush.bf16.msra.mxu2 %v5153_v7 }
 0x186   :  { %v1884_v48 = vmax.f32 %v1153_v17, 0.0  ;;  %v1871_v26 = vmax.f32 %v1298_v37, 0.0 }
 0x187   :  { %v1885_v15 = vmax.f32 %v1202_v18, 0.0 }
 0x188   :  { %v5764_v8 = vpack.c.bf16 %v1884_v48, %v1868_v39  ;;  %v5137_v39 = vld [vmem:[#allocation4 + $0x38] sm:$0xff] }
 0x189   :  { %v5767_v0 = vpack.c.bf16 %v1885_v15, %v1869_v22  ;;  %v5161_v48 = vld [vmem:[#allocation4 + $0xf8] sm:$0xff]  ;;  %3116 = vmatpush.bf16.msra.mxu0 %v5137_v39 }
 0x18a   :  { %6510 = vst [vmem:[#allocation28_spill] sm:$0xff] %v5764_v8  ;;  %v1250_v19 = vpop.f32.mrf.mxu2  ;;  %3263 = vmatpush.bf16.msra.mxu3 %v5161_v48 }
 0x18b   :  { %6511 = vst [vmem:[#allocation29_spill] sm:$0xff] %v5767_v0  ;;  %v1251_v47 = vadd.f32 %v1250_v19, %v5633_v50  ;;  %v1299_v34 = vpop.f32.mrf.mxu3  ;;  %v1155_v31 = vpop.f32.mrf.mxu0 }
 0x18c   :  { %v1300_v17 = vadd.f32 %v1299_v34, %v5636_v40  ;;  %v1204_v43 = vpop.f32.mrf.mxu1  ;;  %v1156_v22 = vadd.f32 %v1155_v31, %v5611_v58 }
 0x18d   :  { %v1886_v25 = vmax.f32 %v1251_v47, 0.0  ;;  %v1205_v5 = vadd.f32 %v1204_v43, %v5620_v59 }
 0x18e   :  { %v1887_v18 = vmax.f32 %v1300_v17, 0.0  ;;  %1350 = vmatmul.bf16.gmra.mxu0 %v5775_v57  ;;  %1399 = vmatmul.bf16.gmra.mxu1 %v5775_v57 }
 0x18f   :  { %1448 = vmatmul.bf16.gmra.mxu2 %v5775_v57  ;;  %v5780_v15 = vpack.c.bf16 %v1886_v25, %v1870_v3  ;;  %v1900_v3 = vmax.f32 %v1156_v22, 0.0 }
 0x190   :  { %1497 = vmatmul.bf16.gmra.mxu3 %v5775_v57  ;;  %v5783_v21 = vpack.c.bf16 %v1887_v18, %v1871_v26  ;;  %v1901_v26 = vmax.f32 %v1205_v5, 0.0 }
 0x191   :  { %6512 = vst [vmem:[#allocation30_spill] sm:$0xff] %v5780_v15  ;;  %v5145_v15 = vld [vmem:[#allocation4 + $0x78] sm:$0xff] }
 0x192   :  { %6513 = vst [vmem:[#allocation31_spill] sm:$0xff] %v5783_v21  ;;  %v1253_v63 = vpop.f32.mrf.mxu2  ;;  %3165 = vmatpush.bf16.msra.mxu1 %v5145_v15 }
 0x193   :  { %v1302_v37 = vpop.f32.mrf.mxu3  ;;  %v1157_v19 = vpop.f32.mrf.mxu0  ;;  %v1254_v7 = vadd.f32 %v1253_v63, %v5633_v50  ;;  %v5800_v63 = vld [vmem:[%s6484_s0 + $0x38] sm:$0xff] }
 0x194   :  { %v1158_v47 = vadd.f32 %v1157_v19, %v5611_v58  ;;  %v1206_v34 = vpop.f32.mrf.mxu1  ;;  %v1303_v43 = vadd.f32 %v1302_v37, %v5636_v40 }
 0x195   :  { %v1207_v17 = vadd.f32 %v1206_v34, %v5620_v59  ;;  %v1902_v34 = vmax.f32 %v1254_v7, 0.0 }
 0x196   :  { %v1916_v25 = vmax.f32 %v1158_v47, 0.0 }
 0x197   :  { %v1917_v18 = vmax.f32 %v1207_v17, 0.0  ;;  %v1903_v17 = vmax.f32 %v1303_v43, 0.0 }
 0x198   :  { %v5789_v31 = vpack.c.bf16 %v1916_v25, %v1900_v3  ;;  %v5136_v3 = vld [vmem:[#allocation4 + $0x30] sm:$0xff] }
 0x199   :  { %v5792_v39 = vpack.c.bf16 %v1917_v18, %v1901_v26  ;;  %v5160_v25 = vld [vmem:[#allocation4 + $0xf0] sm:$0xff]  ;;  %3117 = vmatpush.bf16.msra.mxu0 %v5136_v3 }
 0x19a   :  { %6514 = vst [vmem:[#allocation32_spill] sm:$0xff] %v5789_v31  ;;  %v1255_v48 = vpop.f32.mrf.mxu2  ;;  %3264 = vmatpush.bf16.msra.mxu3 %v5160_v25  ;;  %v5144_v31 = vld [vmem:[#allocation4 + $0x70] sm:$0xff] }
 0x19b   :  { %6515 = vst [vmem:[#allocation33_spill] sm:$0xff] %v5792_v39  ;;  %v1256_v19 = vadd.f32 %v1255_v48, %v5633_v50  ;;  %v1304_v21 = vpop.f32.mrf.mxu3  ;;  %v1160_v0 = vpop.f32.mrf.mxu0  ;;  %3166 = vmatpush.bf16.msra.mxu1 %v5144_v31 }
 0x19c   :  { %v1305_v22 = vadd.f32 %v1304_v21, %v5636_v40  ;;  %v1209_v47 = vpop.f32.mrf.mxu1  ;;  %v5152_v21 = vld [vmem:[#allocation4 + $0xb0] sm:$0xff]  ;;  %v1161_v18 = vadd.f32 %v1160_v0, %v5611_v58 }
 0x19d   :  { %v1918_v5 = vmax.f32 %v1256_v19, 0.0  ;;  %3215 = vmatpush.bf16.msra.mxu2 %v5152_v21  ;;  %v1210_v43 = vadd.f32 %v1209_v47, %v5620_v59 }
 0x19e   :  { %v1919_v15 = vmax.f32 %v1305_v22, 0.0  ;;  %1355 = vmatmul.bf16.gmra.mxu0 %v5800_v63  ;;  %1404 = vmatmul.bf16.gmra.mxu1 %v5800_v63 }
 0x19f   :  { %1453 = vmatmul.bf16.gmra.mxu2 %v5800_v63  ;;  %v5805_v37 = vpack.c.bf16 %v1918_v5, %v1902_v34 }
 0x1a0   :  { %1502 = vmatmul.bf16.gmra.mxu3 %v5800_v63  ;;  %v5808_v26 = vpack.c.bf16 %v1919_v15, %v1903_v17  ;;  %v1933_v17 = vmax.f32 %v1210_v43, 0.0 }
 0x1a1   :  { %6516 = vst [vmem:[#allocation34_spill] sm:$0xff] %v5805_v37  ;;  %v1932_v37 = vmax.f32 %v1161_v18, 0.0 }
 0x1a2   :  { %6517 = vst [vmem:[#allocation35_spill] sm:$0xff] %v5808_v26  ;;  %v1258_v7 = vpop.f32.mrf.mxu2 }
 0x1a3   :  { %v1307_v48 = vpop.f32.mrf.mxu3  ;;  %v1162_v19 = vpop.f32.mrf.mxu0  ;;  %v1259_v21 = vadd.f32 %v1258_v7, %v5633_v50 }
 0x1a4   :  { %v1163_v22 = vadd.f32 %v1162_v19, %v5611_v58  ;;  %v1211_v34 = vpop.f32.mrf.mxu1  ;;  %v1308_v47 = vadd.f32 %v1307_v48, %v5636_v40 }
 0x1a5   :  { %v1212_v5 = vadd.f32 %v1211_v34, %v5620_v59  ;;  %v5824_v59 = vld [vmem:[%s6486_s2 + $0x8] sm:$0xff] }
 0x1a6   :  { %v1948_v39 = vmax.f32 %v1163_v22, 0.0  ;;  %v1935_v7 = vmax.f32 %v1308_v47, 0.0  ;;  %v5828_v34 = vperm.slane %v5824_v59, 0 }
 0x1a7   :  { %v1949_v15 = vmax.f32 %v1212_v5, 0.0  ;;  %v5135_v5 = vld [vmem:[#allocation4 + $0x28] sm:$0xff] }
 0x1a8   :  { %v5814_v0 = vpack.c.bf16 %v1948_v39, %v1932_v37  ;;  %v1934_v37 = vmax.f32 %v1259_v21, 0.0  ;;  %3118 = vmatpush.bf16.msra.mxu0 %v5135_v5 }
 0x1a9   :  { %v5817_v3 = vpack.c.bf16 %v1949_v15, %v1933_v17  ;;  %v5159_v17 = vld [vmem:[#allocation4 + $0xe8] sm:$0xff] }
 0x1aa   :  { %6518 = vst [vmem:[#allocation36_spill] sm:$0xff] %v5814_v0  ;;  %v1260_v25 = vpop.f32.mrf.mxu2  ;;  %3265 = vmatpush.bf16.msra.mxu3 %v5159_v17 }
 0x1ab   :  { %6519 = vst [vmem:[#allocation37_spill] sm:$0xff] %v5817_v3  ;;  %v1261_v58 = vadd.f32 %v1260_v25, %v5633_v50  ;;  %v1309_v19 = vpop.f32.mrf.mxu3  ;;  %v1321_v18 = vpop.f32.mrf.mxu0  ;;  %v5832_v50 = vperm.slane %v5824_v59, 1 }
 0x1ac   :  { %v1310_v31 = vadd.f32 %v1309_v19, %v5636_v40  ;;  %v1370_v39 = vpop.f32.mrf.mxu1  ;;  %v5151_v40 = vld [vmem:[#allocation4 + $0xa8] sm:$0xff]  ;;  %v1322_v21 = vadd.f32 %v1321_v18, %v5828_v34 }
 0x1ad   :  { %v1950_v43 = vmax.f32 %v1261_v58, 0.0  ;;  %3216 = vmatpush.bf16.msra.mxu2 %v5151_v40  ;;  %v1371_v25 = vadd.f32 %v1370_v39, %v5832_v50  ;;  %v5143_v40 = vld [vmem:[#allocation4 + $0x68] sm:$0xff] }
 0x1ae   :  { %v1951_v22 = vmax.f32 %v1310_v31, 0.0  ;;  %1516 = vmatmul.bf16.vlgmr.msrb.gmra.mxu0 %v5616_v45  ;;  %1565 = vmatmul.bf16.vlgmr.msrb.gmra.mxu1 %v5616_v45 }
 0x1af   :  { %1614 = vmatmul.bf16.vlgmr.msrb.gmra.mxu2 %v5616_v45  ;;  %v5836_v48 = vpack.c.bf16 %v1950_v43, %v1934_v37  ;;  %v1713_v5 = vmax.f32 %v1371_v25, 0.0  ;;  %3167 = vmatpush.bf16.msra.mxu1 %v5143_v40 }
 0x1b0   :  { %1663 = vmatmul.bf16.vlgmr.msrb.gmra.mxu3 %v5616_v45  ;;  %v5839_v15 = vpack.c.bf16 %v1951_v22, %v1935_v7  ;;  %v5845_v45 = vperm.slane %v5824_v59, 2  ;;  %v1712_v7 = vmax.f32 %v1322_v21, 0.0  ;;  %v5849_v22 = vperm.slane %v5824_v59, 3 }
 0x1b1   :  { %6520 = vst [vmem:[#allocation38_spill] sm:$0xff] %v5836_v48 }
 0x1b2   :  { %6521 = vst [vmem:[#allocation39_spill] sm:$0xff] %v5839_v15  ;;  %v1419_v47 = vpop.f32.mrf.mxu2 }
 0x1b3   :  { %v1468_v58 = vpop.f32.mrf.mxu3  ;;  %v1323_v19 = vpop.f32.mrf.mxu0  ;;  %v1420_v17 = vadd.f32 %v1419_v47, %v5845_v45  ;;  %v5134_v47 = vld [vmem:[#allocation4 + $0x20] sm:$0xff] }
 0x1b4   :  { %v1324_v31 = vadd.f32 %v1323_v19, %v5828_v34  ;;  %v1372_v37 = vpop.f32.mrf.mxu1  ;;  %v1469_v48 = vadd.f32 %v1468_v58, %v5849_v22  ;;  %v5158_v58 = vld [vmem:[#allocation4 + $0xe0] sm:$0xff]  ;;  %3119 = vmatpush.bf16.msra.mxu0 %v5134_v47 }
 0x1b5   :  { %v1373_v43 = vadd.f32 %v1372_v37, %v5832_v50  ;;  %v1714_v8 = vmax.f32 %v1420_v17, 0.0  ;;  %3266 = vmatpush.bf16.msra.mxu3 %v5158_v58 }
 0x1b6   :  { %v1728_v18 = vmax.f32 %v1324_v31, 0.0 }
 0x1b7   :  { %v1729_v15 = vmax.f32 %v1373_v43, 0.0  ;;  %v1715_v43 = vmax.f32 %v1469_v48, 0.0 }
 0x1b8   :  { %v5851_v39 = vpack.c.bf16 %v1728_v18, %v1712_v7 }
 0x1b9   :  { %v5854_v19 = vpack.c.bf16 %v1729_v15, %v1713_v5 }
 0x1ba   :  { %v1421_v3 = vpop.f32.mrf.mxu2 }
 0x1bb   :  { %6522 = vst [vmem:[#allocation40_spill] sm:$0xff] %v5854_v19  ;;  %v1422_v37 = vadd.f32 %v1421_v3, %v5845_v45  ;;  %v1470_v21 = vpop.f32.mrf.mxu3  ;;  %v1326_v0 = vpop.f32.mrf.mxu0  ;;  %v5150_v3 = vld [vmem:[#allocation4 + $0xa0] sm:$0xff] }
 0x1bc   :  { %v1471_v26 = vadd.f32 %v1470_v21, %v5849_v22  ;;  %v1375_v31 = vpop.f32.mrf.mxu1  ;;  %v1327_v40 = vadd.f32 %v1326_v0, %v5828_v34  ;;  %3217 = vmatpush.bf16.msra.mxu2 %v5150_v3 }
 0x1bd   :  { %v1730_v25 = vmax.f32 %v1422_v37, 0.0 }
 0x1be   :  { %v1731_v7 = vmax.f32 %v1471_v26, 0.0  ;;  %1521 = vmatmul.bf16.gmra.mxu0 %v5650_v27  ;;  %1570 = vmatmul.bf16.gmra.mxu1 %v5650_v27  ;;  %v1376_v26 = vadd.f32 %v1375_v31, %v5832_v50 }
 0x1bf   :  { %v5860_v18 = vpack.c.bf16 %v1730_v25, %v1714_v8  ;;  %1619 = vmatmul.bf16.gmra.mxu2 %v5650_v27  ;;  %v1744_v25 = vmax.f32 %v1327_v40, 0.0 }
 0x1c0   :  { %v5864_v15 = vpack.c.bf16 %v1731_v7, %v1715_v43  ;;  %1668 = vmatmul.bf16.gmra.mxu3 %v5650_v27  ;;  %v5142_v43 = vld [vmem:[#allocation4 + $0x60] sm:$0xff]  ;;  %v1745_v7 = vmax.f32 %v1376_v26, 0.0 }
 0x1c1   :  { %6523 = vst [vmem:[#allocation41_spill] sm:$0xff] %v5860_v18  ;;  %3168 = vmatpush.bf16.msra.mxu1 %v5142_v43 }
 0x1c2   :  { %6524 = vst [vmem:[#allocation42_spill] sm:$0xff] %v5864_v15  ;;  %v1424_v5 = vpop.f32.mrf.mxu2 }
 0x1c3   :  { %v1473_v8 = vpop.f32.mrf.mxu3  ;;  %v1328_v48 = vpop.f32.mrf.mxu0  ;;  %v1425_v3 = vadd.f32 %v1424_v5, %v5845_v45  ;;  %v5149_v5 = vld [vmem:[#allocation4 + $0x98] sm:$0xff] }
 0x1c4   :  { %v1329_v17 = vadd.f32 %v1328_v48, %v5828_v34  ;;  %v1377_v37 = vpop.f32.mrf.mxu1  ;;  %v1474_v31 = vadd.f32 %v1473_v8, %v5849_v22  ;;  %v5133_v8 = vld [vmem:[#allocation4 + $0x18] sm:$0xff]  ;;  %3218 = vmatpush.bf16.msra.mxu2 %v5149_v5 }
 0x1c5   :  { %v1378_v21 = vadd.f32 %v1377_v37, %v5832_v50  ;;  %v1746_v37 = vmax.f32 %v1425_v3, 0.0  ;;  %3120 = vmatpush.bf16.msra.mxu0 %v5133_v8 }
 0x1c6   :  { %v1760_v27 = vmax.f32 %v1329_v17, 0.0 }
 0x1c7   :  { %v1761_v15 = vmax.f32 %v1378_v21, 0.0  ;;  %v1747_v21 = vmax.f32 %v1474_v31, 0.0 }
 0x1c8   :  { %v5871_v0 = vpack.c.bf16 %v1760_v27, %v1744_v25  ;;  %v5157_v25 = vld [vmem:[#allocation4 + $0xd8] sm:$0xff] }
 0x1c9   :  { %v5874_v47 = vpack.c.bf16 %v1761_v15, %v1745_v7  ;;  %3267 = vmatpush.bf16.msra.mxu3 %v5157_v25 }
 0x1ca   :  { %v1426_v58 = vpop.f32.mrf.mxu2 }
 0x1cb   :  { %6525 = vst [vmem:[#allocation43_spill] sm:$0xff] %v5874_v47  ;;  %v1427_v48 = vadd.f32 %v1426_v58, %v5845_v45  ;;  %v1475_v18 = vpop.f32.mrf.mxu3  ;;  %v1331_v19 = vpop.f32.mrf.mxu0 }
 0x1cc   :  { %v1476_v40 = vadd.f32 %v1475_v18, %v5849_v22  ;;  %v1380_v17 = vpop.f32.mrf.mxu1  ;;  %v1332_v18 = vadd.f32 %v1331_v19, %v5828_v34 }
 0x1cd   :  { %v1762_v26 = vmax.f32 %v1427_v48, 0.0  ;;  %v1381_v3 = vadd.f32 %v1380_v17, %v5832_v50 }
 0x1ce   :  { %v1763_v43 = vmax.f32 %v1476_v40, 0.0  ;;  %1526 = vmatmul.bf16.gmra.mxu0 %v5675_v11  ;;  %1575 = vmatmul.bf16.gmra.mxu1 %v5675_v11 }
 0x1cf   :  { %1624 = vmatmul.bf16.gmra.mxu2 %v5675_v11  ;;  %v5882_v15 = vpack.c.bf16 %v1762_v26, %v1746_v37  ;;  %v1776_v37 = vmax.f32 %v1332_v18, 0.0 }
 0x1d0   :  { %1673 = vmatmul.bf16.gmra.mxu3 %v5675_v11  ;;  %v5885_v27 = vpack.c.bf16 %v1763_v43, %v1747_v21  ;;  %v1777_v21 = vmax.f32 %v1381_v3, 0.0 }
 0x1d1   :  { %6526 = vst [vmem:[#allocation44_spill] sm:$0xff] %v5882_v15  ;;  %v5141_v15 = vld [vmem:[#allocation4 + $0x58] sm:$0xff] }
 0x1d2   :  { %6527 = vst [vmem:[#allocation45_spill] sm:$0xff] %v5885_v27  ;;  %v1429_v7 = vpop.f32.mrf.mxu2  ;;  %3169 = vmatpush.bf16.msra.mxu1 %v5141_v15 }
 0x1d3   :  { %v1478_v31 = vpop.f32.mrf.mxu3  ;;  %v1333_v58 = vpop.f32.mrf.mxu0  ;;  %v1430_v5 = vadd.f32 %v1429_v7, %v5845_v45 }
 0x1d4   :  { %v1334_v48 = vadd.f32 %v1333_v58, %v5828_v34  ;;  %v1382_v40 = vpop.f32.mrf.mxu1  ;;  %v1479_v17 = vadd.f32 %v1478_v31, %v5849_v22  ;;  %v5148_v31 = vld [vmem:[#allocation4 + $0x90] sm:$0xff] }
 0x1d5   :  { %v1383_v11 = vadd.f32 %v1382_v40, %v5832_v50  ;;  %v1778_v40 = vmax.f32 %v1430_v5, 0.0  ;;  %3219 = vmatpush.bf16.msra.mxu2 %v5148_v31 }
 0x1d6   :  { %v1792_v26 = vmax.f32 %v1334_v48, 0.0 }
 0x1d7   :  { %v1793_v43 = vmax.f32 %v1383_v11, 0.0  ;;  %v1779_v11 = vmax.f32 %v1479_v17, 0.0 }
 0x1d8   :  { %v5891_v19 = vpack.c.bf16 %v1792_v26, %v1776_v37  ;;  %v5132_v37 = vld [vmem:[#allocation4 + $0x10] sm:$0xff] }
 0x1d9   :  { %v5894_v8 = vpack.c.bf16 %v1793_v43, %v1777_v21  ;;  %v5156_v26 = vld [vmem:[#allocation4 + $0xd0] sm:$0xff]  ;;  %3121 = vmatpush.bf16.msra.mxu0 %v5132_v37 }
 0x1da   :  { %v1431_v25 = vpop.f32.mrf.mxu2  ;;  %3268 = vmatpush.bf16.msra.mxu3 %v5156_v26 }
 0x1db   :  { %6528 = vst [vmem:[#allocation46_spill] sm:$0xff] %v5894_v8  ;;  %v1432_v58 = vadd.f32 %v1431_v25, %v5845_v45  ;;  %v1480_v27 = vpop.f32.mrf.mxu3  ;;  %v1336_v47 = vpop.f32.mrf.mxu0 }
 0x1dc   :  { %v1481_v18 = vadd.f32 %v1480_v27, %v5849_v22  ;;  %v1385_v48 = vpop.f32.mrf.mxu1  ;;  %v1337_v27 = vadd.f32 %v1336_v47, %v5828_v34 }
 0x1dd   :  { %v1794_v3 = vmax.f32 %v1432_v58, 0.0  ;;  %v1386_v5 = vadd.f32 %v1385_v48, %v5832_v50 }
 0x1de   :  { %v1795_v15 = vmax.f32 %v1481_v18, 0.0  ;;  %1531 = vmatmul.bf16.gmra.mxu0 %v5700_v12  ;;  %1580 = vmatmul.bf16.gmra.mxu1 %v5700_v12 }
 0x1df   :  { %1629 = vmatmul.bf16.gmra.mxu2 %v5700_v12  ;;  %v5902_v7 = vpack.c.bf16 %v1794_v3, %v1778_v40  ;;  %v1808_v40 = vmax.f32 %v1337_v27, 0.0 }
 0x1e0   :  { %1678 = vmatmul.bf16.gmra.mxu3 %v5700_v12  ;;  %v5905_v21 = vpack.c.bf16 %v1795_v15, %v1779_v11  ;;  %v1809_v11 = vmax.f32 %v1386_v5, 0.0 }
 0x1e1   :  { %6529 = vst [vmem:[#allocation47_spill] sm:$0xff] %v5902_v7  ;;  %v5140_v7 = vld [vmem:[#allocation4 + $0x50] sm:$0xff] }
 0x1e2   :  { %6530 = vst [vmem:[#allocation48_spill] sm:$0xff] %v5905_v21  ;;  %v1434_v43 = vpop.f32.mrf.mxu2  ;;  %3170 = vmatpush.bf16.msra.mxu1 %v5140_v7 }
 0x1e3   :  { %v1483_v17 = vpop.f32.mrf.mxu3  ;;  %v1338_v25 = vpop.f32.mrf.mxu0  ;;  %v1435_v31 = vadd.f32 %v1434_v43, %v5845_v45 }
 0x1e4   :  { %v1339_v58 = vadd.f32 %v1338_v25, %v5828_v34  ;;  %v1387_v18 = vpop.f32.mrf.mxu1  ;;  %v1484_v48 = vadd.f32 %v1483_v17, %v5849_v22  ;;  %v5147_v17 = vld [vmem:[#allocation4 + $0x88] sm:$0xff] }
 0x1e5   :  { %v1388_v12 = vadd.f32 %v1387_v18, %v5832_v50  ;;  %v1810_v18 = vmax.f32 %v1435_v31, 0.0  ;;  %3220 = vmatpush.bf16.msra.mxu2 %v5147_v17 }
 0x1e6   :  { %v1824_v3 = vmax.f32 %v1339_v58, 0.0 }
 0x1e7   :  { %v1825_v15 = vmax.f32 %v1388_v12, 0.0  ;;  %v1811_v12 = vmax.f32 %v1484_v48, 0.0 }
 0x1e8   :  { %v5911_v47 = vpack.c.bf16 %v1824_v3, %v1808_v40  ;;  %v5131_v40 = vld [vmem:[#allocation4 + $0x8] sm:$0xff] }
 0x1e9   :  { %v5914_v37 = vpack.c.bf16 %v1825_v15, %v1809_v11  ;;  %v5155_v3 = vld [vmem:[#allocation4 + $0xc8] sm:$0xff]  ;;  %3122 = vmatpush.bf16.msra.mxu0 %v5131_v40 }
 0x1ea   :  { %v1436_v26 = vpop.f32.mrf.mxu2  ;;  %3269 = vmatpush.bf16.msra.mxu3 %v5155_v3 }
 0x1eb   :  { %6531 = vst [vmem:[#allocation49_spill] sm:$0xff] %v5914_v37  ;;  %v1437_v25 = vadd.f32 %v1436_v26, %v5845_v45  ;;  %v1485_v21 = vpop.f32.mrf.mxu3  ;;  %v1341_v8 = vpop.f32.mrf.mxu0 }
 0x1ec   :  { %v1486_v27 = vadd.f32 %v1485_v21, %v5849_v22  ;;  %v1390_v58 = vpop.f32.mrf.mxu1  ;;  %v1342_v21 = vadd.f32 %v1341_v8, %v5828_v34 }
 0x1ed   :  { %v1826_v5 = vmax.f32 %v1437_v25, 0.0  ;;  %v1391_v31 = vadd.f32 %v1390_v58, %v5832_v50 }
 0x1ee   :  { %v1827_v7 = vmax.f32 %v1486_v27, 0.0  ;;  %1536 = vmatmul.bf16.gmra.mxu0 %v5725_v16  ;;  %1585 = vmatmul.bf16.gmra.mxu1 %v5725_v16 }
 0x1ef   :  { %1634 = vmatmul.bf16.gmra.mxu2 %v5725_v16  ;;  %v5922_v43 = vpack.c.bf16 %v1826_v5, %v1810_v18  ;;  %v1840_v18 = vmax.f32 %v1342_v21, 0.0 }
 0x1f0   :  { %1683 = vmatmul.bf16.gmra.mxu3 %v5725_v16  ;;  %v5925_v11 = vpack.c.bf16 %v1827_v7, %v1811_v12  ;;  %v1841_v12 = vmax.f32 %v1391_v31, 0.0 }
 0x1f1   :  { %6532 = vst [vmem:[#allocation50_spill] sm:$0xff] %v5922_v43  ;;  %v5139_v43 = vld [vmem:[#allocation4 + $0x48] sm:$0xff] }
 0x1f2   :  { %6533 = vst [vmem:[#allocation51_spill] sm:$0xff] %v5925_v11  ;;  %v1439_v15 = vpop.f32.mrf.mxu2  ;;  %3171 = vmatpush.bf16.msra.mxu1 %v5139_v43 }
 0x1f3   :  { %v1488_v48 = vpop.f32.mrf.mxu3  ;;  %v1343_v26 = vpop.f32.mrf.mxu0  ;;  %v1440_v17 = vadd.f32 %v1439_v15, %v5845_v45 }
 0x1f4   :  { %v1344_v25 = vadd.f32 %v1343_v26, %v5828_v34  ;;  %v1392_v27 = vpop.f32.mrf.mxu1  ;;  %v1489_v58 = vadd.f32 %v1488_v48, %v5849_v22  ;;  %v5146_v48 = vld [vmem:[#allocation4 + $0x80] sm:$0xff] }
 0x1f5   :  { %v1393_v16 = vadd.f32 %v1392_v27, %v5832_v50  ;;  %v1842_v27 = vmax.f32 %v1440_v17, 0.0  ;;  %3221 = vmatpush.bf16.msra.mxu2 %v5146_v48 }
 0x1f6   :  { %v1856_v5 = vmax.f32 %v1344_v25, 0.0 }
 0x1f7   :  { %v1857_v7 = vmax.f32 %v1393_v16, 0.0  ;;  %v1843_v16 = vmax.f32 %v1489_v58, 0.0 }
 0x1f8   :  { %v5931_v8 = vpack.c.bf16 %v1856_v5, %v1840_v18  ;;  %v5130_v18 = vld [vmem:[#allocation4] sm:$0xff] }
 0x1f9   :  { %v5934_v40 = vpack.c.bf16 %v1857_v7, %v1841_v12  ;;  %v5154_v5 = vld [vmem:[#allocation4 + $0xc0] sm:$0xff]  ;;  %3123 = vmatpush.bf16.msra.mxu0 %v5130_v18 }
 0x1fa   :  { %v1441_v3 = vpop.f32.mrf.mxu2  ;;  %3270 = vmatpush.bf16.msra.mxu3 %v5154_v5 }
 0x1fb   :  { %6534 = vst [vmem:[#allocation52_spill] sm:$0xff] %v5934_v40  ;;  %v1442_v26 = vadd.f32 %v1441_v3, %v5845_v45  ;;  %v1490_v11 = vpop.f32.mrf.mxu3  ;;  %v1346_v37 = vpop.f32.mrf.mxu0 }
 0x1fc   :  { %v1491_v21 = vadd.f32 %v1490_v11, %v5849_v22  ;;  %v1395_v25 = vpop.f32.mrf.mxu1  ;;  %v1347_v11 = vadd.f32 %v1346_v37, %v5828_v34 }
 0x1fd   :  { %v1858_v31 = vmax.f32 %v1442_v26, 0.0  ;;  %v1396_v17 = vadd.f32 %v1395_v25, %v5832_v50 }
 0x1fe   :  { %v1859_v43 = vmax.f32 %v1491_v21, 0.0  ;;  %1541 = vmatmul.bf16.gmra.mxu0 %v5750_v41  ;;  %1590 = vmatmul.bf16.gmra.mxu1 %v5750_v41 }
 0x1ff   :  { %1639 = vmatmul.bf16.gmra.mxu2 %v5750_v41  ;;  %v5942_v15 = vpack.c.bf16 %v1858_v31, %v1842_v27  ;;  %v1872_v27 = vmax.f32 %v1347_v11, 0.0 }
 0x200   :  { %1688 = vmatmul.bf16.gmra.mxu3 %v5750_v41  ;;  %v5945_v12 = vpack.c.bf16 %v1859_v43, %v1843_v16  ;;  %v1873_v16 = vmax.f32 %v1396_v17, 0.0 }
 0x201   :  { %6535 = vst [vmem:[#allocation53_spill] sm:$0xff] %v5942_v15  ;;  %v5138_v15 = vld [vmem:[#allocation4 + $0x40] sm:$0xff] }
 0x202   :  { %6536 = vst [vmem:[#allocation54_spill] sm:$0xff] %v5945_v12  ;;  %v1444_v7 = vpop.f32.mrf.mxu2  ;;  %3172 = vmatpush.bf16.msra.mxu1 %v5138_v15 }
 0x203   :  { %v1493_v58 = vpop.f32.mrf.mxu3  ;;  %v1348_v3 = vpop.f32.mrf.mxu0  ;;  %v1445_v48 = vadd.f32 %v1444_v7, %v5845_v45 }
 0x204   :  { %v1349_v26 = vadd.f32 %v1348_v3, %v5828_v34  ;;  %v1397_v21 = vpop.f32.mrf.mxu1  ;;  %v1494_v25 = vadd.f32 %v1493_v58, %v5849_v22  ;;  %v5185_v58 = vld [vmem:[#allocation4 + $0x1b8] sm:$0xff] }
 0x205   :  { %v1398_v41 = vadd.f32 %v1397_v21, %v5832_v50  ;;  %v1874_v21 = vmax.f32 %v1445_v48, 0.0  ;;  %3410 = vmatpush.bf16.msrb.mxu2 %v5185_v58 }
 0x206   :  { %v1888_v31 = vmax.f32 %v1349_v26, 0.0 }
 0x207   :  { %v1889_v43 = vmax.f32 %v1398_v41, 0.0  ;;  %v1875_v41 = vmax.f32 %v1494_v25, 0.0 }
 0x208   :  { %v5951_v37 = vpack.c.bf16 %v1888_v31, %v1872_v27  ;;  %v5169_v27 = vld [vmem:[#allocation4 + $0x138] sm:$0xff] }
 0x209   :  { %v5954_v18 = vpack.c.bf16 %v1889_v43, %v1873_v16  ;;  %v5193_v31 = vld [vmem:[#allocation4 + $0x1f8] sm:$0xff]  ;;  %3312 = vmatpush.bf16.msrb.mxu0 %v5169_v27 }
 0x20a   :  { %v1446_v5 = vpop.f32.mrf.mxu2  ;;  %3459 = vmatpush.bf16.msrb.mxu3 %v5193_v31 }
 0x20b   :  { %6537 = vst [vmem:[#allocation55_spill] sm:$0xff] %v5954_v18  ;;  %v1447_v3 = vadd.f32 %v1446_v5, %v5845_v45  ;;  %v1495_v12 = vpop.f32.mrf.mxu3  ;;  %v1351_v40 = vpop.f32.mrf.mxu0 }
 0x20c   :  { %v1496_v11 = vadd.f32 %v1495_v12, %v5849_v22  ;;  %v1400_v26 = vpop.f32.mrf.mxu1  ;;  %v1352_v12 = vadd.f32 %v1351_v40, %v5828_v34 }
 0x20d   :  { %v1890_v17 = vmax.f32 %v1447_v3, 0.0  ;;  %v1401_v48 = vadd.f32 %v1400_v26, %v5832_v50 }
 0x20e   :  { %v1891_v15 = vmax.f32 %v1496_v11, 0.0  ;;  %1546 = vmatmul.bf16.gmra.mxu0 %v5775_v57  ;;  %1595 = vmatmul.bf16.gmra.mxu1 %v5775_v57 }
 0x20f   :  { %1644 = vmatmul.bf16.gmra.mxu2 %v5775_v57  ;;  %v5962_v7 = vpack.c.bf16 %v1890_v17, %v1874_v21  ;;  %v1904_v21 = vmax.f32 %v1352_v12, 0.0 }
 0x210   :  { %1693 = vmatmul.bf16.gmra.mxu3 %v5775_v57  ;;  %v5965_v16 = vpack.c.bf16 %v1891_v15, %v1875_v41  ;;  %v1905_v41 = vmax.f32 %v1401_v48, 0.0 }
 0x211   :  { %6538 = vst [vmem:[#allocation56_spill] sm:$0xff] %v5962_v7  ;;  %v5177_v7 = vld [vmem:[#allocation4 + $0x178] sm:$0xff] }
 0x212   :  { %6539 = vst [vmem:[#allocation57_spill] sm:$0xff] %v5965_v16  ;;  %v1449_v43 = vpop.f32.mrf.mxu2  ;;  %3361 = vmatpush.bf16.msrb.mxu1 %v5177_v7 }
 0x213   :  { %v1498_v25 = vpop.f32.mrf.mxu3  ;;  %v1353_v5 = vpop.f32.mrf.mxu0  ;;  %v1450_v58 = vadd.f32 %v1449_v43, %v5845_v45 }
 0x214   :  { %v1354_v3 = vadd.f32 %v1353_v5, %v5828_v34  ;;  %v1402_v11 = vpop.f32.mrf.mxu1  ;;  %v1499_v26 = vadd.f32 %v1498_v25, %v5849_v22  ;;  %v5184_v25 = vld [vmem:[#allocation4 + $0x1b0] sm:$0xff] }
 0x215   :  { %v1403_v57 = vadd.f32 %v1402_v11, %v5832_v50  ;;  %v1906_v11 = vmax.f32 %v1450_v58, 0.0  ;;  %3411 = vmatpush.bf16.msrb.mxu2 %v5184_v25 }
 0x216   :  { %v1920_v17 = vmax.f32 %v1354_v3, 0.0 }
 0x217   :  { %v1921_v15 = vmax.f32 %v1403_v57, 0.0  ;;  %v1907_v57 = vmax.f32 %v1499_v26, 0.0 }
 0x218   :  { %v5971_v40 = vpack.c.bf16 %v1920_v17, %v1904_v21  ;;  %v5168_v21 = vld [vmem:[#allocation4 + $0x130] sm:$0xff] }
 0x219   :  { %v5974_v27 = vpack.c.bf16 %v1921_v15, %v1905_v41  ;;  %v5192_v17 = vld [vmem:[#allocation4 + $0x1f0] sm:$0xff]  ;;  %3313 = vmatpush.bf16.msrb.mxu0 %v5168_v21 }
 0x21a   :  { %v1451_v31 = vpop.f32.mrf.mxu2  ;;  %3460 = vmatpush.bf16.msrb.mxu3 %v5192_v17 }
 0x21b   :  { %v1452_v5 = vadd.f32 %v1451_v31, %v5845_v45  ;;  %v1500_v16 = vpop.f32.mrf.mxu3  ;;  %v1356_v18 = vpop.f32.mrf.mxu0 }
 0x21c   :  { %v1501_v12 = vadd.f32 %v1500_v16, %v5849_v22  ;;  %v1405_v3 = vpop.f32.mrf.mxu1  ;;  %v1357_v16 = vadd.f32 %v1356_v18, %v5828_v34 }
 0x21d   :  { %v1922_v48 = vmax.f32 %v1452_v5, 0.0  ;;  %v1406_v58 = vadd.f32 %v1405_v3, %v5832_v50 }
 0x21e   :  { %v1923_v7 = vmax.f32 %v1501_v12, 0.0  ;;  %1551 = vmatmul.bf16.gmra.mxu0 %v5800_v63  ;;  %1600 = vmatmul.bf16.gmra.mxu1 %v5800_v63 }
 0x21f   :  { %1649 = vmatmul.bf16.gmra.mxu2 %v5800_v63  ;;  %v5982_v43 = vpack.c.bf16 %v1922_v48, %v1906_v11  ;;  %v1936_v11 = vmax.f32 %v1357_v16, 0.0 }
 0x220   :  { %1698 = vmatmul.bf16.gmra.mxu3 %v5800_v63  ;;  %v5985_v41 = vpack.c.bf16 %v1923_v7, %v1907_v57  ;;  %v1937_v57 = vmax.f32 %v1406_v58, 0.0 }
 0x221   :  { %6540 = vst [vmem:[#allocation58_spill] sm:$0xff] %v5982_v43  ;;  %v5176_v43 = vld [vmem:[#allocation4 + $0x170] sm:$0xff] }
 0x222   :  { %6541 = vst [vmem:[#allocation59_spill] sm:$0xff] %v5985_v41  ;;  %v1454_v15 = vpop.f32.mrf.mxu2  ;;  %3362 = vmatpush.bf16.msrb.mxu1 %v5176_v43 }
 0x223   :  { %v1503_v26 = vpop.f32.mrf.mxu3  ;;  %v1358_v31 = vpop.f32.mrf.mxu0  ;;  %v1455_v25 = vadd.f32 %v1454_v15, %v5845_v45  ;;  %v6004_v15 = vperm.slane %v5824_v59, 5 }
 0x224   :  { %v1359_v5 = vadd.f32 %v1358_v31, %v5828_v34  ;;  %v1407_v12 = vpop.f32.mrf.mxu1  ;;  %v1504_v3 = vadd.f32 %v1503_v26, %v5849_v22  ;;  %v5167_v26 = vld [vmem:[#allocation4 + $0x128] sm:$0xff] }
 0x225   :  { %v1408_v63 = vadd.f32 %v1407_v12, %v5832_v50  ;;  %3314 = vmatpush.bf16.msrb.mxu0 %v5167_v26 }
 0x226   :  { %v1952_v48 = vmax.f32 %v1359_v5, 0.0  ;;  %v1938_v5 = vmax.f32 %v1455_v25, 0.0  ;;  %v1939_v12 = vmax.f32 %v1504_v3, 0.0 }
 0x227   :  { %v1953_v7 = vmax.f32 %v1408_v63, 0.0  ;;  %v6000_v63 = vperm.slane %v5824_v59, 4 }
 0x228   :  { %v5991_v18 = vpack.c.bf16 %v1952_v48, %v1936_v11  ;;  %v5191_v11 = vld [vmem:[#allocation4 + $0x1e8] sm:$0xff] }
 0x229   :  { %v5994_v21 = vpack.c.bf16 %v1953_v7, %v1937_v57  ;;  %3461 = vmatpush.bf16.msrb.mxu3 %v5191_v11 }
 0x22a   :  { %v1456_v17 = vpop.f32.mrf.mxu2 }
 0x22b   :  { %v1457_v34 = vadd.f32 %v1456_v17, %v5845_v45  ;;  %v1505_v31 = vpop.f32.mrf.mxu3  ;;  %v1517_v41 = vpop.f32.mrf.mxu0 }
 0x22c   :  { %v1506_v50 = vadd.f32 %v1505_v31, %v5849_v22  ;;  %v1566_v16 = vpop.f32.mrf.mxu1  ;;  %v5183_v22 = vld [vmem:[#allocation4 + $0x1a8] sm:$0xff]  ;;  %v1518_v57 = vadd.f32 %v1517_v41, %v6000_v63  ;;  %v6021_v31 = vperm.slane %v5824_v59, 7 }
 0x22d   :  { %v1954_v58 = vmax.f32 %v1457_v34, 0.0  ;;  %3412 = vmatpush.bf16.msrb.mxu2 %v5183_v22 }
 0x22e   :  { %v1955_v43 = vmax.f32 %v1506_v50, 0.0  ;;  %3124 = vmatmul.bf16.vlgmr.msra.gmra.mxu0 %v5462_v6  ;;  %3173 = vmatmul.bf16.vlgmr.msra.gmra.mxu1 %v5465_v9  ;;  %v1567_v6 = vadd.f32 %v1566_v16, %v6004_v15  ;;  %v1716_v34 = vmax.f32 %v1518_v57, 0.0  ;;  %v5175_v50 = vld [vmem:[#allocation4 + $0x168] sm:$0xff] }
 0x22f   :  { %3222 = vmatmul.bf16.vlgmr.msra.gmra.mxu2 %v5471_v23  ;;  %v6008_v45 = vpack.c.bf16 %v1954_v58, %v1938_v5  ;;  %3363 = vmatpush.bf16.msrb.mxu1 %v5175_v50  ;;  %v5166_v50 = vld [vmem:[#allocation4 + $0x120] sm:$0xff] }
 0x230   :  { %3271 = vmatmul.bf16.vlgmr.msra.gmra.mxu3 %v5475_v24  ;;  %v6011_v48 = vpack.c.bf16 %v1955_v43, %v1939_v12  ;;  %v6017_v24 = vperm.slane %v5824_v59, 6  ;;  %v1717_v5 = vmax.f32 %v1567_v6, 0.0  ;;  %3315 = vmatpush.bf16.msrb.mxu0 %v5166_v50 }
 0x232   :  { %v1615_v7 = vpop.f32.mrf.mxu2 }
 0x233   :  { %v1664_v25 = vpop.f32.mrf.mxu3  ;;  %v1519_v9 = vpop.f32.mrf.mxu0  ;;  %v1616_v12 = vadd.f32 %v1615_v7, %v6017_v24 }
 0x234   :  { %v1520_v23 = vadd.f32 %v1519_v9, %v6000_v63  ;;  %v1568_v3 = vpop.f32.mrf.mxu1  ;;  %v1665_v22 = vadd.f32 %v1664_v25, %v6021_v31  ;;  %v5182_v25 = vld [vmem:[#allocation4 + $0x1a0] sm:$0xff] }
 0x235   :  { %v1569_v17 = vadd.f32 %v1568_v3, %v6004_v15  ;;  %v1718_v3 = vmax.f32 %v1616_v12, 0.0  ;;  %3413 = vmatpush.bf16.msrb.mxu2 %v5182_v25 }
 0x236   :  { %v1732_v41 = vmax.f32 %v1520_v23, 0.0 }
 0x237   :  { %v1733_v58 = vmax.f32 %v1569_v17, 0.0  ;;  %v1719_v17 = vmax.f32 %v1665_v22, 0.0 }
 0x238   :  { %v6023_v16 = vpack.c.bf16 %v1732_v41, %v1716_v34 }
 0x239   :  { %v6026_v43 = vpack.c.bf16 %v1733_v58, %v1717_v5  ;;  %v5190_v5 = vld [vmem:[#allocation4 + $0x1e0] sm:$0xff] }
 0x23a   :  { %v1617_v26 = vpop.f32.mrf.mxu2  ;;  %3462 = vmatpush.bf16.msrb.mxu3 %v5190_v5 }
 0x23b   :  { %v1618_v11 = vadd.f32 %v1617_v26, %v6017_v24  ;;  %v1666_v57 = vpop.f32.mrf.mxu3  ;;  %v1522_v9 = vpop.f32.mrf.mxu0 }
 0x23c   :  { %v1667_v59 = vadd.f32 %v1666_v57, %v6021_v31  ;;  %v1571_v23 = vpop.f32.mrf.mxu1  ;;  %v1523_v58 = vadd.f32 %v1522_v9, %v6000_v63 }
 0x23d   :  { %v1734_v6 = vmax.f32 %v1618_v11, 0.0 }
 0x23e   :  { %v1735_v34 = vmax.f32 %v1667_v59, 0.0  ;;  %3129 = vmatmul.bf16.gmra.mxu0 %v5482_v54  ;;  %3178 = vmatmul.bf16.gmra.mxu1 %v5485_v56  ;;  %v1572_v54 = vadd.f32 %v1571_v23, %v6004_v15  ;;  %v1748_v57 = vmax.f32 %v1523_v58, 0.0  ;;  %v5174_v59 = vld [vmem:[#allocation4 + $0x160] sm:$0xff] }
 0x23f   :  { %v6032_v41 = vpack.c.bf16 %v1734_v6, %v1718_v3  ;;  %3227 = vmatmul.bf16.gmra.mxu2 %v5493_v10  ;;  %3364 = vmatpush.bf16.msrb.mxu1 %v5174_v59 }
 0x240   :  { %v6036_v7 = vpack.c.bf16 %v1735_v34, %v1719_v17  ;;  %3276 = vmatmul.bf16.gmra.mxu3 %v5496_v14  ;;  %v1749_v3 = vmax.f32 %v1572_v54, 0.0 }
 0x242   :  { %v1620_v12 = vpop.f32.mrf.mxu2 }
 0x243   :  { %v1669_v22 = vpop.f32.mrf.mxu3  ;;  %v1524_v26 = vpop.f32.mrf.mxu0  ;;  %v1621_v17 = vadd.f32 %v1620_v12, %v6017_v24 }
 0x244   :  { %v1525_v56 = vadd.f32 %v1524_v26, %v6000_v63  ;;  %v1573_v10 = vpop.f32.mrf.mxu1  ;;  %v1670_v23 = vadd.f32 %v1669_v22, %v6021_v31  ;;  %v5181_v22 = vld [vmem:[#allocation4 + $0x198] sm:$0xff] }
 0x245   :  { %v1574_v11 = vadd.f32 %v1573_v10, %v6004_v15  ;;  %v1750_v10 = vmax.f32 %v1621_v17, 0.0  ;;  %3414 = vmatpush.bf16.msrb.mxu2 %v5181_v22 }
 0x246   :  { %v1764_v14 = vmax.f32 %v1525_v56, 0.0 }
 0x247   :  { %v1765_v6 = vmax.f32 %v1574_v11, 0.0  ;;  %v1751_v11 = vmax.f32 %v1670_v23, 0.0 }
 0x248   :  { %v6043_v9 = vpack.c.bf16 %v1764_v14, %v1748_v57  ;;  %v5165_v57 = vld [vmem:[#allocation4 + $0x118] sm:$0xff] }
 0x249   :  { %v6046_v34 = vpack.c.bf16 %v1765_v6, %v1749_v3  ;;  %v5189_v14 = vld [vmem:[#allocation4 + $0x1d8] sm:$0xff]  ;;  %3316 = vmatpush.bf16.msrb.mxu0 %v5165_v57 }
 0x24a   :  { %v1622_v25 = vpop.f32.mrf.mxu2  ;;  %3463 = vmatpush.bf16.msrb.mxu3 %v5189_v14 }
 0x24b   :  { %v1623_v50 = vadd.f32 %v1622_v25, %v6017_v24  ;;  %v1671_v5 = vpop.f32.mrf.mxu3  ;;  %v1527_v26 = vpop.f32.mrf.mxu0 }
 0x24c   :  { %v1672_v58 = vadd.f32 %v1671_v5, %v6021_v31  ;;  %v1576_v56 = vpop.f32.mrf.mxu1  ;;  %v1528_v6 = vadd.f32 %v1527_v26, %v6000_v63 }
 0x24d   :  { %v1766_v54 = vmax.f32 %v1623_v50, 0.0 }
 0x24e   :  { %v1767_v59 = vmax.f32 %v1672_v58, 0.0  ;;  %3134 = vmatmul.bf16.gmra.mxu0 %v5502_v44  ;;  %3183 = vmatmul.bf16.gmra.mxu1 %v5505_v46  ;;  %v1577_v44 = vadd.f32 %v1576_v56, %v6004_v15  ;;  %v1780_v50 = vmax.f32 %v1528_v6, 0.0  ;;  %v5173_v58 = vld [vmem:[#allocation4 + $0x158] sm:$0xff] }
 0x24f   :  { %3232 = vmatmul.bf16.gmra.mxu2 %v5513_v62  ;;  %v6054_v12 = vpack.c.bf16 %v1766_v54, %v1750_v10  ;;  %3365 = vmatpush.bf16.msrb.mxu1 %v5173_v58 }
 0x250   :  { %3281 = vmatmul.bf16.gmra.mxu3 %v5516_v2  ;;  %v6057_v3 = vpack.c.bf16 %v1767_v59, %v1751_v11  ;;  %v1781_v10 = vmax.f32 %v1577_v44, 0.0 }
 0x252   :  { %v1625_v17 = vpop.f32.mrf.mxu2 }
 0x253   :  { %v1674_v23 = vpop.f32.mrf.mxu3  ;;  %v1529_v46 = vpop.f32.mrf.mxu0  ;;  %v1626_v11 = vadd.f32 %v1625_v17, %v6017_v24 }
 0x254   :  { %v1530_v62 = vadd.f32 %v1529_v46, %v6000_v63  ;;  %v1578_v25 = vpop.f32.mrf.mxu1  ;;  %v1675_v56 = vadd.f32 %v1674_v23, %v6021_v31  ;;  %v5180_v23 = vld [vmem:[#allocation4 + $0x190] sm:$0xff] }
 0x255   :  { %v1579_v2 = vadd.f32 %v1578_v25, %v6004_v15  ;;  %v1782_v25 = vmax.f32 %v1626_v11, 0.0  ;;  %3415 = vmatpush.bf16.msrb.mxu2 %v5180_v23 }
 0x256   :  { %v1796_v5 = vmax.f32 %v1530_v62, 0.0 }
 0x257   :  { %v1797_v54 = vmax.f32 %v1579_v2, 0.0  ;;  %v1783_v2 = vmax.f32 %v1675_v56, 0.0 }
 0x258   :  { %v6063_v26 = vpack.c.bf16 %v1796_v5, %v1780_v50  ;;  %v5164_v50 = vld [vmem:[#allocation4 + $0x110] sm:$0xff] }
 0x259   :  { %v6066_v59 = vpack.c.bf16 %v1797_v54, %v1781_v10  ;;  %v5188_v5 = vld [vmem:[#allocation4 + $0x1d0] sm:$0xff]  ;;  %3317 = vmatpush.bf16.msrb.mxu0 %v5164_v50 }
 0x25a   :  { %v1627_v22 = vpop.f32.mrf.mxu2  ;;  %3464 = vmatpush.bf16.msrb.mxu3 %v5188_v5 }
 0x25b   :  { %v1628_v57 = vadd.f32 %v1627_v22, %v6017_v24  ;;  %v1676_v14 = vpop.f32.mrf.mxu3  ;;  %v1532_v46 = vpop.f32.mrf.mxu0 }
 0x25c   :  { %v1677_v6 = vadd.f32 %v1676_v14, %v6021_v31  ;;  %v1581_v62 = vpop.f32.mrf.mxu1  ;;  %v1533_v54 = vadd.f32 %v1532_v46, %v6000_v63 }
 0x25d   :  { %v1798_v44 = vmax.f32 %v1628_v57, 0.0 }
 0x25e   :  { %v1799_v58 = vmax.f32 %v1677_v6, 0.0  ;;  %3139 = vmatmul.bf16.gmra.mxu0 %v5522_v33  ;;  %3188 = vmatmul.bf16.gmra.mxu1 %v5525_v36  ;;  %v1582_v33 = vadd.f32 %v1581_v62, %v6004_v15  ;;  %v1812_v57 = vmax.f32 %v1533_v54, 0.0  ;;  %v5172_v6 = vld [vmem:[#allocation4 + $0x150] sm:$0xff] }
 0x25f   :  { %3237 = vmatmul.bf16.gmra.mxu2 %v5533_v53  ;;  %v6074_v17 = vpack.c.bf16 %v1798_v44, %v1782_v25  ;;  %3366 = vmatpush.bf16.msrb.mxu1 %v5172_v6 }
 0x260   :  { %3286 = vmatmul.bf16.gmra.mxu3 %v5536_v61  ;;  %v6077_v10 = vpack.c.bf16 %v1799_v58, %v1783_v2  ;;  %v1813_v25 = vmax.f32 %v1582_v33, 0.0 }
 0x262   :  { %v1630_v11 = vpop.f32.mrf.mxu2 }
 0x263   :  { %v1679_v56 = vpop.f32.mrf.mxu3  ;;  %v1534_v36 = vpop.f32.mrf.mxu0  ;;  %v1631_v2 = vadd.f32 %v1630_v11, %v6017_v24 }
 0x264   :  { %v1535_v53 = vadd.f32 %v1534_v36, %v6000_v63  ;;  %v1583_v22 = vpop.f32.mrf.mxu1  ;;  %v1680_v62 = vadd.f32 %v1679_v56, %v6021_v31  ;;  %v5179_v56 = vld [vmem:[#allocation4 + $0x188] sm:$0xff] }
 0x265   :  { %v1584_v61 = vadd.f32 %v1583_v22, %v6004_v15  ;;  %v1814_v22 = vmax.f32 %v1631_v2, 0.0  ;;  %3416 = vmatpush.bf16.msrb.mxu2 %v5179_v56 }
 0x266   :  { %v1828_v14 = vmax.f32 %v1535_v53, 0.0 }
 0x267   :  { %v1829_v44 = vmax.f32 %v1584_v61, 0.0  ;;  %v1815_v61 = vmax.f32 %v1680_v62, 0.0 }
 0x268   :  { %v6083_v46 = vpack.c.bf16 %v1828_v14, %v1812_v57  ;;  %v5163_v57 = vld [vmem:[#allocation4 + $0x108] sm:$0xff] }
 0x269   :  { %v6086_v58 = vpack.c.bf16 %v1829_v44, %v1813_v25  ;;  %v5187_v14 = vld [vmem:[#allocation4 + $0x1c8] sm:$0xff]  ;;  %3318 = vmatpush.bf16.msrb.mxu0 %v5163_v57 }
 0x26a   :  { %v1632_v23 = vpop.f32.mrf.mxu2  ;;  %3465 = vmatpush.bf16.msrb.mxu3 %v5187_v14 }
 0x26b   :  { %v1633_v50 = vadd.f32 %v1632_v23, %v6017_v24  ;;  %v1681_v5 = vpop.f32.mrf.mxu3  ;;  %v1537_v36 = vpop.f32.mrf.mxu0 }
 0x26c   :  { %v1682_v54 = vadd.f32 %v1681_v5, %v6021_v31  ;;  %v1586_v53 = vpop.f32.mrf.mxu1  ;;  %v1538_v44 = vadd.f32 %v1537_v36, %v6000_v63 }
 0x26d   :  { %v1830_v33 = vmax.f32 %v1633_v50, 0.0 }
 0x26e   :  { %v1831_v6 = vmax.f32 %v1682_v54, 0.0  ;;  %3144 = vmatmul.bf16.gmra.mxu0 %v5542_v29  ;;  %3193 = vmatmul.bf16.gmra.mxu1 %v5545_v30  ;;  %v1587_v29 = vadd.f32 %v1586_v53, %v6004_v15  ;;  %v1844_v50 = vmax.f32 %v1538_v44, 0.0  ;;  %v5171_v54 = vld [vmem:[#allocation4 + $0x148] sm:$0xff] }
 0x26f   :  { %3242 = vmatmul.bf16.gmra.mxu2 %v5553_v51  ;;  %v6094_v11 = vpack.c.bf16 %v1830_v33, %v1814_v22  ;;  %3367 = vmatpush.bf16.msrb.mxu1 %v5171_v54 }
 0x270   :  { %3291 = vmatmul.bf16.gmra.mxu3 %v5556_v35  ;;  %v6097_v25 = vpack.c.bf16 %v1831_v6, %v1815_v61  ;;  %v1845_v22 = vmax.f32 %v1587_v29, 0.0 }
 0x272   :  { %v1635_v2 = vpop.f32.mrf.mxu2 }
 0x273   :  { %v1684_v62 = vpop.f32.mrf.mxu3  ;;  %v1539_v30 = vpop.f32.mrf.mxu0  ;;  %v1636_v61 = vadd.f32 %v1635_v2, %v6017_v24 }
 0x274   :  { %v1540_v51 = vadd.f32 %v1539_v30, %v6000_v63  ;;  %v1588_v23 = vpop.f32.mrf.mxu1  ;;  %v1685_v53 = vadd.f32 %v1684_v62, %v6021_v31  ;;  %v5178_v62 = vld [vmem:[#allocation4 + $0x180] sm:$0xff] }
 0x275   :  { %v1589_v35 = vadd.f32 %v1588_v23, %v6004_v15  ;;  %v1846_v23 = vmax.f32 %v1636_v61, 0.0  ;;  %3417 = vmatpush.bf16.msrb.mxu2 %v5178_v62 }
 0x276   :  { %v1860_v5 = vmax.f32 %v1540_v51, 0.0 }
 0x277   :  { %v1861_v33 = vmax.f32 %v1589_v35, 0.0  ;;  %v1847_v35 = vmax.f32 %v1685_v53, 0.0 }
 0x278   :  { %v6103_v36 = vpack.c.bf16 %v1860_v5, %v1844_v50  ;;  %v5162_v50 = vld [vmem:[#allocation4 + $0x100] sm:$0xff] }
 0x279   :  { %v6106_v6 = vpack.c.bf16 %v1861_v33, %v1845_v22  ;;  %v5186_v5 = vld [vmem:[#allocation4 + $0x1c0] sm:$0xff]  ;;  %3319 = vmatpush.bf16.msrb.mxu0 %v5162_v50 }
 0x27a   :  { %v1637_v56 = vpop.f32.mrf.mxu2  ;;  %3466 = vmatpush.bf16.msrb.mxu3 %v5186_v5 }
 0x27b   :  { %v1638_v57 = vadd.f32 %v1637_v56, %v6017_v24  ;;  %v1686_v14 = vpop.f32.mrf.mxu3  ;;  %v1542_v30 = vpop.f32.mrf.mxu0 }
 0x27c   :  { %v1687_v44 = vadd.f32 %v1686_v14, %v6021_v31  ;;  %v1591_v51 = vpop.f32.mrf.mxu1  ;;  %v1543_v33 = vadd.f32 %v1542_v30, %v6000_v63 }
 0x27d   :  { %v1862_v29 = vmax.f32 %v1638_v57, 0.0 }
 0x27e   :  { %v1863_v54 = vmax.f32 %v1687_v44, 0.0  ;;  %3149 = vmatmul.bf16.gmra.mxu0 %v5562_v28  ;;  %3198 = vmatmul.bf16.gmra.mxu1 %v5565_v32  ;;  %v1592_v28 = vadd.f32 %v1591_v51, %v6004_v15  ;;  %v1876_v57 = vmax.f32 %v1543_v33, 0.0  ;;  %v5170_v44 = vld [vmem:[#allocation4 + $0x140] sm:$0xff] }
 0x27f   :  { %3247 = vmatmul.bf16.gmra.mxu2 %v5573_v55  ;;  %v6114_v2 = vpack.c.bf16 %v1862_v29, %v1846_v23  ;;  %3368 = vmatpush.bf16.msrb.mxu1 %v5170_v44 }
 0x280   :  { %3296 = vmatmul.bf16.gmra.mxu3 %v5576_v1  ;;  %v6117_v22 = vpack.c.bf16 %v1863_v54, %v1847_v35  ;;  %v1877_v23 = vmax.f32 %v1592_v28, 0.0 }
 0x282   :  { %6542 = vst [vmem:[#allocation60_spill] sm:$0xff] %v6117_v22  ;;  %v1640_v61 = vpop.f32.mrf.mxu2 }
 0x283   :  { %v1689_v53 = vpop.f32.mrf.mxu3  ;;  %v1544_v32 = vpop.f32.mrf.mxu0  ;;  %v1641_v35 = vadd.f32 %v1640_v61, %v6017_v24 }
 0x284   :  { %v1545_v55 = vadd.f32 %v1544_v32, %v6000_v63  ;;  %v1593_v56 = vpop.f32.mrf.mxu1  ;;  %v1690_v51 = vadd.f32 %v1689_v53, %v6021_v31  ;;  %v5217_v53 = vld [vmem:[#allocation4 + $0x2b8] sm:$0xff] }
 0x285   :  { %v1594_v1 = vadd.f32 %v1593_v56, %v6004_v15  ;;  %v1878_v56 = vmax.f32 %v1641_v35, 0.0  ;;  %3606 = vmatpush.bf16.msra.mxu2 %v5217_v53 }
 0x286   :  { %v1892_v14 = vmax.f32 %v1545_v55, 0.0 }
 0x287   :  { %v1893_v29 = vmax.f32 %v1594_v1, 0.0  ;;  %v1879_v1 = vmax.f32 %v1690_v51, 0.0 }
 0x288   :  { %v6123_v30 = vpack.c.bf16 %v1892_v14, %v1876_v57  ;;  %v5201_v57 = vld [vmem:[#allocation4 + $0x238] sm:$0xff] }
 0x289   :  { %v6126_v54 = vpack.c.bf16 %v1893_v29, %v1877_v23  ;;  %v5225_v14 = vld [vmem:[#allocation4 + $0x2f8] sm:$0xff]  ;;  %3508 = vmatpush.bf16.msra.mxu0 %v5201_v57 }
 0x28a   :  { %6543 = vst [vmem:[#allocation61_spill] sm:$0xff] %v6123_v30  ;;  %v1642_v62 = vpop.f32.mrf.mxu2  ;;  %3655 = vmatpush.bf16.msra.mxu3 %v5225_v14 }
 0x28b   :  { %6544 = vst [vmem:[#allocation62_spill] sm:$0xff] %v6126_v54  ;;  %v1643_v50 = vadd.f32 %v1642_v62, %v6017_v24  ;;  %v1691_v5 = vpop.f32.mrf.mxu3  ;;  %v1547_v32 = vpop.f32.mrf.mxu0 }
 0x28c   :  { %v1692_v33 = vadd.f32 %v1691_v5, %v6021_v31  ;;  %v1596_v55 = vpop.f32.mrf.mxu1  ;;  %v1548_v29 = vadd.f32 %v1547_v32, %v6000_v63 }
 0x28d   :  { %v1894_v28 = vmax.f32 %v1643_v50, 0.0  ;;  %v5209_v50 = vld [vmem:[#allocation4 + $0x278] sm:$0xff] }
 0x28e   :  { %v1895_v44 = vmax.f32 %v1692_v33, 0.0  ;;  %3154 = vmatmul.bf16.gmra.mxu0 %v5582_v38  ;;  %3203 = vmatmul.bf16.gmra.mxu1 %v5585_v42  ;;  %v1597_v38 = vadd.f32 %v1596_v55, %v6004_v15  ;;  %v1908_v5 = vmax.f32 %v1548_v29, 0.0 }
 0x28f   :  { %3252 = vmatmul.bf16.gmra.mxu2 %v5593_v4  ;;  %v6134_v61 = vpack.c.bf16 %v1894_v28, %v1878_v56  ;;  %3557 = vmatpush.bf16.msra.mxu1 %v5209_v50 }
 0x290   :  { %3301 = vmatmul.bf16.gmra.mxu3 %v5596_v13  ;;  %v6137_v23 = vpack.c.bf16 %v1895_v44, %v1879_v1  ;;  %v1909_v56 = vmax.f32 %v1597_v38, 0.0 }
 0x291   :  { %6545 = vst [vmem:[#allocation63_spill] sm:$0xff] %v6134_v61 }
 0x292   :  { %6546 = vst [vmem:[#allocation64_spill] sm:$0xff] %v6137_v23  ;;  %v1645_v35 = vpop.f32.mrf.mxu2 }
 0x293   :  { %v1694_v51 = vpop.f32.mrf.mxu3  ;;  %v1549_v42 = vpop.f32.mrf.mxu0  ;;  %v1646_v1 = vadd.f32 %v1645_v35, %v6017_v24 }
 0x294   :  { %v1550_v4 = vadd.f32 %v1549_v42, %v6000_v63  ;;  %v1598_v62 = vpop.f32.mrf.mxu1  ;;  %v1695_v55 = vadd.f32 %v1694_v51, %v6021_v31  ;;  %v5216_v51 = vld [vmem:[#allocation4 + $0x2b0] sm:$0xff] }
 0x295   :  { %v1599_v13 = vadd.f32 %v1598_v62, %v6004_v15  ;;  %3607 = vmatpush.bf16.msra.mxu2 %v5216_v51 }
 0x296   :  { %v1924_v33 = vmax.f32 %v1550_v4, 0.0  ;;  %v1910_v4 = vmax.f32 %v1646_v1, 0.0 }
 0x297   :  { %v1925_v28 = vmax.f32 %v1599_v13, 0.0  ;;  %v1911_v13 = vmax.f32 %v1695_v55, 0.0 }
 0x298   :  { %v6143_v32 = vpack.c.bf16 %v1924_v33, %v1908_v5  ;;  %v5200_v5 = vld [vmem:[#allocation4 + $0x230] sm:$0xff] }
 0x299   :  { %v6146_v44 = vpack.c.bf16 %v1925_v28, %v1909_v56  ;;  %v5224_v33 = vld [vmem:[#allocation4 + $0x2f0] sm:$0xff]  ;;  %3509 = vmatpush.bf16.msra.mxu0 %v5200_v5 }
 0x29a   :  { %6547 = vst [vmem:[#allocation65_spill] sm:$0xff] %v6143_v32  ;;  %v1647_v53 = vpop.f32.mrf.mxu2  ;;  %3656 = vmatpush.bf16.msra.mxu3 %v5224_v33 }
 0x29b   :  { %6548 = vst [vmem:[#allocation66_spill] sm:$0xff] %v6146_v44  ;;  %v1648_v57 = vadd.f32 %v1647_v53, %v6017_v24  ;;  %v1696_v14 = vpop.f32.mrf.mxu3  ;;  %v1552_v42 = vpop.f32.mrf.mxu0 }
 0x29c   :  { %v1697_v62 = vadd.f32 %v1696_v14, %v6021_v31  ;;  %v1601_v29 = vpop.f32.mrf.mxu1  ;;  %v1553_v28 = vadd.f32 %v1552_v42, %v6000_v63  ;;  %v6166_v42 = vld [vmem:[%s6488_s4] ss:$0 sm:$0xff] }
 0x29d   :  { %v1926_v38 = vmax.f32 %v1648_v57, 0.0  ;;  %v5208_v57 = vld [vmem:[#allocation4 + $0x270] sm:$0xff] }
 0x29e   :  { %v1927_v50 = vmax.f32 %v1697_v62, 0.0  ;;  %3159 = vmatmul.bf16.gmra.mxu0 %v5602_v49  ;;  %3208 = vmatmul.bf16.gmra.mxu1 %v5605_v52  ;;  %v1602_v49 = vadd.f32 %v1601_v29, %v6004_v15  ;;  %v1940_v14 = vmax.f32 %v1553_v28, 0.0 }
 0x29f   :  { %3257 = vmatmul.bf16.gmra.mxu2 %v5624_v60  ;;  %v6154_v35 = vpack.c.bf16 %v1926_v38, %v1910_v4  ;;  %3558 = vmatpush.bf16.msra.mxu1 %v5208_v57 }
 0x2a0   :  { %3306 = vmatmul.bf16.gmra.mxu3 %v5627_v20  ;;  %v6157_v56 = vpack.c.bf16 %v1927_v50, %v1911_v13  ;;  %v1941_v4 = vmax.f32 %v1602_v49, 0.0 }
 0x2a1   :  { %6549 = vst [vmem:[#allocation67_spill] sm:$0xff] %v6154_v35 }
 0x2a2   :  { %6550 = vst [vmem:[#allocation68_spill] sm:$0xff] %v6157_v56  ;;  %v1650_v1 = vpop.f32.mrf.mxu2 }
 0x2a3   :  { %v1699_v55 = vpop.f32.mrf.mxu3  ;;  %v1554_v52 = vpop.f32.mrf.mxu0  ;;  %v1651_v13 = vadd.f32 %v1650_v1, %v6017_v24  ;;  %v6553_v1 = vld [vmem:[#allocation8_spill] sm:$0xff] }
 0x2a4   :  { %v1555_v60 = vadd.f32 %v1554_v52, %v6000_v63  ;;  %v1603_v53 = vpop.f32.mrf.mxu1  ;;  %v1700_v63 = vadd.f32 %v1699_v55, %v6021_v31  ;;  %v6555_v55 = vld [vmem:[#allocation10_spill] sm:$0xff] }
 0x2a5   :  { %v1604_v20 = vadd.f32 %v1603_v53, %v6004_v15 }
 0x2a6   :  { %v1956_v62 = vmax.f32 %v1555_v60, 0.0  ;;  %v1942_v60 = vmax.f32 %v1651_v13, 0.0 }
 0x2a7   :  { %v1957_v38 = vmax.f32 %v1604_v20, 0.0  ;;  %v1943_v20 = vmax.f32 %v1700_v63, 0.0 }
 0x2a8   :  { %v6168_v29 = vpack.c.bf16 %v1956_v62, %v1940_v14  ;;  %v6554_v62 = vld [vmem:[#allocation9_spill] sm:$0xff] }
 0x2a9   :  { %v6171_v50 = vpack.c.bf16 %v1957_v38, %v1941_v4  ;;  %v5215_v38 = vld [vmem:[#allocation4 + $0x2a8] sm:$0xff] }
 0x2aa   :  { %6551 = vst [vmem:[#allocation69_spill] sm:$0xff] %v6168_v29  ;;  %v1652_v15 = vpop.f32.mrf.mxu2  ;;  %3608 = vmatpush.bf16.msra.mxu2 %v5215_v38 }
 0x2ab   :  { %6552 = vst [vmem:[#allocation70_spill] sm:$0xff] %v6171_v50  ;;  %v1653_v51 = vadd.f32 %v1652_v15, %v6017_v24  ;;  %v1701_v5 = vpop.f32.mrf.mxu3  ;;  %v3125_v33 = vpop.f32.mrf.mxu0  ;;  %v6557_v24 = vld [vmem:[#allocation11_spill] sm:$0xff]  ;;  %v5223_v15 = vld [vmem:[#allocation4 + $0x2e8] sm:$0xff] }
 0x2ac   :  { %v1702_v28 = vadd.f32 %v1701_v5, %v6021_v31  ;;  %v3126_v49 = vadd.f32 %v6166_v42, %v3125_v33  ;;  %v3174_v52 = vpop.f32.mrf.mxu1  ;;  %v5199_v31 = vld [vmem:[#allocation4 + $0x228] sm:$0xff]  ;;  %3657 = vmatpush.bf16.msra.mxu3 %v5223_v15 }
 0x2ad   :  { %v1958_v53 = vmax.f32 %v1653_v51, 0.0  ;;  %3510 = vmatpush.bf16.msra.mxu0 %v5199_v31  ;;  %v6559_v31 = vld [vmem:[#allocation12_spill] sm:$0xff]  ;;  %v6560_v15 = vld [vmem:[#allocation13_spill] sm:$0xff] }
 0x2ae   :  { %v1959_v57 = vmax.f32 %v1702_v28, 0.0  ;;  %v3175_v14 = vadd.f32 %v3174_v52, %v3126_v49  ;;  %3320 = vmatmul.bf16.vlgmr.msrb.gmra.mxu0 %v6553_v1  ;;  %3369 = vmatmul.bf16.vlgmr.msrb.gmra.mxu1 %v6554_v62 }
 0x2af   :  { %3418 = vmatmul.bf16.vlgmr.msrb.gmra.mxu2 %v6555_v55  ;;  %v6180_v4 = vpack.c.bf16 %v1958_v53, %v1942_v60  ;;  %v5207_v60 = vld [vmem:[#allocation4 + $0x268] sm:$0xff] }
 0x2b0   :  { %3467 = vmatmul.bf16.vlgmr.msrb.gmra.mxu3 %v6557_v24  ;;  %v6183_v5 = vpack.c.bf16 %v1959_v57, %v1943_v20  ;;  %3559 = vmatpush.bf16.msra.mxu1 %v5207_v60 }
 0x2b1   :  { %6556 = vst [vmem:[#allocation8_spill] sm:$0xff] %v6180_v4 }
 0x2b2   :  { %6558 = vst [vmem:[#allocation9_spill] sm:$0xff] %v6183_v5  ;;  %v3223_v13 = vpop.f32.mrf.mxu2 }
 0x2b3   :  { %v3224_v63 = vadd.f32 %v3223_v13, %v3175_v14  ;;  %v3272_v51 = vpop.f32.mrf.mxu3  ;;  %v3127_v33 = vpop.f32.mrf.mxu0  ;;  %v6561_v13 = vld [vmem:[#allocation14_spill] sm:$0xff] }
 0x2b4   :  { %v3128_v28 = vadd.f32 %v6166_v42, %v3127_v33  ;;  %v3176_v49 = vpop.f32.mrf.mxu1  ;;  %v5198_v33 = vld [vmem:[#allocation4 + $0x220] sm:$0xff] }
 0x2b5   :  { %v6186_v52 = vadd.f32 %v3272_v51, %v3224_v63  ;;  %v6562_v63 = vld [vmem:[#allocation15_spill] sm:$0xff]  ;;  %v5214_v51 = vld [vmem:[#allocation4 + $0x2a0] sm:$0xff]  ;;  %3511 = vmatpush.bf16.msra.mxu0 %v5198_v33 }
 0x2b6   :  { %v3177_v53 = vadd.f32 %v3176_v49, %v3128_v28  ;;  %v5222_v28 = vld [vmem:[#allocation4 + $0x2e0] sm:$0xff]  ;;  %3609 = vmatpush.bf16.msra.mxu2 %v5214_v51 }
 0x2b7   :  { %3658 = vmatpush.bf16.msra.mxu3 %v5222_v28  ;;  %v6564_v28 = vld [vmem:[#allocation17_spill] sm:$0xff] }
 0x2ba   :  { %v3225_v1 = vpop.f32.mrf.mxu2 }
 0x2bb   :  { %v3226_v62 = vadd.f32 %v3225_v1, %v3177_v53  ;;  %v3274_v55 = vpop.f32.mrf.mxu3  ;;  %v3130_v20 = vpop.f32.mrf.mxu0 }
 0x2bc   :  { %v3131_v57 = vadd.f32 %v6166_v42, %v3130_v20  ;;  %v3179_v24 = vpop.f32.mrf.mxu1 }
 0x2bd   :  { %v6189_v38 = vadd.f32 %v3274_v55, %v3226_v62 }
 0x2be   :  { %v3180_v14 = vadd.f32 %v3179_v24, %v3131_v57  ;;  %3325 = vmatmul.bf16.gmra.mxu0 %v6559_v31  ;;  %3374 = vmatmul.bf16.gmra.mxu1 %v6560_v15  ;;  %v5206_v57 = vld [vmem:[#allocation4 + $0x260] sm:$0xff] }
 0x2bf   :  { %3423 = vmatmul.bf16.gmra.mxu2 %v6561_v13  ;;  %3560 = vmatpush.bf16.msra.mxu1 %v5206_v57 }
 0x2c0   :  { %3472 = vmatmul.bf16.gmra.mxu3 %v6562_v63 }
 0x2c2   :  { %v3228_v49 = vpop.f32.mrf.mxu2 }
 0x2c3   :  { %v3229_v60 = vadd.f32 %v3228_v49, %v3180_v14  ;;  %v3277_v53 = vpop.f32.mrf.mxu3  ;;  %v3132_v1 = vpop.f32.mrf.mxu0  ;;  %v6563_v49 = vld [vmem:[#allocation16_spill] sm:$0xff] }
 0x2c4   :  { %v3133_v62 = vadd.f32 %v6166_v42, %v3132_v1  ;;  %v3181_v55 = vpop.f32.mrf.mxu1  ;;  %v6565_v1 = vld [vmem:[#allocation18_spill] sm:$0xff] }
 0x2c5   :  { %v6196_v20 = vadd.f32 %v3277_v53, %v3229_v60  ;;  %v6566_v60 = vld [vmem:[#allocation19_spill] sm:$0xff] }
 0x2c6   :  { %v3182_v24 = vadd.f32 %v3181_v55, %v3133_v62  ;;  %v5213_v53 = vld [vmem:[#allocation4 + $0x298] sm:$0xff] }
 0x2c7   :  { %v5197_v62 = vld [vmem:[#allocation4 + $0x218] sm:$0xff]  ;;  %3610 = vmatpush.bf16.msra.mxu2 %v5213_v53 }
 0x2c8   :  { %v5221_v55 = vld [vmem:[#allocation4 + $0x2d8] sm:$0xff]  ;;  %3512 = vmatpush.bf16.msra.mxu0 %v5197_v62 }
 0x2c9   :  { %3659 = vmatpush.bf16.msra.mxu3 %v5221_v55  ;;  %v6568_v55 = vld [vmem:[#allocation21_spill] sm:$0xff] }
 0x2ca   :  { %v3230_v31 = vpop.f32.mrf.mxu2 }
 0x2cb   :  { %v3231_v15 = vadd.f32 %v3230_v31, %v3182_v24  ;;  %v3279_v13 = vpop.f32.mrf.mxu3  ;;  %v3135_v63 = vpop.f32.mrf.mxu0 }
 0x2cc   :  { %v3136_v5 = vadd.f32 %v6166_v42, %v3135_v63  ;;  %v3184_v51 = vpop.f32.mrf.mxu1 }
 0x2cd   :  { %v6199_v33 = vadd.f32 %v3279_v13, %v3231_v15 }
 0x2ce   :  { %v3185_v14 = vadd.f32 %v3184_v51, %v3136_v5  ;;  %3330 = vmatmul.bf16.gmra.mxu0 %v6563_v49  ;;  %3379 = vmatmul.bf16.gmra.mxu1 %v6564_v28  ;;  %v5205_v51 = vld [vmem:[#allocation4 + $0x258] sm:$0xff] }
 0x2cf   :  { %3428 = vmatmul.bf16.gmra.mxu2 %v6565_v1  ;;  %3561 = vmatpush.bf16.msra.mxu1 %v5205_v51 }
 0x2d0   :  { %3477 = vmatmul.bf16.gmra.mxu3 %v6566_v60 }
 0x2d2   :  { %v3233_v57 = vpop.f32.mrf.mxu2 }
 0x2d3   :  { %v3234_v24 = vadd.f32 %v3233_v57, %v3185_v14  ;;  %v3282_v31 = vpop.f32.mrf.mxu3  ;;  %v3137_v63 = vpop.f32.mrf.mxu0  ;;  %v6567_v57 = vld [vmem:[#allocation20_spill] sm:$0xff] }
 0x2d4   :  { %v3138_v5 = vadd.f32 %v6166_v42, %v3137_v63  ;;  %v3186_v15 = vpop.f32.mrf.mxu1  ;;  %v6569_v63 = vld [vmem:[#allocation22_spill] sm:$0xff] }
 0x2d5   :  { %v6206_v13 = vadd.f32 %v3282_v31, %v3234_v24  ;;  %v6570_v24 = vld [vmem:[#allocation23_spill] sm:$0xff]  ;;  %v5212_v31 = vld [vmem:[#allocation4 + $0x290] sm:$0xff] }
 0x2d6   :  { %v3187_v49 = vadd.f32 %v3186_v15, %v3138_v5  ;;  %v5196_v5 = vld [vmem:[#allocation4 + $0x210] sm:$0xff]  ;;  %3611 = vmatpush.bf16.msra.mxu2 %v5212_v31 }
 0x2d7   :  { %v5220_v15 = vld [vmem:[#allocation4 + $0x2d0] sm:$0xff]  ;;  %3513 = vmatpush.bf16.msra.mxu0 %v5196_v5 }
 0x2d8   :  { %3660 = vmatpush.bf16.msra.mxu3 %v5220_v15  ;;  %v6572_v15 = vld [vmem:[#allocation25_spill] sm:$0xff] }
 0x2da   :  { %v3235_v28 = vpop.f32.mrf.mxu2 }
 0x2db   :  { %v3236_v1 = vadd.f32 %v3235_v28, %v3187_v49  ;;  %v3284_v60 = vpop.f32.mrf.mxu3  ;;  %v3140_v4 = vpop.f32.mrf.mxu0 }
 0x2dc   :  { %v3141_v50 = vadd.f32 %v6166_v42, %v3140_v4  ;;  %v3189_v53 = vpop.f32.mrf.mxu1 }
 0x2dd   :  { %v6209_v62 = vadd.f32 %v3284_v60, %v3236_v1 }
 0x2de   :  { %v3190_v14 = vadd.f32 %v3189_v53, %v3141_v50  ;;  %3335 = vmatmul.bf16.gmra.mxu0 %v6567_v57  ;;  %3384 = vmatmul.bf16.gmra.mxu1 %v6568_v55  ;;  %v5204_v53 = vld [vmem:[#allocation4 + $0x250] sm:$0xff] }
 0x2df   :  { %3433 = vmatmul.bf16.gmra.mxu2 %v6569_v63  ;;  %3562 = vmatpush.bf16.msra.mxu1 %v5204_v53 }
 0x2e0   :  { %3482 = vmatmul.bf16.gmra.mxu3 %v6570_v24 }
 0x2e2   :  { %v3238_v51 = vpop.f32.mrf.mxu2 }
 0x2e3   :  { %v3239_v49 = vadd.f32 %v3238_v51, %v3190_v14  ;;  %v3287_v4 = vpop.f32.mrf.mxu3  ;;  %v3142_v28 = vpop.f32.mrf.mxu0  ;;  %v6571_v51 = vld [vmem:[#allocation24_spill] sm:$0xff] }
 0x2e4   :  { %v3143_v50 = vadd.f32 %v6166_v42, %v3142_v28  ;;  %v3191_v1 = vpop.f32.mrf.mxu1  ;;  %v6573_v28 = vld [vmem:[#allocation26_spill] sm:$0xff] }
 0x2e5   :  { %v6216_v60 = vadd.f32 %v3287_v4, %v3239_v49  ;;  %v6574_v49 = vld [vmem:[#allocation27_spill] sm:$0xff]  ;;  %v5211_v4 = vld [vmem:[#allocation4 + $0x288] sm:$0xff] }
 0x2e6   :  { %v3192_v57 = vadd.f32 %v3191_v1, %v3143_v50  ;;  %v5195_v50 = vld [vmem:[#allocation4 + $0x208] sm:$0xff]  ;;  %3612 = vmatpush.bf16.msra.mxu2 %v5211_v4 }
 0x2e7   :  { %v5219_v1 = vld [vmem:[#allocation4 + $0x2c8] sm:$0xff]  ;;  %3514 = vmatpush.bf16.msra.mxu0 %v5195_v50 }
 0x2e8   :  { %3661 = vmatpush.bf16.msra.mxu3 %v5219_v1  ;;  %v6576_v1 = vld [vmem:[#allocation29_spill] sm:$0xff] }
 0x2ea   :  { %v3240_v55 = vpop.f32.mrf.mxu2 }
 0x2eb   :  { %v3241_v63 = vadd.f32 %v3240_v55, %v3192_v57  ;;  %v3289_v24 = vpop.f32.mrf.mxu3  ;;  %v3145_v29 = vpop.f32.mrf.mxu0 }
 0x2ec   :  { %v3146_v56 = vadd.f32 %v6166_v42, %v3145_v29  ;;  %v3194_v31 = vpop.f32.mrf.mxu1 }
 0x2ed   :  { %v6219_v5 = vadd.f32 %v3289_v24, %v3241_v63 }
 0x2ee   :  { %v3195_v14 = vadd.f32 %v3194_v31, %v3146_v56  ;;  %3340 = vmatmul.bf16.gmra.mxu0 %v6571_v51  ;;  %3389 = vmatmul.bf16.gmra.mxu1 %v6572_v15  ;;  %v5203_v31 = vld [vmem:[#allocation4 + $0x248] sm:$0xff] }
 0x2ef   :  { %3438 = vmatmul.bf16.gmra.mxu2 %v6573_v28  ;;  %3563 = vmatpush.bf16.msra.mxu1 %v5203_v31 }
 0x2f0   :  { %3487 = vmatmul.bf16.gmra.mxu3 %v6574_v49 }
 0x2f2   :  { %v3243_v53 = vpop.f32.mrf.mxu2 }
 0x2f3   :  { %v3244_v57 = vadd.f32 %v3243_v53, %v3195_v14  ;;  %v3292_v29 = vpop.f32.mrf.mxu3  ;;  %v3147_v55 = vpop.f32.mrf.mxu0  ;;  %v6575_v53 = vld [vmem:[#allocation28_spill] sm:$0xff] }
 0x2f4   :  { %v3148_v56 = vadd.f32 %v6166_v42, %v3147_v55  ;;  %v3196_v63 = vpop.f32.mrf.mxu1  ;;  %v6577_v55 = vld [vmem:[#allocation30_spill] sm:$0xff] }
 0x2f5   :  { %v6226_v24 = vadd.f32 %v3292_v29, %v3244_v57  ;;  %v6578_v57 = vld [vmem:[#allocation31_spill] sm:$0xff]  ;;  %v5210_v29 = vld [vmem:[#allocation4 + $0x280] sm:$0xff] }
 0x2f6   :  { %v3197_v51 = vadd.f32 %v3196_v63, %v3148_v56  ;;  %v5194_v56 = vld [vmem:[#allocation4 + $0x200] sm:$0xff]  ;;  %3613 = vmatpush.bf16.msra.mxu2 %v5210_v29 }
 0x2f7   :  { %v5218_v63 = vld [vmem:[#allocation4 + $0x2c0] sm:$0xff]  ;;  %3515 = vmatpush.bf16.msra.mxu0 %v5194_v56 }
 0x2f8   :  { %3662 = vmatpush.bf16.msra.mxu3 %v5218_v63  ;;  %v6580_v63 = vld [vmem:[#allocation33_spill] sm:$0xff] }
 0x2fa   :  { %v3245_v15 = vpop.f32.mrf.mxu2 }
 0x2fb   :  { %v3246_v28 = vadd.f32 %v3245_v15, %v3197_v51  ;;  %v3294_v49 = vpop.f32.mrf.mxu3  ;;  %v3150_v35 = vpop.f32.mrf.mxu0 }
 0x2fc   :  { %v3151_v44 = vadd.f32 %v6166_v42, %v3150_v35  ;;  %v3199_v4 = vpop.f32.mrf.mxu1 }
 0x2fd   :  { %v6229_v50 = vadd.f32 %v3294_v49, %v3246_v28 }
 0x2fe   :  { %v3200_v14 = vadd.f32 %v3199_v4, %v3151_v44  ;;  %3345 = vmatmul.bf16.gmra.mxu0 %v6575_v53  ;;  %3394 = vmatmul.bf16.gmra.mxu1 %v6576_v1  ;;  %v5202_v4 = vld [vmem:[#allocation4 + $0x240] sm:$0xff] }
 0x2ff   :  { %3443 = vmatmul.bf16.gmra.mxu2 %v6577_v55  ;;  %3564 = vmatpush.bf16.msra.mxu1 %v5202_v4 }
 0x300   :  { %3492 = vmatmul.bf16.gmra.mxu3 %v6578_v57 }
 0x302   :  { %v3248_v31 = vpop.f32.mrf.mxu2 }
 0x303   :  { %v3249_v51 = vadd.f32 %v3248_v31, %v3200_v14  ;;  %v3297_v35 = vpop.f32.mrf.mxu3  ;;  %v3152_v15 = vpop.f32.mrf.mxu0  ;;  %v6579_v31 = vld [vmem:[#allocation32_spill] sm:$0xff] }
 0x304   :  { %v3153_v44 = vadd.f32 %v6166_v42, %v3152_v15  ;;  %v3201_v28 = vpop.f32.mrf.mxu1  ;;  %v6581_v15 = vld [vmem:[#allocation34_spill] sm:$0xff] }
 0x305   :  { %v6236_v49 = vadd.f32 %v3297_v35, %v3249_v51  ;;  %v6582_v51 = vld [vmem:[#allocation35_spill] sm:$0xff] }
 0x306   :  { %v3202_v53 = vadd.f32 %v3201_v28, %v3153_v44  ;;  %v5249_v35 = vld [vmem:[#allocation4 + $0x3b8] sm:$0xff] }
 0x307   :  { %v5233_v44 = vld [vmem:[#allocation4 + $0x338] sm:$0xff]  ;;  %3802 = vmatpush.bf16.msrb.mxu2 %v5249_v35 }
 0x308   :  { %v5257_v28 = vld [vmem:[#allocation4 + $0x3f8] sm:$0xff]  ;;  %3704 = vmatpush.bf16.msrb.mxu0 %v5233_v44 }
 0x309   :  { %3851 = vmatpush.bf16.msrb.mxu3 %v5257_v28  ;;  %v6584_v28 = vld [vmem:[#allocation37_spill] sm:$0xff] }
 0x30a   :  { %v3250_v1 = vpop.f32.mrf.mxu2 }
 0x30b   :  { %v3251_v55 = vadd.f32 %v3250_v1, %v3202_v53  ;;  %v3299_v57 = vpop.f32.mrf.mxu3  ;;  %v3155_v32 = vpop.f32.mrf.mxu0 }
 0x30c   :  { %v3156_v23 = vadd.f32 %v6166_v42, %v3155_v32  ;;  %v3204_v29 = vpop.f32.mrf.mxu1 }
 0x30d   :  { %v6239_v56 = vadd.f32 %v3299_v57, %v3251_v55 }
 0x30e   :  { %v3205_v14 = vadd.f32 %v3204_v29, %v3156_v23  ;;  %3350 = vmatmul.bf16.gmra.mxu0 %v6579_v31  ;;  %3399 = vmatmul.bf16.gmra.mxu1 %v6580_v63  ;;  %v5241_v29 = vld [vmem:[#allocation4 + $0x378] sm:$0xff] }
 0x30f   :  { %3448 = vmatmul.bf16.gmra.mxu2 %v6581_v15  ;;  %3753 = vmatpush.bf16.msrb.mxu1 %v5241_v29 }
 0x310   :  { %3497 = vmatmul.bf16.gmra.mxu3 %v6582_v51 }
 0x312   :  { %v3253_v4 = vpop.f32.mrf.mxu2 }
 0x313   :  { %v3254_v53 = vadd.f32 %v3253_v4, %v3205_v14  ;;  %v3302_v32 = vpop.f32.mrf.mxu3  ;;  %v3157_v1 = vpop.f32.mrf.mxu0  ;;  %v6583_v4 = vld [vmem:[#allocation36_spill] sm:$0xff] }
 0x314   :  { %v3158_v23 = vadd.f32 %v6166_v42, %v3157_v1  ;;  %v3206_v55 = vpop.f32.mrf.mxu1  ;;  %v6585_v1 = vld [vmem:[#allocation38_spill] sm:$0xff] }
 0x315   :  { %v6246_v57 = vadd.f32 %v3302_v32, %v3254_v53  ;;  %v6586_v53 = vld [vmem:[#allocation39_spill] sm:$0xff]  ;;  %v5248_v32 = vld [vmem:[#allocation4 + $0x3b0] sm:$0xff] }
 0x316   :  { %v3207_v31 = vadd.f32 %v3206_v55, %v3158_v23  ;;  %v5232_v23 = vld [vmem:[#allocation4 + $0x330] sm:$0xff]  ;;  %3803 = vmatpush.bf16.msrb.mxu2 %v5248_v32 }
 0x317   :  { %v5256_v55 = vld [vmem:[#allocation4 + $0x3f0] sm:$0xff]  ;;  %3705 = vmatpush.bf16.msrb.mxu0 %v5232_v23 }
 0x318   :  { %3852 = vmatpush.bf16.msrb.mxu3 %v5256_v55  ;;  %v6587_v55 = vld [vmem:[#allocation40_spill] sm:$0xff] }
 0x31a   :  { %v3255_v63 = vpop.f32.mrf.mxu2 }
 0x31b   :  { %v3256_v15 = vadd.f32 %v3255_v63, %v3207_v31  ;;  %v3304_v51 = vpop.f32.mrf.mxu3  ;;  %v3160_v61 = vpop.f32.mrf.mxu0 }
 0x31c   :  { %v3161_v54 = vadd.f32 %v6166_v42, %v3160_v61  ;;  %v3209_v35 = vpop.f32.mrf.mxu1 }
 0x31d   :  { %v6249_v44 = vadd.f32 %v3304_v51, %v3256_v15 }
 0x31e   :  { %v3210_v14 = vadd.f32 %v3209_v35, %v3161_v54  ;;  %3355 = vmatmul.bf16.gmra.mxu0 %v6583_v4  ;;  %3404 = vmatmul.bf16.gmra.mxu1 %v6584_v28  ;;  %v5240_v35 = vld [vmem:[#allocation4 + $0x370] sm:$0xff] }
 0x31f   :  { %3453 = vmatmul.bf16.gmra.mxu2 %v6585_v1  ;;  %3754 = vmatpush.bf16.msrb.mxu1 %v5240_v35 }
 0x320   :  { %3502 = vmatmul.bf16.gmra.mxu3 %v6586_v53 }
 0x322   :  { %v3258_v29 = vpop.f32.mrf.mxu2 }
 0x323   :  { %v3259_v31 = vadd.f32 %v3258_v29, %v3210_v14  ;;  %v3307_v61 = vpop.f32.mrf.mxu3  ;;  %v3162_v63 = vpop.f32.mrf.mxu0  ;;  %v6589_v29 = vld [vmem:[#allocation42_spill] sm:$0xff] }
 0x324   :  { %v3163_v54 = vadd.f32 %v6166_v42, %v3162_v63  ;;  %v3211_v15 = vpop.f32.mrf.mxu1  ;;  %v6588_v42 = vld [vmem:[#allocation41_spill] sm:$0xff] }
 0x325   :  { %v6256_v51 = vadd.f32 %v3307_v61, %v3259_v31  ;;  %v5247_v31 = vld [vmem:[#allocation4 + $0x3a8] sm:$0xff] }
 0x326   :  { %v3212_v4 = vadd.f32 %v3211_v15, %v3163_v54  ;;  %v5231_v61 = vld [vmem:[#allocation4 + $0x328] sm:$0xff]  ;;  %3804 = vmatpush.bf16.msrb.mxu2 %v5247_v31 }
 0x327   :  { %v5255_v63 = vld [vmem:[#allocation4 + $0x3e8] sm:$0xff]  ;;  %3706 = vmatpush.bf16.msrb.mxu0 %v5231_v61  ;;  %v6590_v61 = vld [vmem:[#allocation43_spill] sm:$0xff] }
 0x328   :  { %3853 = vmatpush.bf16.msrb.mxu3 %v5255_v63  ;;  %v6592_v63 = vld [vmem:[#allocation45_spill] sm:$0xff] }
 0x32a   :  { %v3260_v28 = vpop.f32.mrf.mxu2 }
 0x32b   :  { %v3261_v1 = vadd.f32 %v3260_v28, %v3212_v4  ;;  %v3309_v53 = vpop.f32.mrf.mxu3  ;;  %v3321_v30 = vpop.f32.mrf.mxu0  ;;  %v5239_v4 = vld [vmem:[#allocation4 + $0x368] sm:$0xff] }
 0x32c   :  { %v3322_v22 = vadd.f32 %v3321_v30, %v6186_v52  ;;  %v3370_v32 = vpop.f32.mrf.mxu1  ;;  %3755 = vmatpush.bf16.msrb.mxu1 %v5239_v4 }
 0x32d   :  { %v6259_v23 = vadd.f32 %v3309_v53, %v3261_v1 }
 0x32e   :  { %v3371_v14 = vadd.f32 %v3370_v32, %v3322_v22  ;;  %3516 = vmatmul.bf16.vlgmr.msra.gmra.mxu0 %v5851_v39  ;;  %3565 = vmatmul.bf16.vlgmr.msra.gmra.mxu1 %v6587_v55 }
 0x32f   :  { %3614 = vmatmul.bf16.vlgmr.msra.gmra.mxu2 %v6588_v42 }
 0x330   :  { %3663 = vmatmul.bf16.vlgmr.msra.gmra.mxu3 %v6589_v29 }
 0x332   :  { %v3419_v54 = vpop.f32.mrf.mxu2 }
 0x333   :  { %v3420_v15 = vadd.f32 %v3419_v54, %v3371_v14  ;;  %v3468_v30 = vpop.f32.mrf.mxu3  ;;  %v3323_v52 = vpop.f32.mrf.mxu0  ;;  %v5246_v54 = vld [vmem:[#allocation4 + $0x3a0] sm:$0xff] }
 0x334   :  { %v3324_v22 = vadd.f32 %v3323_v52, %v6189_v38  ;;  %v3372_v35 = vpop.f32.mrf.mxu1  ;;  %v6591_v38 = vld [vmem:[#allocation44_spill] sm:$0xff]  ;;  %3805 = vmatpush.bf16.msrb.mxu2 %v5246_v54  ;;  %v6593_v54 = vld [vmem:[#allocation46_spill] sm:$0xff] }
 0x335   :  { %v6266_v39 = vadd.f32 %v3468_v30, %v3420_v15  ;;  %v5230_v15 = vld [vmem:[#allocation4 + $0x320] sm:$0xff] }
 0x336   :  { %v3373_v28 = vadd.f32 %v3372_v35, %v3324_v22  ;;  %v5254_v30 = vld [vmem:[#allocation4 + $0x3e0] sm:$0xff]  ;;  %3707 = vmatpush.bf16.msrb.mxu0 %v5230_v15 }
 0x337   :  { %3854 = vmatpush.bf16.msrb.mxu3 %v5254_v30  ;;  %v6595_v15 = vld [vmem:[#allocation48_spill] sm:$0xff]  ;;  %v5245_v30 = vld [vmem:[#allocation4 + $0x398] sm:$0xff] }
 0x338   :  { %3806 = vmatpush.bf16.msrb.mxu2 %v5245_v30  ;;  %v6598_v30 = vld [vmem:[#allocation51_spill] sm:$0xff] }
 0x33a   :  { %v3421_v1 = vpop.f32.mrf.mxu2 }
 0x33b   :  { %v3422_v53 = vadd.f32 %v3421_v1, %v3373_v28  ;;  %v3470_v32 = vpop.f32.mrf.mxu3  ;;  %v3326_v55 = vpop.f32.mrf.mxu0  ;;  %v5238_v1 = vld [vmem:[#allocation4 + $0x360] sm:$0xff] }
 0x33c   :  { %v3327_v42 = vadd.f32 %v3326_v55, %v6196_v20  ;;  %v3375_v29 = vpop.f32.mrf.mxu1  ;;  %3756 = vmatpush.bf16.msrb.mxu1 %v5238_v1 }
 0x33d   :  { %v6269_v31 = vadd.f32 %v3470_v32, %v3422_v53 }
 0x33e   :  { %v3376_v14 = vadd.f32 %v3375_v29, %v3327_v42  ;;  %3521 = vmatmul.bf16.gmra.mxu0 %v5871_v0  ;;  %3570 = vmatmul.bf16.gmra.mxu1 %v6590_v61 }
 0x33f   :  { %3619 = vmatmul.bf16.gmra.mxu2 %v6591_v38 }
 0x340   :  { %3668 = vmatmul.bf16.gmra.mxu3 %v6592_v63 }
 0x342   :  { %v3424_v52 = vpop.f32.mrf.mxu2 }
 0x343   :  { %v3425_v22 = vadd.f32 %v3424_v52, %v3376_v14  ;;  %v3473_v20 = vpop.f32.mrf.mxu3  ;;  %v3328_v35 = vpop.f32.mrf.mxu0  ;;  %v5229_v52 = vld [vmem:[#allocation4 + $0x318] sm:$0xff] }
 0x344   :  { %v3329_v4 = vadd.f32 %v3328_v35, %v6199_v33  ;;  %v3377_v28 = vpop.f32.mrf.mxu1  ;;  %v6594_v33 = vld [vmem:[#allocation47_spill] sm:$0xff]  ;;  %3708 = vmatpush.bf16.msrb.mxu0 %v5229_v52  ;;  %v5244_v52 = vld [vmem:[#allocation4 + $0x390] sm:$0xff] }
 0x345   :  { %v6276_v0 = vadd.f32 %v3473_v20, %v3425_v22  ;;  %v5253_v22 = vld [vmem:[#allocation4 + $0x3d8] sm:$0xff]  ;;  %3807 = vmatpush.bf16.msrb.mxu2 %v5244_v52  ;;  %v5243_v52 = vld [vmem:[#allocation4 + $0x388] sm:$0xff] }
 0x346   :  { %v3378_v53 = vadd.f32 %v3377_v28, %v3329_v4  ;;  %3855 = vmatpush.bf16.msrb.mxu3 %v5253_v22  ;;  %v5228_v22 = vld [vmem:[#allocation4 + $0x310] sm:$0xff] }
 0x348   :  { %3709 = vmatpush.bf16.msrb.mxu0 %v5228_v22  ;;  %v5227_v22 = vld [vmem:[#allocation4 + $0x308] sm:$0xff] }
 0x349   :  { %3808 = vmatpush.bf16.msrb.mxu2 %v5243_v52  ;;  %v5226_v52 = vld [vmem:[#allocation4 + $0x300] sm:$0xff] }
 0x34a   :  { %v3426_v32 = vpop.f32.mrf.mxu2 }
 0x34b   :  { %v3427_v55 = vadd.f32 %v3426_v32, %v3378_v53  ;;  %v3475_v42 = vpop.f32.mrf.mxu3  ;;  %v3331_v29 = vpop.f32.mrf.mxu0  ;;  %v5237_v53 = vld [vmem:[#allocation4 + $0x358] sm:$0xff] }
 0x34c   :  { %v3332_v61 = vadd.f32 %v3331_v29, %v6206_v13  ;;  %v3380_v38 = vpop.f32.mrf.mxu1  ;;  %3757 = vmatpush.bf16.msrb.mxu1 %v5237_v53  ;;  %v5236_v53 = vld [vmem:[#allocation4 + $0x350] sm:$0xff]  ;;  %3710 = vmatpush.bf16.msrb.mxu0 %v5227_v22  ;;  %v5250_v22 = vld [vmem:[#allocation4 + $0x3c0] sm:$0xff] }
 0x34d   :  { %v6279_v63 = vadd.f32 %v3475_v42, %v3427_v55 }
 0x34e   :  { %v3381_v14 = vadd.f32 %v3380_v38, %v3332_v61  ;;  %3526 = vmatmul.bf16.gmra.mxu0 %v5891_v19  ;;  %3575 = vmatmul.bf16.gmra.mxu1 %v6593_v54 }
 0x34f   :  { %3624 = vmatmul.bf16.gmra.mxu2 %v6594_v33 }
 0x350   :  { %3673 = vmatmul.bf16.gmra.mxu3 %v6595_v15  ;;  %v6596_v15 = vld [vmem:[#allocation49_spill] sm:$0xff]  ;;  %3758 = vmatpush.bf16.msrb.mxu1 %v5236_v53 }
 0x351   :  { %3711 = vmatpush.bf16.msrb.mxu0 %v5226_v52 }
 0x352   :  { %v3429_v20 = vpop.f32.mrf.mxu2 }
 0x353   :  { %v3430_v35 = vadd.f32 %v3429_v20, %v3381_v14  ;;  %v3478_v13 = vpop.f32.mrf.mxu3  ;;  %v3333_v4 = vpop.f32.mrf.mxu0  ;;  %v5252_v20 = vld [vmem:[#allocation4 + $0x3d0] sm:$0xff] }
 0x354   :  { %v3334_v28 = vadd.f32 %v3333_v4, %v6209_v62  ;;  %v3382_v1 = vpop.f32.mrf.mxu1  ;;  %v6597_v62 = vld [vmem:[#allocation50_spill] sm:$0xff]  ;;  %3856 = vmatpush.bf16.msrb.mxu3 %v5252_v20  ;;  %v5251_v20 = vld [vmem:[#allocation4 + $0x3c8] sm:$0xff] }
 0x355   :  { %v6286_v19 = vadd.f32 %v3478_v13, %v3430_v35 }
 0x356   :  { %v3383_v32 = vadd.f32 %v3382_v1, %v3334_v28 }
 0x358   :  { %3857 = vmatpush.bf16.msrb.mxu3 %v5251_v20 }
 0x35a   :  { %v3431_v55 = vpop.f32.mrf.mxu2 }
 0x35b   :  { %v3432_v42 = vadd.f32 %v3431_v55, %v3383_v32  ;;  %v3480_v29 = vpop.f32.mrf.mxu3  ;;  %v3336_v61 = vpop.f32.mrf.mxu0 }
 0x35c   :  { %v3337_v38 = vadd.f32 %v3336_v61, %v6216_v60  ;;  %v3385_v54 = vpop.f32.mrf.mxu1  ;;  %3858 = vmatpush.bf16.msrb.mxu3 %v5250_v22 }
 0x35d   :  { %v6289_v33 = vadd.f32 %v3480_v29, %v3432_v42 }
 0x35e   :  { %v3386_v14 = vadd.f32 %v3385_v54, %v3337_v38  ;;  %3531 = vmatmul.bf16.gmra.mxu0 %v5911_v47  ;;  %3580 = vmatmul.bf16.gmra.mxu1 %v6596_v15 }
 0x35f   :  { %3629 = vmatmul.bf16.gmra.mxu2 %v6597_v62  ;;  %v6599_v62 = vld [vmem:[#allocation52_spill] sm:$0xff] }
 0x360   :  { %3678 = vmatmul.bf16.gmra.mxu3 %v6598_v30  ;;  %v6601_v30 = vld [vmem:[#allocation54_spill] sm:$0xff] }
 0x362   :  { %v3434_v35 = vpop.f32.mrf.mxu2 }
 0x363   :  { %v3435_v13 = vadd.f32 %v3434_v35, %v3386_v14  ;;  %v3483_v60 = vpop.f32.mrf.mxu3  ;;  %v3338_v4 = vpop.f32.mrf.mxu0 }
 0x364   :  { %v3339_v28 = vadd.f32 %v3338_v4, %v6219_v5  ;;  %v3387_v1 = vpop.f32.mrf.mxu1  ;;  %v6600_v5 = vld [vmem:[#allocation53_spill] sm:$0xff] }
 0x365   :  { %v6296_v47 = vadd.f32 %v3483_v60, %v3435_v13 }
 0x366   :  { %v3388_v32 = vadd.f32 %v3387_v1, %v3339_v28  ;;  %v5235_v1 = vld [vmem:[#allocation4 + $0x348] sm:$0xff] }
 0x367   :  { %3759 = vmatpush.bf16.msrb.mxu1 %v5235_v1 }
 0x36a   :  { %v3436_v55 = vpop.f32.mrf.mxu2 }
 0x36b   :  { %v3437_v42 = vadd.f32 %v3436_v55, %v3388_v32  ;;  %v3485_v29 = vpop.f32.mrf.mxu3  ;;  %v3341_v61 = vpop.f32.mrf.mxu0 }
 0x36c   :  { %v3342_v38 = vadd.f32 %v3341_v61, %v6226_v24  ;;  %v3390_v54 = vpop.f32.mrf.mxu1 }
 0x36d   :  { %v6299_v15 = vadd.f32 %v3485_v29, %v3437_v42 }
 0x36e   :  { %v3391_v14 = vadd.f32 %v3390_v54, %v3342_v38  ;;  %3536 = vmatmul.bf16.gmra.mxu0 %v5931_v8  ;;  %3585 = vmatmul.bf16.gmra.mxu1 %v6599_v62  ;;  %v6602_v62 = vld [vmem:[#allocation55_spill] sm:$0xff] }
 0x36f   :  { %3634 = vmatmul.bf16.gmra.mxu2 %v6600_v5  ;;  %v6604_v5 = vld [vmem:[#allocation57_spill] sm:$0xff] }
 0x370   :  { %3683 = vmatmul.bf16.gmra.mxu3 %v6601_v30  ;;  %v5242_v30 = vld [vmem:[#allocation4 + $0x380] sm:$0xff] }
 0x371   :  { %3809 = vmatpush.bf16.msrb.mxu2 %v5242_v30 }
 0x372   :  { %v3439_v35 = vpop.f32.mrf.mxu2 }
 0x373   :  { %v3440_v13 = vadd.f32 %v3439_v35, %v3391_v14  ;;  %v3488_v24 = vpop.f32.mrf.mxu3  ;;  %v3343_v60 = vpop.f32.mrf.mxu0 }
 0x374   :  { %v3344_v4 = vadd.f32 %v3343_v60, %v6229_v50  ;;  %v3392_v28 = vpop.f32.mrf.mxu1  ;;  %v6603_v50 = vld [vmem:[#allocation56_spill] sm:$0xff] }
 0x375   :  { %v6306_v8 = vadd.f32 %v3488_v24, %v3440_v13 }
 0x376   :  { %v3393_v53 = vadd.f32 %v3392_v28, %v3344_v4  ;;  %v5234_v4 = vld [vmem:[#allocation4 + $0x340] sm:$0xff] }
 0x377   :  { %3760 = vmatpush.bf16.msrb.mxu1 %v5234_v4 }
 0x37a   :  { %v3441_v32 = vpop.f32.mrf.mxu2 }
 0x37b   :  { %v3442_v55 = vadd.f32 %v3441_v32, %v3393_v53  ;;  %v3490_v42 = vpop.f32.mrf.mxu3  ;;  %v3346_v29 = vpop.f32.mrf.mxu0 }
 0x37c   :  { %v3347_v61 = vadd.f32 %v3346_v29, %v6236_v49  ;;  %v3395_v38 = vpop.f32.mrf.mxu1 }
 0x37d   :  { %v6309_v54 = vadd.f32 %v3490_v42, %v3442_v55 }
 0x37e   :  { %v3396_v14 = vadd.f32 %v3395_v38, %v3347_v61  ;;  %3541 = vmatmul.bf16.gmra.mxu0 %v5951_v37  ;;  %3590 = vmatmul.bf16.gmra.mxu1 %v6602_v62 }
 0x37f   :  { %3639 = vmatmul.bf16.gmra.mxu2 %v6603_v50 }
 0x380   :  { %3688 = vmatmul.bf16.gmra.mxu3 %v6604_v5 }
 0x382   :  { %v3444_v20 = vpop.f32.mrf.mxu2 }
 0x383   :  { %v3445_v35 = vadd.f32 %v3444_v20, %v3396_v14  ;;  %v3493_v49 = vpop.f32.mrf.mxu3  ;;  %v3348_v13 = vpop.f32.mrf.mxu0  ;;  %v6606_v14 = vld [vmem:[#allocation59_spill] sm:$0xff] }
 0x384   :  { %v3349_v24 = vadd.f32 %v3348_v13, %v6239_v56  ;;  %v3397_v60 = vpop.f32.mrf.mxu1  ;;  %v6605_v56 = vld [vmem:[#allocation58_spill] sm:$0xff] }
 0x385   :  { %v6316_v37 = vadd.f32 %v3493_v49, %v3445_v35 }
 0x386   :  { %v3398_v28 = vadd.f32 %v3397_v60, %v3349_v24 }
 0x38a   :  { %v3446_v1 = vpop.f32.mrf.mxu2 }
 0x38b   :  { %v3447_v53 = vadd.f32 %v3446_v1, %v3398_v28  ;;  %v3495_v32 = vpop.f32.mrf.mxu3  ;;  %v3351_v55 = vpop.f32.mrf.mxu0 }
 0x38c   :  { %v3352_v42 = vadd.f32 %v3351_v55, %v6246_v57  ;;  %v3400_v29 = vpop.f32.mrf.mxu1 }
 0x38d   :  { %v6319_v61 = vadd.f32 %v3495_v32, %v3447_v53 }
 0x38e   :  { %v3401_v38 = vadd.f32 %v3400_v29, %v3352_v42  ;;  %3546 = vmatmul.bf16.gmra.mxu0 %v5971_v40  ;;  %3595 = vmatmul.bf16.gmra.mxu1 %v5974_v27 }
 0x38f   :  { %3644 = vmatmul.bf16.gmra.mxu2 %v6605_v56 }
 0x390   :  { %3693 = vmatmul.bf16.gmra.mxu3 %v6606_v14 }
 0x392   :  { %v3449_v62 = vpop.f32.mrf.mxu2 }
 0x393   :  { %v3450_v50 = vadd.f32 %v3449_v62, %v3401_v38  ;;  %v3498_v5 = vpop.f32.mrf.mxu3  ;;  %v3353_v30 = vpop.f32.mrf.mxu0 }
 0x394   :  { %v3354_v52 = vadd.f32 %v3353_v30, %v6249_v44  ;;  %v3402_v22 = vpop.f32.mrf.mxu1 }
 0x395   :  { %v6326_v57 = vadd.f32 %v3498_v5, %v3450_v50 }
 0x396   :  { %v3403_v20 = vadd.f32 %v3402_v22, %v3354_v52 }
 0x39a   :  { %v3451_v35 = vpop.f32.mrf.mxu2 }
 0x39b   :  { %v3452_v49 = vadd.f32 %v3451_v35, %v3403_v20  ;;  %v3500_v13 = vpop.f32.mrf.mxu3  ;;  %v3356_v40 = vpop.f32.mrf.mxu0 }
 0x39c   :  { %v3357_v27 = vadd.f32 %v3356_v40, %v6256_v51  ;;  %v3405_v24 = vpop.f32.mrf.mxu1 }
 0x39d   :  { %v6329_v60 = vadd.f32 %v3500_v13, %v3452_v49 }
 0x39e   :  { %v3406_v4 = vadd.f32 %v3405_v24, %v3357_v27  ;;  %3551 = vmatmul.bf16.gmra.mxu0 %v5991_v18  ;;  %3600 = vmatmul.bf16.gmra.mxu1 %v5994_v21 }
 0x39f   :  { %3649 = vmatmul.bf16.gmra.mxu2 %v6008_v45 }
 0x3a0   :  { %3698 = vmatmul.bf16.gmra.mxu3 %v6011_v48 }
 0x3a2   :  { %v3454_v44 = vpop.f32.mrf.mxu2 }
 0x3a3   :  { %v3455_v28 = vadd.f32 %v3454_v44, %v3406_v4  ;;  %v3503_v1 = vpop.f32.mrf.mxu3  ;;  %v3358_v53 = vpop.f32.mrf.mxu0 }
 0x3a4   :  { %v3359_v32 = vadd.f32 %v3358_v53, %v6259_v23  ;;  %v3407_v55 = vpop.f32.mrf.mxu1 }
 0x3a5   :  { %v6336_v51 = vadd.f32 %v3503_v1, %v3455_v28 }
 0x3a6   :  { %v3408_v42 = vadd.f32 %v3407_v55, %v3359_v32 }
 0x3aa   :  { %v3456_v29 = vpop.f32.mrf.mxu2 }
 0x3ab   :  { %v3457_v38 = vadd.f32 %v3456_v29, %v3408_v42  ;;  %v3505_v56 = vpop.f32.mrf.mxu3  ;;  %v3517_v18 = vpop.f32.mrf.mxu0 }
 0x3ac   :  { %v3518_v21 = vadd.f32 %v3517_v18, %v6266_v39  ;;  %v3566_v14 = vpop.f32.mrf.mxu1 }
 0x3ad   :  { %v6339_v45 = vadd.f32 %v3505_v56, %v3457_v38 }
 0x3ae   :  { %v3567_v48 = vadd.f32 %v3566_v14, %v3518_v21  ;;  %3712 = vmatmul.bf16.vlgmr.msrb.gmra.mxu0 %v6023_v16  ;;  %3761 = vmatmul.bf16.vlgmr.msrb.gmra.mxu1 %v6026_v43 }
 0x3af   :  { %3810 = vmatmul.bf16.vlgmr.msrb.gmra.mxu2 %v6032_v41 }
 0x3b0   :  { %3859 = vmatmul.bf16.vlgmr.msrb.gmra.mxu3 %v6036_v7 }
 0x3b2   :  { %v3615_v23 = vpop.f32.mrf.mxu2 }
 0x3b3   :  { %v3616_v62 = vadd.f32 %v3615_v23, %v3567_v48  ;;  %v3664_v50 = vpop.f32.mrf.mxu3  ;;  %v3519_v5 = vpop.f32.mrf.mxu0 }
 0x3b4   :  { %v3520_v30 = vadd.f32 %v3519_v5, %v6269_v31  ;;  %v3568_v52 = vpop.f32.mrf.mxu1 }
 0x3b5   :  { %v6346_v39 = vadd.f32 %v3664_v50, %v3616_v62 }
 0x3b6   :  { %v3569_v22 = vadd.f32 %v3568_v52, %v3520_v30 }
 0x3ba   :  { %v3617_v20 = vpop.f32.mrf.mxu2 }
 0x3bb   :  { %v3618_v35 = vadd.f32 %v3617_v20, %v3569_v22  ;;  %v3666_v49 = vpop.f32.mrf.mxu3  ;;  %v3522_v16 = vpop.f32.mrf.mxu0 }
 0x3bc   :  { %v3523_v43 = vadd.f32 %v3522_v16, %v6276_v0  ;;  %v3571_v13 = vpop.f32.mrf.mxu1 }
 0x3bd   :  { %v6349_v41 = vadd.f32 %v3666_v49, %v3618_v35 }
 0x3be   :  { %v3572_v7 = vadd.f32 %v3571_v13, %v3523_v43  ;;  %3717 = vmatmul.bf16.gmra.mxu0 %v6043_v9  ;;  %3766 = vmatmul.bf16.gmra.mxu1 %v6046_v34 }
 0x3bf   :  { %3815 = vmatmul.bf16.gmra.mxu2 %v6054_v12 }
 0x3c0   :  { %3864 = vmatmul.bf16.gmra.mxu3 %v6057_v3 }
 0x3c2   :  { %v3620_v31 = vpop.f32.mrf.mxu2 }
 0x3c3   :  { %v3621_v40 = vadd.f32 %v3620_v31, %v3572_v7  ;;  %v3669_v27 = vpop.f32.mrf.mxu3  ;;  %v3524_v24 = vpop.f32.mrf.mxu0 }
 0x3c4   :  { %v3525_v4 = vadd.f32 %v3524_v24, %v6279_v63  ;;  %v3573_v44 = vpop.f32.mrf.mxu1 }
 0x3c5   :  { %v6356_v0 = vadd.f32 %v3669_v27, %v3621_v40 }
 0x3c6   :  { %v3574_v28 = vadd.f32 %v3573_v44, %v3525_v4 }
 0x3ca   :  { %v3622_v1 = vpop.f32.mrf.mxu2 }
 0x3cb   :  { %v3623_v53 = vadd.f32 %v3622_v1, %v3574_v28  ;;  %v3671_v32 = vpop.f32.mrf.mxu3  ;;  %v3527_v9 = vpop.f32.mrf.mxu0 }
 0x3cc   :  { %v3528_v34 = vadd.f32 %v3527_v9, %v6286_v19  ;;  %v3576_v55 = vpop.f32.mrf.mxu1  ;;  %v6608_v9 = vld [vmem:[#allocation61_spill] sm:$0xff] }
 0x3cd   :  { %v6359_v12 = vadd.f32 %v3671_v32, %v3623_v53 }
 0x3ce   :  { %v3577_v3 = vadd.f32 %v3576_v55, %v3528_v34  ;;  %3722 = vmatmul.bf16.gmra.mxu0 %v6063_v26  ;;  %3771 = vmatmul.bf16.gmra.mxu1 %v6066_v59  ;;  %v6609_v34 = vld [vmem:[#allocation62_spill] sm:$0xff]  ;;  %v6610_v55 = vld [vmem:[#allocation63_spill] sm:$0xff] }
 0x3cf   :  { %3820 = vmatmul.bf16.gmra.mxu2 %v6074_v17 }
 0x3d0   :  { %3869 = vmatmul.bf16.gmra.mxu3 %v6077_v10 }
 0x3d2   :  { %v3625_v63 = vpop.f32.mrf.mxu2 }
 0x3d3   :  { %v3626_v42 = vadd.f32 %v3625_v63, %v3577_v3  ;;  %v3674_v29 = vpop.f32.mrf.mxu3  ;;  %v3529_v38 = vpop.f32.mrf.mxu0 }
 0x3d4   :  { %v3530_v56 = vadd.f32 %v3529_v38, %v6289_v33  ;;  %v3578_v18 = vpop.f32.mrf.mxu1 }
 0x3d5   :  { %v6366_v19 = vadd.f32 %v3674_v29, %v3626_v42 }
 0x3d6   :  { %v3579_v21 = vadd.f32 %v3578_v18, %v3530_v56 }
 0x3da   :  { %v3627_v14 = vpop.f32.mrf.mxu2 }
 0x3db   :  { %v3628_v48 = vadd.f32 %v3627_v14, %v3579_v21  ;;  %v3676_v23 = vpop.f32.mrf.mxu3  ;;  %v3532_v26 = vpop.f32.mrf.mxu0 }
 0x3dc   :  { %v3533_v59 = vadd.f32 %v3532_v26, %v6296_v47  ;;  %v3581_v62 = vpop.f32.mrf.mxu1 }
 0x3dd   :  { %v6369_v17 = vadd.f32 %v3676_v23, %v3628_v48 }
 0x3de   :  { %v3582_v10 = vadd.f32 %v3581_v62, %v3533_v59  ;;  %3727 = vmatmul.bf16.gmra.mxu0 %v6083_v46  ;;  %3776 = vmatmul.bf16.gmra.mxu1 %v6086_v58 }
 0x3df   :  { %3825 = vmatmul.bf16.gmra.mxu2 %v6094_v11 }
 0x3e0   :  { %3874 = vmatmul.bf16.gmra.mxu3 %v6097_v25 }
 0x3e2   :  { %v3630_v33 = vpop.f32.mrf.mxu2 }
 0x3e3   :  { %v3631_v50 = vadd.f32 %v3630_v33, %v3582_v10  ;;  %v3679_v5 = vpop.f32.mrf.mxu3  ;;  %v3534_v30 = vpop.f32.mrf.mxu0  ;;  %v6612_v33 = vld [vmem:[#allocation65_spill] sm:$0xff] }
 0x3e4   :  { %v3535_v52 = vadd.f32 %v3534_v30, %v6299_v15  ;;  %v3583_v22 = vpop.f32.mrf.mxu1  ;;  %v6607_v15 = vld [vmem:[#allocation60_spill] sm:$0xff] }
 0x3e5   :  { %v6376_v47 = vadd.f32 %v3679_v5, %v3631_v50  ;;  %v6613_v50 = vld [vmem:[#allocation66_spill] sm:$0xff]  ;;  %v6614_v5 = vld [vmem:[#allocation67_spill] sm:$0xff] }
 0x3e6   :  { %v3584_v20 = vadd.f32 %v3583_v22, %v3535_v52 }
 0x3ea   :  { %v3632_v35 = vpop.f32.mrf.mxu2 }
 0x3eb   :  { %v3633_v49 = vadd.f32 %v3632_v35, %v3584_v20  ;;  %v3681_v16 = vpop.f32.mrf.mxu3  ;;  %v3537_v46 = vpop.f32.mrf.mxu0 }
 0x3ec   :  { %v3538_v58 = vadd.f32 %v3537_v46, %v6306_v8  ;;  %v3586_v43 = vpop.f32.mrf.mxu1 }
 0x3ed   :  { %v6379_v11 = vadd.f32 %v3681_v16, %v3633_v49 }
 0x3ee   :  { %v3587_v25 = vadd.f32 %v3586_v43, %v3538_v58  ;;  %3732 = vmatmul.bf16.gmra.mxu0 %v6103_v36  ;;  %3781 = vmatmul.bf16.gmra.mxu1 %v6106_v6 }
 0x3ef   :  { %3830 = vmatmul.bf16.gmra.mxu2 %v6114_v2 }
 0x3f0   :  { %3879 = vmatmul.bf16.gmra.mxu3 %v6607_v15 }
 0x3f2   :  { %v3635_v13 = vpop.f32.mrf.mxu2 }
 0x3f3   :  { %v3636_v7 = vadd.f32 %v3635_v13, %v3587_v25  ;;  %v3684_v31 = vpop.f32.mrf.mxu3  ;;  %v3539_v40 = vpop.f32.mrf.mxu0 }
 0x3f4   :  { %v3540_v27 = vadd.f32 %v3539_v40, %v6309_v54  ;;  %v3588_v24 = vpop.f32.mrf.mxu1  ;;  %v6611_v54 = vld [vmem:[#allocation64_spill] sm:$0xff]  ;;  %v6616_v40 = vld [vmem:[#allocation69_spill] sm:$0xff] }
 0x3f5   :  { %v6386_v8 = vadd.f32 %v3684_v31, %v3636_v7 }
 0x3f6   :  { %v3589_v4 = vadd.f32 %v3588_v24, %v3540_v27  ;;  %v6617_v27 = vld [vmem:[#allocation70_spill] sm:$0xff]  ;;  %v6618_v24 = vld [vmem:[#allocation8_spill] sm:$0xff] }
 0x3fa   :  { %v3637_v44 = vpop.f32.mrf.mxu2 }
 0x3fb   :  { %v3638_v28 = vadd.f32 %v3637_v44, %v3589_v4  ;;  %v3686_v1 = vpop.f32.mrf.mxu3  ;;  %v3542_v36 = vpop.f32.mrf.mxu0 }
 0x3fc   :  { %v3543_v6 = vadd.f32 %v3542_v36, %v6316_v37  ;;  %v3591_v53 = vpop.f32.mrf.mxu1 }
 0x3fd   :  { %v6389_v2 = vadd.f32 %v3686_v1, %v3638_v28 }
 0x3fe   :  { %v3592_v32 = vadd.f32 %v3591_v53, %v3543_v6  ;;  %3737 = vmatmul.bf16.gmra.mxu0 %v6608_v9  ;;  %3786 = vmatmul.bf16.gmra.mxu1 %v6609_v34 }
 0x3ff   :  { %3835 = vmatmul.bf16.gmra.mxu2 %v6610_v55 }
 0x400   :  { %3884 = vmatmul.bf16.gmra.mxu3 %v6611_v54 }
 0x402   :  { %v3640_v3 = vpop.f32.mrf.mxu2 }
 0x403   :  { %v3641_v63 = vadd.f32 %v3640_v3, %v3592_v32  ;;  %v3689_v42 = vpop.f32.mrf.mxu3  ;;  %v3544_v29 = vpop.f32.mrf.mxu0 }
 0x404   :  { %v3545_v38 = vadd.f32 %v3544_v29, %v6319_v61  ;;  %v3593_v56 = vpop.f32.mrf.mxu1  ;;  %v6615_v61 = vld [vmem:[#allocation68_spill] sm:$0xff] }
 0x405   :  { %v6396_v37 = vadd.f32 %v3689_v42, %v3641_v63 }
 0x406   :  { %v3594_v18 = vadd.f32 %v3593_v56, %v3545_v38 }
 0x40a   :  { %v3642_v21 = vpop.f32.mrf.mxu2 }
 0x40b   :  { %v3643_v14 = vadd.f32 %v3642_v21, %v3594_v18  ;;  %v3691_v48 = vpop.f32.mrf.mxu3  ;;  %v3547_v23 = vpop.f32.mrf.mxu0 }
 0x40c   :  { %v3548_v26 = vadd.f32 %v3547_v23, %v6326_v57  ;;  %v3596_v59 = vpop.f32.mrf.mxu1 }
 0x40d   :  { %v6399_v62 = vadd.f32 %v3691_v48, %v3643_v14 }
 0x40e   :  { %v3597_v10 = vadd.f32 %v3596_v59, %v3548_v26  ;;  %3742 = vmatmul.bf16.gmra.mxu0 %v6612_v33  ;;  %3791 = vmatmul.bf16.gmra.mxu1 %v6613_v50 }
 0x40f   :  { %3840 = vmatmul.bf16.gmra.mxu2 %v6614_v5 }
 0x410   :  { %3889 = vmatmul.bf16.gmra.mxu3 %v6615_v61 }
 0x412   :  { %v3645_v30 = vpop.f32.mrf.mxu2 }
 0x413   :  { %v3646_v52 = vadd.f32 %v3645_v30, %v3597_v10  ;;  %v3694_v22 = vpop.f32.mrf.mxu3  ;;  %v3549_v20 = vpop.f32.mrf.mxu0 }
 0x414   :  { %v3550_v35 = vadd.f32 %v3549_v20, %v6329_v60  ;;  %v3598_v49 = vpop.f32.mrf.mxu1  ;;  %v6619_v60 = vld [vmem:[#allocation9_spill] sm:$0xff] }
 0x415   :  { %v6406_v57 = vadd.f32 %v3694_v22, %v3646_v52 }
 0x416   :  { %v3599_v16 = vadd.f32 %v3598_v49, %v3550_v35 }
 0x41a   :  { %v3647_v46 = vpop.f32.mrf.mxu2 }
 0x41b   :  { %v3648_v58 = vadd.f32 %v3647_v46, %v3599_v16  ;;  %v3696_v43 = vpop.f32.mrf.mxu3  ;;  %v3552_v25 = vpop.f32.mrf.mxu0 }
 0x41c   :  { %v3553_v15 = vadd.f32 %v3552_v25, %v6336_v51  ;;  %v3601_v13 = vpop.f32.mrf.mxu1 }
 0x41d   :  { %v6409_v7 = vadd.f32 %v3696_v43, %v3648_v58 }
 0x41e   :  { %v3602_v31 = vadd.f32 %v3601_v13, %v3553_v15  ;;  %3747 = vmatmul.bf16.gmra.mxu0 %v6616_v40  ;;  %3796 = vmatmul.bf16.gmra.mxu1 %v6617_v27 }
 0x41f   :  { %3845 = vmatmul.bf16.gmra.mxu2 %v6618_v24 }
 0x420   :  { %3894 = vmatmul.bf16.gmra.mxu3 %v6619_v60 }
 0x422   :  { %v3650_v4 = vpop.f32.mrf.mxu2 }
 0x423   :  { %v3651_v44 = vadd.f32 %v3650_v4, %v3602_v31  ;;  %v3699_v28 = vpop.f32.mrf.mxu3  ;;  %v3554_v1 = vpop.f32.mrf.mxu0 }
 0x424   :  { %v3555_v36 = vadd.f32 %v3554_v1, %v6339_v45  ;;  %v3603_v6 = vpop.f32.mrf.mxu1 }
 0x425   :  { %v6416_v51 = vadd.f32 %v3699_v28, %v3651_v44 }
 0x426   :  { %v3604_v53 = vadd.f32 %v3603_v6, %v3555_v36 }
 0x42a   :  { %v3652_v32 = vpop.f32.mrf.mxu2 }
 0x42b   :  { %v3653_v9 = vadd.f32 %v3652_v32, %v3604_v53  ;;  %v3701_v34 = vpop.f32.mrf.mxu3  ;;  %v3713_v55 = vpop.f32.mrf.mxu0 }
 0x42c   :  { %v3762_v54 = vpop.f32.mrf.mxu1  ;;  %v3714_v63 = vadd.f32 %v3713_v55, %v6346_v39 }
 0x42d   :  { %v6418_v3 = vadd.f32 %v3701_v34, %v3653_v9 }
 0x42e   :  { %v3763_v42 = vadd.f32 %v3762_v54, %v3714_v63 }
 0x432   :  { %v3811_v29 = vpop.f32.mrf.mxu2 }
 0x433   :  { %v3812_v38 = vadd.f32 %v3811_v29, %v3763_v42  ;;  %v3860_v56 = vpop.f32.mrf.mxu3  ;;  %v3715_v18 = vpop.f32.mrf.mxu0 }
 0x434   :  { %v3764_v21 = vpop.f32.mrf.mxu1  ;;  %v3716_v14 = vadd.f32 %v3715_v18, %v6349_v41 }
 0x435   :  { %v3861_v45 = vadd.f32 %v3860_v56, %v3812_v38 }
 0x436   :  { %v3765_v23 = vadd.f32 %v3764_v21, %v3716_v14 }
 0x437   :  { %v3900_v48 = vmax.f32 %v3861_v45, 0.0 }
 0x439   :  { %3916 = vst [vmem:[%s6489_s5] sm:$0xff] %v3900_v48 }
 0x43a   :  { %v3813_v26 = vpop.f32.mrf.mxu2 }
 0x43b   :  { %v3814_v59 = vadd.f32 %v3813_v26, %v3765_v23  ;;  %v3862_v10 = vpop.f32.mrf.mxu3  ;;  %v3718_v33 = vpop.f32.mrf.mxu0 }
 0x43c   :  { %v3767_v39 = vpop.f32.mrf.mxu1  ;;  %v3719_v5 = vadd.f32 %v3718_v33, %v6356_v0 }
 0x43d   :  { %v3863_v50 = vadd.f32 %v3862_v10, %v3814_v59 }
 0x43e   :  { %v3768_v41 = vadd.f32 %v3767_v39, %v3719_v5 }
 0x43f   :  { %v3901_v61 = vmax.f32 %v3863_v50, 0.0 }
 0x441   :  { %3917 = vst [vmem:[%s6489_s5 + $0x8] sm:$0xff] %v3901_v61 }
 0x442   :  { %v3816_v30 = vpop.f32.mrf.mxu2 }
 0x443   :  { %v3817_v52 = vadd.f32 %v3816_v30, %v3768_v41  ;;  %v3865_v22 = vpop.f32.mrf.mxu3  ;;  %v3720_v20 = vpop.f32.mrf.mxu0 }
 0x444   :  { %v3769_v35 = vpop.f32.mrf.mxu1  ;;  %v3721_v16 = vadd.f32 %v3720_v20, %v6359_v12 }
 0x445   :  { %v3866_v49 = vadd.f32 %v3865_v22, %v3817_v52 }
 0x446   :  { %v3770_v0 = vadd.f32 %v3769_v35, %v3721_v16 }
 0x447   :  { %v3902_v46 = vmax.f32 %v3866_v49, 0.0 }
 0x449   :  { %3918 = vst [vmem:[%s6489_s5 + $0x10] sm:$0xff] %v3902_v46 }
 0x44a   :  { %v3818_v58 = vpop.f32.mrf.mxu2 }
 0x44b   :  { %v3819_v43 = vadd.f32 %v3818_v58, %v3770_v0  ;;  %v3867_v25 = vpop.f32.mrf.mxu3  ;;  %v3723_v15 = vpop.f32.mrf.mxu0 }
 0x44c   :  { %v3772_v13 = vpop.f32.mrf.mxu1  ;;  %v3724_v40 = vadd.f32 %v3723_v15, %v6366_v19 }
 0x44d   :  { %v3868_v31 = vadd.f32 %v3867_v25, %v3819_v43 }
 0x44e   :  { %v3773_v12 = vadd.f32 %v3772_v13, %v3724_v40 }
 0x44f   :  { %v3903_v27 = vmax.f32 %v3868_v31, 0.0 }
 0x451   :  { %3919 = vst [vmem:[%s6489_s5 + $0x18] sm:$0xff] %v3903_v27 }
 0x452   :  { %v3821_v24 = vpop.f32.mrf.mxu2 }
 0x453   :  { %v3822_v60 = vadd.f32 %v3821_v24, %v3773_v12  ;;  %v3870_v4 = vpop.f32.mrf.mxu3  ;;  %v3725_v44 = vpop.f32.mrf.mxu0 }
 0x454   :  { %v3774_v28 = vpop.f32.mrf.mxu1  ;;  %v3726_v36 = vadd.f32 %v3725_v44, %v6369_v17 }
 0x455   :  { %v3871_v1 = vadd.f32 %v3870_v4, %v3822_v60 }
 0x456   :  { %v3775_v19 = vadd.f32 %v3774_v28, %v3726_v36 }
 0x457   :  { %v3904_v6 = vmax.f32 %v3871_v1, 0.0 }
 0x459   :  { %3920 = vst [vmem:[%s6489_s5 + $0x20] sm:$0xff] %v3904_v6 }
 0x45a   :  { %v3823_v53 = vpop.f32.mrf.mxu2 }
 0x45b   :  { %v3824_v32 = vadd.f32 %v3823_v53, %v3775_v19  ;;  %v3872_v9 = vpop.f32.mrf.mxu3  ;;  %v3728_v34 = vpop.f32.mrf.mxu0 }
 0x45c   :  { %v3777_v55 = vpop.f32.mrf.mxu1  ;;  %v3729_v63 = vadd.f32 %v3728_v34, %v6376_v47 }
 0x45d   :  { %v3873_v54 = vadd.f32 %v3872_v9, %v3824_v32 }
 0x45e   :  { %v3778_v17 = vadd.f32 %v3777_v55, %v3729_v63 }
 0x45f   :  { %v3905_v42 = vmax.f32 %v3873_v54, 0.0 }
 0x461   :  { %3921 = vst [vmem:[%s6489_s5 + $0x28] sm:$0xff] %v3905_v42 }
 0x462   :  { %v3826_v29 = vpop.f32.mrf.mxu2 }
 0x463   :  { %v3827_v38 = vadd.f32 %v3826_v29, %v3778_v17  ;;  %v3875_v56 = vpop.f32.mrf.mxu3  ;;  %v3730_v18 = vpop.f32.mrf.mxu0 }
 0x464   :  { %v3779_v21 = vpop.f32.mrf.mxu1  ;;  %v3731_v14 = vadd.f32 %v3730_v18, %v6379_v11 }
 0x465   :  { %v3876_v45 = vadd.f32 %v3875_v56, %v3827_v38 }
 0x466   :  { %v3780_v47 = vadd.f32 %v3779_v21, %v3731_v14 }
 0x467   :  { %v3906_v48 = vmax.f32 %v3876_v45, 0.0 }
 0x469   :  { %3922 = vst [vmem:[%s6489_s5 + $0x30] sm:$0xff] %v3906_v48 }
 0x46a   :  { %v3828_v23 = vpop.f32.mrf.mxu2 }
 0x46b   :  { %v3829_v26 = vadd.f32 %v3828_v23, %v3780_v47  ;;  %v3877_v59 = vpop.f32.mrf.mxu3  ;;  %v3733_v10 = vpop.f32.mrf.mxu0 }
 0x46c   :  { %v3782_v33 = vpop.f32.mrf.mxu1  ;;  %v3734_v50 = vadd.f32 %v3733_v10, %v6386_v8 }
 0x46d   :  { %v3878_v39 = vadd.f32 %v3877_v59, %v3829_v26 }
 0x46e   :  { %v3783_v11 = vadd.f32 %v3782_v33, %v3734_v50 }
 0x46f   :  { %v3907_v5 = vmax.f32 %v3878_v39, 0.0 }
 0x471   :  { %3923 = vst [vmem:[%s6489_s5 + $0x38] sm:$0xff] %v3907_v5 }
 0x472   :  { %v3831_v61 = vpop.f32.mrf.mxu2 }
 0x473   :  { %v3832_v41 = vadd.f32 %v3831_v61, %v3783_v11  ;;  %v3880_v30 = vpop.f32.mrf.mxu3  ;;  %v3735_v52 = vpop.f32.mrf.mxu0 }
 0x474   :  { %v3784_v22 = vpop.f32.mrf.mxu1  ;;  %v3736_v35 = vadd.f32 %v3735_v52, %v6389_v2 }
 0x475   :  { %v3881_v20 = vadd.f32 %v3880_v30, %v3832_v41 }
 0x476   :  { %v3785_v8 = vadd.f32 %v3784_v22, %v3736_v35 }
 0x477   :  { %v3908_v49 = vmax.f32 %v3881_v20, 0.0 }
 0x479   :  { %3924 = vst [vmem:[%s6489_s5 + $0x40] sm:$0xff] %v3908_v49 }
 0x47a   :  { %v3833_v16 = vpop.f32.mrf.mxu2 }
 0x47b   :  { %v3834_v46 = vadd.f32 %v3833_v16, %v3785_v8  ;;  %v3882_v0 = vpop.f32.mrf.mxu3  ;;  %v3738_v58 = vpop.f32.mrf.mxu0 }
 0x47c   :  { %v3787_v43 = vpop.f32.mrf.mxu1  ;;  %v3739_v15 = vadd.f32 %v3738_v58, %v6396_v37 }
 0x47d   :  { %v3883_v25 = vadd.f32 %v3882_v0, %v3834_v46 }
 0x47e   :  { %v3788_v2 = vadd.f32 %v3787_v43, %v3739_v15 }
 0x47f   :  { %v3909_v13 = vmax.f32 %v3883_v25, 0.0 }
 0x481   :  { %3925 = vst [vmem:[%s6489_s5 + $0x48] sm:$0xff] %v3909_v13 }
 0x482   :  { %v3836_v31 = vpop.f32.mrf.mxu2 }
 0x483   :  { %v3837_v40 = vadd.f32 %v3836_v31, %v3788_v2  ;;  %v3885_v27 = vpop.f32.mrf.mxu3  ;;  %v3740_v12 = vpop.f32.mrf.mxu0 }
 0x484   :  { %v3789_v24 = vpop.f32.mrf.mxu1  ;;  %v3741_v4 = vadd.f32 %v3740_v12, %v6399_v62 }
 0x485   :  { %v3886_v60 = vadd.f32 %v3885_v27, %v3837_v40 }
 0x486   :  { %v3790_v37 = vadd.f32 %v3789_v24, %v3741_v4 }
 0x487   :  { %v3910_v44 = vmax.f32 %v3886_v60, 0.0 }
 0x489   :  { %3926 = vst [vmem:[%s6489_s5 + $0x50] sm:$0xff] %v3910_v44 }
 0x48a   :  { %v3838_v28 = vpop.f32.mrf.mxu2 }
 0x48b   :  { %v3839_v1 = vadd.f32 %v3838_v28, %v3790_v37  ;;  %v3887_v36 = vpop.f32.mrf.mxu3  ;;  %v3743_v6 = vpop.f32.mrf.mxu0 }
 0x48c   :  { %v3792_v19 = vpop.f32.mrf.mxu1  ;;  %v3744_v32 = vadd.f32 %v3743_v6, %v6406_v57 }
 0x48d   :  { %v3888_v53 = vadd.f32 %v3887_v36, %v3839_v1 }
 0x48e   :  { %v3793_v62 = vadd.f32 %v3792_v19, %v3744_v32 }
 0x48f   :  { %v3911_v9 = vmax.f32 %v3888_v53, 0.0 }
 0x491   :  { %3927 = vst [vmem:[%s6489_s5 + $0x58] sm:$0xff] %v3911_v9 }
 0x492   :  { %v3841_v34 = vpop.f32.mrf.mxu2 }
 0x493   :  { %v3842_v55 = vadd.f32 %v3841_v34, %v3793_v62  ;;  %v3890_v54 = vpop.f32.mrf.mxu3  ;;  %v3745_v63 = vpop.f32.mrf.mxu0 }
 0x494   :  { %v3794_v42 = vpop.f32.mrf.mxu1  ;;  %v3746_v29 = vadd.f32 %v3745_v63, %v6409_v7 }
 0x495   :  { %v3891_v17 = vadd.f32 %v3890_v54, %v3842_v55 }
 0x496   :  { %v3795_v57 = vadd.f32 %v3794_v42, %v3746_v29 }
 0x497   :  { %v3912_v38 = vmax.f32 %v3891_v17, 0.0 }
 0x499   :  { %3928 = vst [vmem:[%s6489_s5 + $0x60] sm:$0xff] %v3912_v38 }
 0x49a   :  { %v3843_v56 = vpop.f32.mrf.mxu2 }
 0x49b   :  { %v3844_v18 = vadd.f32 %v3843_v56, %v3795_v57  ;;  %v3892_v21 = vpop.f32.mrf.mxu3  ;;  %v3748_v45 = vpop.f32.mrf.mxu0 }
 0x49c   :  { %v3749_v48 = vadd.f32 %v3748_v45, %v6416_v51  ;;  %v3797_v47 = vpop.f32.mrf.mxu1 }
 0x49d   :  { %v3893_v14 = vadd.f32 %v3892_v21, %v3844_v18 }
 0x49e   :  { %v3798_v7 = vadd.f32 %v3797_v47, %v3749_v48 }
 0x49f   :  { %v3913_v23 = vmax.f32 %v3893_v14, 0.0 }
 0x4a1   :  { %3929 = vst [vmem:[%s6489_s5 + $0x68] sm:$0xff] %v3913_v23 }
 0x4a2   :  { %v3846_v26 = vpop.f32.mrf.mxu2 }
 0x4a3   :  { %v3847_v59 = vadd.f32 %v3846_v26, %v3798_v7  ;;  %v3895_v10 = vpop.f32.mrf.mxu3  ;;  %v3750_v33 = vpop.f32.mrf.mxu0 }
 0x4a4   :  { %v3751_v50 = vadd.f32 %v3750_v33, %v6418_v3  ;;  %v3799_v11 = vpop.f32.mrf.mxu1 }
 0x4a5   :  { %v3896_v39 = vadd.f32 %v3895_v10, %v3847_v59 }
 0x4a6   :  { %v3800_v51 = vadd.f32 %v3799_v11, %v3751_v50 }
 0x4a7   :  { %v3914_v5 = vmax.f32 %v3896_v39, 0.0 }
 0x4a9   :  { %3930 = vst [vmem:[%s6489_s5 + $0x70] sm:$0xff] %v3914_v5 }
 0x4aa   :  { %v3848_v61 = vpop.f32.mrf.mxu2 }
 0x4ab   :  { %v3849_v41 = vadd.f32 %v3848_v61, %v3800_v51  ;;  %v3897_v30 = vpop.f32.mrf.mxu3 }
 0x4ad   :  { %v3898_v52 = vadd.f32 %v3897_v30, %v3849_v41 }
 0x4af   :  { %v3915_v22 = vmax.f32 %v3898_v52, 0.0 }
 0x4b1   :  { %3931 = vst [vmem:[%s6489_s5 + $0x78] sm:$0xff] %v3915_v22 }
 0x4b2   :  { %3936 = vsyncpa [#allocation3], 1 }
 0x4b3   :  { %3937 = vsyncpa [#allocation5], 1 }

</bundles_post_ra>
